<compile_context>
chip_gen: v5e
topology: v5e:2x2
jax: 0.10.0
libtpu: 0.0.40
codegen_flags: <defaults>
</compile_context>

<pallas_src>
import functools

import jax
import jax.numpy as jnp
from jax.experimental import pallas as pl
from jax.experimental.pallas import tpu as pltpu


def _logsoftmax_rows(x):
    # numerically stable log-softmax along the class (last / lane) axis
    m = jnp.max(x, axis=1, keepdims=True)
    z = x - m
    lse = jnp.log(jnp.sum(jnp.exp(z), axis=1, keepdims=True))
    return z - lse


def _ce_soft_kernel(pred_ref, tgt_ref, loss_ref):
    # branch 1: target is a (TN, C) soft-label distribution
    x = pred_ref[...].astype(jnp.float32)            # (TN, C)
    t = tgt_ref[...].astype(jnp.float32)             # (TN, C)
    logp = _logsoftmax_rows(x)
    loss = -jnp.sum(logp * t, axis=1)                # (TN,)
    loss_ref[...] = loss[None, :]                    # lane-dense (1, TN) store


def _ce_hard_kernel(pred_ref, tgt_ref, loss_ref, *, class_num, label_smooth):
    # branches 2 & 3: target is (TN, 1) int class indices
    x = pred_ref[...].astype(jnp.float32)            # (TN, C)
    idx = tgt_ref[...]                               # (TN, 1) int32
    n, c = x.shape
    logp = _logsoftmax_rows(x)                       # (TN, C)
    classes = jax.lax.broadcasted_iota(jnp.int32, (n, c), 1)
    logp_at_t = jnp.sum(jnp.where(classes == idx, logp, 0.0), axis=1)  # (TN,)
    if label_smooth is not None:
        # smoothed target == lo off-class, hi on-class (== clamp(one_hot, lo, hi))
        # NOTE: lo uses class_num (module quirk); assumes class_num == pred.shape[1].
        lo = label_smooth / (class_num - 1)
        hi = 1.0 - label_smooth
        loss = -(lo * jnp.sum(logp, axis=1) + (hi - lo) * logp_at_t)
    else:
        loss = -logp_at_t                            # plain CE, reduction='none'
    loss_ref[...] = loss[None, :]                    # lane-dense (1, TN) store


def ce_loss(pred, target, label_smooth=None, class_num=21, block_rows=1024):
    """Pallas implementation of CELoss.forward (reduction='none')."""
    n, c = pred.shape
    block_rows = max(8, (block_rows // 8) * 8)

    # Keep the double-buffered f32 tiles well under the scoped VMEM limit
    # (16 MiB default on v5e, 32 MiB on v6e/v7x): ~4 tile buffers of tn*c*4 B.
    vmem_budget = 8 * 1024 * 1024
    tn_cap = max(128, (vmem_budget // (c * 4 * 4)) // 128 * 128)
    tn = min(block_rows, tn_cap)
    if n < tn:
        tn = max(8, ((n + 7) // 8) * 8)              # small problem: one block

    num_blocks = (n + tn - 1) // tn
    n_pad = num_blocks * tn
    pad = n_pad - n

    # No wrapper-side dtype cast; pad the row remainder only when needed.
    pred_p = pred if pad == 0 else jnp.pad(pred, ((0, pad), (0, 0)))

    if target.ndim == 2:
        tgt = target if pad == 0 else jnp.pad(target, ((0, pad), (0, 0)))
        kernel = _ce_soft_kernel
        tgt_spec = pl.BlockSpec((tn, c), lambda i: (i, 0))
    else:
        tgt = target.astype(jnp.int32).reshape(n, 1)
        if pad:
            tgt = jnp.pad(tgt, ((0, pad), (0, 0)))
        kernel = functools.partial(
            _ce_hard_kernel, class_num=class_num, label_smooth=label_smooth
        )
        tgt_spec = pl.BlockSpec((tn, 1), lambda i: (i, 0))

    loss = pl.pallas_call(
        kernel,
        out_shape=jax.ShapeDtypeStruct((num_blocks, tn), jnp.float32),
        grid=(num_blocks,),
        in_specs=[pl.BlockSpec((tn, c), lambda i: (i, 0)), tgt_spec],
        out_specs=pl.BlockSpec((1, tn), lambda i: (i, 0)),
        compiler_params=pltpu.CompilerParams(
            dimension_semantics=("parallel",),
            vmem_limit_bytes=32 * 1024 * 1024,
        ),
    )(pred_p, tgt)
    return loss.reshape(-1)[:n]


# ---------------- pure-JAX references (for correctness checking) -------------
def _ref_soft(pred, target):
    logp = jax.nn.log_softmax(pred.astype(jnp.float32), axis=1)
    return -jnp.sum(logp * target.astype(jnp.float32), axis=1)


def _ref_hard_smooth(pred, target, label_smooth, class_num):
    logp = jax.nn.log_softmax(pred.astype(jnp.float32), axis=1)
    oh = jax.nn.one_hot(target, class_num, dtype=jnp.float32)
    t = jnp.clip(oh, label_smooth / (class_num - 1), 1.0 - label_smooth)
    return -jnp.sum(logp * t, axis=1)


def _ref_hard_plain(pred, target):
    logp = jax.nn.log_softmax(pred.astype(jnp.float32), axis=1)
    return -logp[jnp.arange(pred.shape[0]), target]


if __name__ == "__main__":
    key = jax.random.PRNGKey(0)
    B, H, W, C = 2, 16, 16, 21          # segmentation-ish: 512 pixels, 21 classes
    N = B * H * W
    k1, k2, k3 = jax.random.split(key, 3)

    pred = jax.random.normal(k1, (N, C), dtype=jnp.float32)
    target_idx = jax.random.randint(k2, (N,), 0, C, dtype=jnp.int32)
    target_soft = jax.nn.softmax(
        jax.random.normal(k3, (N, C), dtype=jnp.float32), axis=1
    )

    # branch 1: 2D soft targets
    out_soft = jax.block_until_ready(ce_loss(pred, target_soft, class_num=C))
    # branch 2: hard targets + label smoothing
    out_smooth = jax.block_until_ready(
        ce_loss(pred, target_idx, label_smooth=0.1, class_num=C)
    )
    # branch 3: hard targets, plain cross-entropy (reduction='none')
    out_plain = jax.block_until_ready(ce_loss(pred, target_idx, class_num=C))
    # multi-block grid + row-remainder padding path
    out_multi = jax.block_until_ready(
        ce_loss(pred[:300], target_idx[:300], label_smooth=0.1, class_num=C,
                block_rows=128)
    )

    ok = True
    ok &= bool(jnp.allclose(out_soft, _ref_soft(pred, target_soft), atol=1e-5))
    ok &= bool(
        jnp.allclose(out_smooth, _ref_hard_smooth(pred, target_idx, 0.1, C), atol=1e-5)
    )
    ok &= bool(jnp.allclose(out_plain, _ref_hard_plain(pred, target_idx), atol=1e-5))
    ok &= bool(
        jnp.allclose(
            out_multi, _ref_hard_smooth(pred[:300], target_idx[:300], 0.1, C),
            atol=1e-5,
        )
    )

    if ok:
        print("KERNEL_OK")
    else:
        raise SystemExit("mismatch vs reference")
</pallas_src>

<mosaic_0001>
module attributes {stable_mosaic.version = 11 : i64} {
  func.func @_ce_soft_kernel(%arg0: i32, %arg1: memref<512x21xf32, #tpu.memory_space<vmem>>, %arg2: memref<512x21xf32, #tpu.memory_space<vmem>>, %arg3: memref<1x512xf32, #tpu.memory_space<vmem>>) attributes {dimension_semantics = [#tpu.dimension_semantics<parallel>], iteration_bounds = array<i64: 1>, scalar_prefetch = 0 : i64, scratch_operands = 0 : i64, tpu.core_type = #tpu.core_type<tc>, window_params = [{transform_indices = @transform_0, window_bounds = array<i64: 512, 21>}, {transform_indices = @transform_1, window_bounds = array<i64: 512, 21>}, {transform_indices = @transform_2, window_bounds = array<i64: 1, 512>}]} {
    %c0 = arith.constant 0 : index
    %c0_0 = arith.constant 0 : index
    %0 = vector.load %arg1[%c0, %c0_0] : memref<512x21xf32, #tpu.memory_space<vmem>>, vector<512x21xf32>
    %c0_1 = arith.constant 0 : index
    %c0_2 = arith.constant 0 : index
    %1 = vector.load %arg2[%c0_1, %c0_2] : memref<512x21xf32, #tpu.memory_space<vmem>>, vector<512x21xf32>
    %cst = arith.constant dense<0xFF800000> : vector<512xf32>
    %2 = vector.multi_reduction <maximumf>, %0, %cst [1] : vector<512x21xf32> to vector<512xf32>
    %3 = vector.shape_cast %2 : vector<512xf32> to vector<512x1xf32>
    %4 = vector.broadcast %3 : vector<512x1xf32> to vector<512x21xf32>
    %5 = arith.subf %0, %4 : vector<512x21xf32>
    %6 = math.exp %5 : vector<512x21xf32>
    %cst_3 = arith.constant dense<0.000000e+00> : vector<512xf32>
    %7 = vector.multi_reduction <add>, %6, %cst_3 [1] : vector<512x21xf32> to vector<512xf32>
    %8 = vector.shape_cast %7 : vector<512xf32> to vector<512x1xf32>
    %9 = math.log %8 : vector<512x1xf32>
    %10 = vector.broadcast %9 : vector<512x1xf32> to vector<512x21xf32>
    %11 = arith.subf %5, %10 : vector<512x21xf32>
    %12 = arith.mulf %11, %1 : vector<512x21xf32>
    %cst_4 = arith.constant dense<0.000000e+00> : vector<512xf32>
    %13 = vector.multi_reduction <add>, %12, %cst_4 [1] : vector<512x21xf32> to vector<512xf32>
    %cst_5 = arith.constant 0.000000e+00 : f32
    %14 = vector.broadcast %cst_5 : f32 to vector<512xf32>
    %15 = arith.subf %14, %13 : vector<512xf32>
    %16 = vector.shape_cast %15 : vector<512xf32> to vector<1x512xf32>
    %c0_6 = arith.constant 0 : index
    %c0_7 = arith.constant 0 : index
    %17 = vector.load %arg3[%c0_6, %c0_7] : memref<1x512xf32, #tpu.memory_space<vmem>>, vector<1x512xf32>
    tpu.vector_store %arg3[%c0_6, %c0_7], %16 {strides = array<i32>} : memref<1x512xf32, #tpu.memory_space<vmem>>, vector<1x512xf32>,
    return
  }
  func.func @transform_0(%arg0: i32) -> (i32, i32) {
    %c0_i32 = arith.constant 0 : i32
    %c0_i32_0 = arith.constant 0 : i32
    return %arg0, %c0_i32 : i32, i32
  }
  func.func @transform_1(%arg0: i32) -> (i32, i32) {
    %c0_i32 = arith.constant 0 : i32
    %c0_i32_0 = arith.constant 0 : i32
    return %arg0, %c0_i32 : i32, i32
  }
  func.func @transform_2(%arg0: i32) -> (i32, i32) {
    %c0_i32 = arith.constant 0 : i32
    %c0_i32_0 = arith.constant 0 : i32
    return %arg0, %c0_i32 : i32, i32
  }
}

</mosaic_0001>

<bundles_post_ra>
// kernel: tpu_custom_call.1
= control target key start
LH: loop header
LB: loop body
LE: loop exit
PB: predicated region body
PF: predicated region fallthrough
CT: control target
= control target key end

     0   :  { %vm140_vm0 = vcmask 171008   ;;  %s4873_s0 = inlined_call_operand.vmem [shape: f32[512,21], index: 0, kind: input, shape index: {}]   ;;  %s4874_s1 = inlined_call_operand.vmem [shape: f32[512,21], index: 1, kind: input, shape index: {}]   ;;  %s4875_s2 = inlined_call_operand.hbm [shape: f32[1,512], index: 2, kind: output, shape index: {}]  }
   0x1   :  { %v3074_v0 = vld [vmem:[%s4873_s0 + $0x20] sm:$0xff]  ;;  %v3079_v1 = vld [vmem:[%s4873_s0 + $0x10] sm:$0xff]  ;;  %v3095_v6 = vld [vmem:[%s4873_s0 + $0x28] sm:$0xff] }
   0x2   :  { %v3084_v2 = vld [vmem:[%s4873_s0] sm:$0xff]  ;;  %v153_v3 = vsel %vm140_vm0, %v3074_v0, -inf  ;;  %v147_v4 = vsel %vm140_vm0, %v3079_v1, -inf  ;;  %v3100_v7 = vld [vmem:[%s4873_s0 + $0x18] sm:$0xff]  ;;  %v3105_v8 = vld [vmem:[%s4873_s0 + $0x8] sm:$0xff] }
   0x3   :  { %v141_v5 = vsel %vm140_vm0, %v3084_v2, -inf  ;;  %154 = vmax.xlane.f32.xlu2 %v153_v3  ;;  %148 = vmax.xlane.f32.xlu1 %v147_v4 }
   0x4   :  { %142 = vmax.xlane.f32.xlu0 %v141_v5 }
   0x5   :  { %7 = vsyncpa [#allocation3], 0  ;;  %v156_v9 = vsel %vm140_vm0, %v3095_v6, -inf  ;;  %v150_v10 = vsel %vm140_vm0, %v3100_v7, -inf  ;;  %v144_v11 = vsel %vm140_vm0, %v3105_v8, -inf  ;;  %v3116_v12 = vld [vmem:[%s4873_s0 + $0x40] sm:$0xff] }
   0x6   :  { %v3121_v13 = vld [vmem:[%s4873_s0 + $0x38] sm:$0xff]  ;;  %v3126_v14 = vld [vmem:[%s4873_s0 + $0x30] sm:$0xff]  ;;  %v165_v15 = vsel %vm140_vm0, %v3116_v12, -inf  ;;  %v3147_v20 = vld [vmem:[%s4873_s0 + $0x48] sm:$0xff]  ;;  %vm2585_vm1 = vcmask 130112   ;;  %vm2589_vm2 = vcmask 195712  }
   0x7   :  { %v162_v16 = vsel %vm140_vm0, %v3121_v13, -inf  ;;  %v159_v17 = vsel %vm140_vm0, %v3126_v14, -inf  ;;  %v3137_v18 = vld [vmem:[%s4873_s0 + $0x58] sm:$0xff]  ;;  %v3142_v19 = vld [vmem:[%s4873_s0 + $0x50] sm:$0xff]  ;;  %v168_v23 = vsel %vm140_vm0, %v3147_v20, -inf  ;;  %v3163_v25 = vld [vmem:[%s4873_s0 + $0x68] sm:$0xff] }
   0x8   :  { %v174_v21 = vsel %vm140_vm0, %v3137_v18, -inf  ;;  %v171_v22 = vsel %vm140_vm0, %v3142_v19, -inf  ;;  %v3158_v24 = vld [vmem:[%s4873_s0 + $0x70] sm:$0xff]  ;;  %v3168_v26 = vld [vmem:[%s4873_s0 + $0x60] sm:$0xff]  ;;  %v180_v28 = vsel %vm140_vm0, %v3163_v25, -inf  ;;  %v3179_v30 = vld [vmem:[%s4873_s0 + $0x88] sm:$0xff] }
   0x9   :  { %v183_v27 = vsel %vm140_vm0, %v3158_v24, -inf  ;;  %v177_v29 = vsel %vm140_vm0, %v3168_v26, -inf  ;;  %v3184_v31 = vld [vmem:[%s4873_s0 + $0x80] sm:$0xff]  ;;  %v3189_v32 = vld [vmem:[%s4873_s0 + $0x78] sm:$0xff]  ;;  %v192_v33 = vsel %vm140_vm0, %v3179_v30, -inf  ;;  %v3210_v38 = vld [vmem:[%s4873_s0 + $0x90] sm:$0xff] }
   0xa   :  { %v189_v34 = vsel %vm140_vm0, %v3184_v31, -inf  ;;  %v186_v35 = vsel %vm140_vm0, %v3189_v32, -inf  ;;  %v3200_v36 = vld [vmem:[%s4873_s0 + $0xa0] sm:$0xff]  ;;  %v3205_v37 = vld [vmem:[%s4873_s0 + $0x98] sm:$0xff]  ;;  %v195_v41 = vsel %vm140_vm0, %v3210_v38, -inf  ;;  %v3226_v43 = vld [vmem:[%s4873_s0 + $0xb0] sm:$0xff] }
   0xb   :  { %157 = vmax.xlane.f32.xlu2 %v156_v9  ;;  %151 = vmax.xlane.f32.xlu1 %v150_v10  ;;  %v201_v39 = vsel %vm140_vm0, %v3200_v36, -inf  ;;  %v198_v40 = vsel %vm140_vm0, %v3205_v37, -inf  ;;  %v3221_v42 = vld [vmem:[%s4873_s0 + $0xb8] sm:$0xff]  ;;  %v3231_v44 = vld [vmem:[%s4873_s0 + $0xa8] sm:$0xff]  ;;  %v207_v46 = vsel %vm140_vm0, %v3226_v43, -inf  ;;  %v3242_v48 = vld [vmem:[%s4873_s0 + $0xd0] sm:$0xff] }
   0xc   :  { %145 = vmax.xlane.f32.xlu0 %v144_v11  ;;  %v210_v45 = vsel %vm140_vm0, %v3221_v42, -inf  ;;  %v204_v47 = vsel %vm140_vm0, %v3231_v44, -inf  ;;  %v3247_v49 = vld [vmem:[%s4873_s0 + $0xc8] sm:$0xff]  ;;  %v3252_v50 = vld [vmem:[%s4873_s0 + $0xc0] sm:$0xff]  ;;  %v219_v51 = vsel %vm140_vm0, %v3242_v48, -inf  ;;  %v3273_v56 = vld [vmem:[%s4873_s0 + $0xd8] sm:$0xff] }
   0xd   :  { %v216_v52 = vsel %vm140_vm0, %v3247_v49, -inf  ;;  %v213_v53 = vsel %vm140_vm0, %v3252_v50, -inf  ;;  %v3263_v54 = vld [vmem:[%s4873_s0 + $0xe8] sm:$0xff]  ;;  %v3268_v55 = vld [vmem:[%s4873_s0 + $0xe0] sm:$0xff]  ;;  %v222_v59 = vsel %vm140_vm0, %v3273_v56, -inf  ;;  %v3289_v61 = vld [vmem:[%s4873_s0 + $0xf8] sm:$0xff] }
   0xe   :  { %v228_v57 = vsel %vm140_vm0, %v3263_v54, -inf  ;;  %v225_v58 = vsel %vm140_vm0, %v3268_v55, -inf  ;;  %v3284_v60 = vld [vmem:[%s4873_s0 + $0x100] sm:$0xff]  ;;  %v3294_v62 = vld [vmem:[%s4873_s0 + $0xf0] sm:$0xff]  ;;  %v234_v3 = vsel %vm140_vm0, %v3289_v61, -inf  ;;  %v3305_v5 = vld [vmem:[%s4873_s0 + $0x118] sm:$0xff] }
   0xf   :  { %v237_v63 = vsel %vm140_vm0, %v3284_v60, -inf  ;;  %v231_v4 = vsel %vm140_vm0, %v3294_v62, -inf  ;;  %v3310_v9 = vld [vmem:[%s4873_s0 + $0x110] sm:$0xff]  ;;  %v3315_v10 = vld [vmem:[%s4873_s0 + $0x108] sm:$0xff]  ;;  %v246_v11 = vsel %vm140_vm0, %v3305_v5, -inf  ;;  %vm2593_vm3 = vcmask 261312  }
  0x10   :  { %vm2597_vm4 = vcmask 326912   ;;  %vm2601_vm5 = vcmask 392512   ;;  %vm2605_vm6 = vcmask 458112   ;;  %vm2609_vm7 = vcmask 523712   ;;  %s2758_s11 = sshll.u32 %s4875_s2, 4  ;;  %s2759_s11 = int_to_ptr.hbm [resolvable:$true] %s2758_s11 }
  0x11   :  { %vm2613_vm8 = vcmask 589312   ;;  %vm2617_vm9 = vcmask 654912   ;;  %vm2621_vm10 = vcmask 720512   ;;  %vm2625_vm11 = vcmask 786112  }
  0x12   :  { %vm2629_vm12 = vcmask 851712   ;;  %vm2633_vm13 = vcmask 917312   ;;  %vm2637_vm14 = vcmask 982912   ;;  %vm2641_vm15 = vcmask 1048512  }
  0x13   :  { %166 = vmax.xlane.f32.xlu2 %v165_v15  ;;  %163 = vmax.xlane.f32.xlu1 %v162_v16  ;;  %v243_v15 = vsel %vm140_vm0, %v3310_v9, -inf  ;;  %v240_v16 = vsel %vm140_vm0, %v3315_v10, -inf }
  0x14   :  { %160 = vmax.xlane.f32.xlu0 %v159_v17  ;;  %v3326_v17 = vld [vmem:[%s4873_s0 + $0x130] sm:$0xff] }
  0x15   :  { %4928 = vst [vmem:[#allocation5_spill] sm:$0xff] %v3326_v17 }
  0x1b   :  { %175 = vmax.xlane.f32.xlu2 %v174_v21  ;;  %172 = vmax.xlane.f32.xlu1 %v171_v22  ;;  %v3331_v21 = vld [vmem:[%s4873_s0 + $0x128] sm:$0xff]  ;;  %v3336_v22 = vld [vmem:[%s4873_s0 + $0x120] sm:$0xff] }
  0x1c   :  { %169 = vmax.xlane.f32.xlu0 %v168_v23  ;;  %v255_v23 = vsel %vm140_vm0, %v3326_v17, -inf }
  0x23   :  { %184 = vmax.xlane.f32.xlu2 %v183_v27  ;;  %181 = vmax.xlane.f32.xlu1 %v180_v28  ;;  %v252_v27 = vsel %vm140_vm0, %v3331_v21, -inf  ;;  %v249_v28 = vsel %vm140_vm0, %v3336_v22, -inf }
  0x24   :  { %178 = vmax.xlane.f32.xlu0 %v177_v29  ;;  %v3347_v29 = vld [vmem:[%s4873_s0 + $0x148] sm:$0xff] }
  0x25   :  { %4929 = vst [vmem:[#allocation6_spill] sm:$0xff] %v3347_v29 }
  0x2b   :  { %193 = vmax.xlane.f32.xlu2 %v192_v33  ;;  %190 = vmax.xlane.f32.xlu1 %v189_v34  ;;  %v3352_v33 = vld [vmem:[%s4873_s0 + $0x140] sm:$0xff]  ;;  %v3357_v34 = vld [vmem:[%s4873_s0 + $0x138] sm:$0xff] }
  0x2c   :  { %187 = vmax.xlane.f32.xlu0 %v186_v35  ;;  %4930 = vst [vmem:[#allocation7_spill] sm:$0xff] %v3357_v34  ;;  %v264_v35 = vsel %vm140_vm0, %v3347_v29, -inf }
  0x33   :  { %202 = vmax.xlane.f32.xlu2 %v201_v39  ;;  %199 = vmax.xlane.f32.xlu1 %v198_v40  ;;  %v261_v39 = vsel %vm140_vm0, %v3352_v33, -inf  ;;  %v258_v40 = vsel %vm140_vm0, %v3357_v34, -inf }
  0x34   :  { %196 = vmax.xlane.f32.xlu0 %v195_v41  ;;  %v3368_v41 = vld [vmem:[%s4873_s0 + $0x160] sm:$0xff] }
  0x35   :  { %4931 = vst [vmem:[#allocation8_spill] sm:$0xff] %v3368_v41 }
  0x3b   :  { %211 = vmax.xlane.f32.xlu2 %v210_v45  ;;  %208 = vmax.xlane.f32.xlu1 %v207_v46  ;;  %v3373_v45 = vld [vmem:[%s4873_s0 + $0x158] sm:$0xff]  ;;  %v3378_v46 = vld [vmem:[%s4873_s0 + $0x150] sm:$0xff] }
  0x3c   :  { %205 = vmax.xlane.f32.xlu0 %v204_v47  ;;  %4932 = vst [vmem:[#allocation9_spill] sm:$0xff] %v3373_v45  ;;  %v273_v47 = vsel %vm140_vm0, %v3368_v41, -inf }
  0x3d   :  { %4933 = vst [vmem:[#allocation10_spill] sm:$0xff] %v3378_v46 }
  0x43   :  { %220 = vmax.xlane.f32.xlu2 %v219_v51  ;;  %217 = vmax.xlane.f32.xlu1 %v216_v52  ;;  %v270_v51 = vsel %vm140_vm0, %v3373_v45, -inf  ;;  %v267_v52 = vsel %vm140_vm0, %v3378_v46, -inf }
  0x44   :  { %214 = vmax.xlane.f32.xlu0 %v213_v53  ;;  %v3389_v53 = vld [vmem:[%s4873_s0 + $0x178] sm:$0xff] }
  0x45   :  { %4934 = vst [vmem:[#allocation11_spill] sm:$0xff] %v3389_v53 }
  0x4b   :  { %229 = vmax.xlane.f32.xlu2 %v228_v57  ;;  %226 = vmax.xlane.f32.xlu1 %v225_v58  ;;  %v3394_v57 = vld [vmem:[%s4873_s0 + $0x170] sm:$0xff] }
  0x4c   :  { %223 = vmax.xlane.f32.xlu0 %v222_v59  ;;  %4935 = vst [vmem:[#allocation12_spill] sm:$0xff] %v3394_v57 }
  0x53   :  { %238 = vmax.xlane.f32.xlu2 %v237_v63  ;;  %235 = vmax.xlane.f32.xlu1 %v234_v3  ;;  %v3403_v63 = vld [vmem:[%s4873_s0 + $0x168] sm:$0xff] }
  0x54   :  { %232 = vmax.xlane.f32.xlu0 %v231_v4  ;;  %4936 = vst [vmem:[#allocation13_spill] sm:$0xff] %v3403_v63  ;;  %v282_v4 = vsel %vm140_vm0, %v3389_v53, -inf }
  0x5b   :  { %247 = vmax.xlane.f32.xlu2 %v246_v11  ;;  %244 = vmax.xlane.f32.xlu1 %v243_v15  ;;  %v279_v11 = vsel %vm140_vm0, %v3394_v57, -inf  ;;  %v276_v15 = vsel %vm140_vm0, %v3403_v63, -inf  ;;  %v3491_v63 = vld [vmem:[%s4873_s0 + $0x1d8] sm:$0xff]  ;;  %v3496_v57 = vld [vmem:[%s4873_s0 + $0x1d0] sm:$0xff] }
  0x5c   :  { %241 = vmax.xlane.f32.xlu0 %v240_v16  ;;  %v3414_v16 = vld [vmem:[%s4873_s0 + $0x190] sm:$0xff]  ;;  %4946 = vst [vmem:[#allocation23_spill] sm:$0xff] %v3491_v63 }
  0x5d   :  { %4937 = vst [vmem:[#allocation14_spill] sm:$0xff] %v3414_v16 }
  0x5e   :  { %4947 = vst [vmem:[#allocation24_spill] sm:$0xff] %v3496_v57 }
  0x63   :  { %256 = vmax.xlane.f32.xlu2 %v255_v23  ;;  %253 = vmax.xlane.f32.xlu1 %v252_v27  ;;  %v3419_v23 = vld [vmem:[%s4873_s0 + $0x188] sm:$0xff] }
  0x64   :  { %250 = vmax.xlane.f32.xlu0 %v249_v28  ;;  %4938 = vst [vmem:[#allocation15_spill] sm:$0xff] %v3419_v23 }
  0x6b   :  { %265 = vmax.xlane.f32.xlu2 %v264_v35  ;;  %262 = vmax.xlane.f32.xlu1 %v261_v39  ;;  %v3426_v35 = vld [vmem:[%s4873_s0 + $0x180] sm:$0xff] }
  0x6c   :  { %259 = vmax.xlane.f32.xlu0 %v258_v40  ;;  %4939 = vst [vmem:[#allocation16_spill] sm:$0xff] %v3426_v35  ;;  %v291_v40 = vsel %vm140_vm0, %v3414_v16, -inf }
  0x73   :  { %274 = vmax.xlane.f32.xlu2 %v273_v47  ;;  %271 = vmax.xlane.f32.xlu1 %v270_v51  ;;  %v288_v47 = vsel %vm140_vm0, %v3419_v23, -inf  ;;  %v285_v51 = vsel %vm140_vm0, %v3426_v35, -inf  ;;  %v3464_v35 = vld [vmem:[%s4873_s0 + $0x1c0] sm:$0xff]  ;;  %v3469_v23 = vld [vmem:[%s4873_s0 + $0x1b8] sm:$0xff] }
  0x74   :  { %268 = vmax.xlane.f32.xlu0 %v267_v52  ;;  %v3437_v52 = vld [vmem:[%s4873_s0 + $0x1a8] sm:$0xff]  ;;  %4943 = vst [vmem:[#allocation20_spill] sm:$0xff] %v3464_v35 }
  0x75   :  { %4940 = vst [vmem:[#allocation17_spill] sm:$0xff] %v3437_v52 }
  0x76   :  { %v3396_v58 = vpop.xlane.xlu2 %154  ;;  %v3398_v59 = vpop.xlane.xlu1 %148  ;;  %4944 = vst [vmem:[#allocation21_spill] sm:$0xff] %v3469_v23 }
  0x77   :  { %v143_v3 = vpop.xlane.xlu0 %142  ;;  %v3559_v34 = vsub.f32 %v3079_v1, %v3398_v59 }
  0x7b   :  { %283 = vmax.xlane.f32.xlu2 %v282_v4  ;;  %280 = vmax.xlane.f32.xlu1 %v279_v11  ;;  %v3442_v4 = vld [vmem:[%s4873_s0 + $0x1a0] sm:$0xff] }
  0x7c   :  { %277 = vmax.xlane.f32.xlu0 %v276_v15  ;;  %4941 = vst [vmem:[#allocation18_spill] sm:$0xff] %v3442_v4  ;;  %v297_v16 = vsel %vm140_vm0, %v3442_v4, -inf }
  0x7e   :  { %v3421_v27 = vpop.xlane.xlu2 %157  ;;  %v152_v28 = vpop.xlane.xlu1 %151 }
  0x7f   :  { %v146_v39 = vpop.xlane.xlu0 %145 }
  0x80   :  { %v3517_v46 = vsub.f32 %v3105_v8, %v146_v39  ;;  %v3531_v8 = vld [vmem:[%s4873_s0 + $0x1e8] sm:$0xff] }
  0x82   :  { %4950 = vst [vmem:[#allocation27_spill] sm:$0xff] %v3517_v46 }
  0x83   :  { %292 = vmax.xlane.f32.xlu2 %v291_v40  ;;  %289 = vmax.xlane.f32.xlu1 %v288_v47  ;;  %v3451_v40 = vld [vmem:[%s4873_s0 + $0x198] sm:$0xff] }
  0x84   :  { %286 = vmax.xlane.f32.xlu0 %v285_v51  ;;  %4942 = vst [vmem:[#allocation19_spill] sm:$0xff] %v3451_v40  ;;  %v300_v51 = vsel %vm140_vm0, %v3437_v52, -inf  ;;  %v294_v53 = vsel %vm140_vm0, %v3451_v40, -inf  ;;  %v306_v40 = vsel %vm140_vm0, %v3469_v23, -inf  ;;  %v315_v23 = vsel %vm140_vm0, %v3496_v57, -inf }
  0x86   :  { %v3444_v11 = vpop.xlane.xlu2 %166  ;;  %v3446_v15 = vpop.xlane.xlu1 %163 }
  0x87   :  { %v3453_v47 = vpop.xlane.xlu0 %160  ;;  %v3577_v59 = vsub.f32 %v3121_v13, %v3446_v15 }
  0x89   :  { %4954 = vst [vmem:[#allocation31_spill] sm:$0xff] %v3577_v59  ;;  %v411_v13 = vmul.f32 1.442695, %v3577_v59 }
  0x8b   :  { %301 = vmax.xlane.f32.xlu2 %v300_v51  ;;  %298 = vmax.xlane.f32.xlu1 %v297_v16  ;;  %v3478_v51 = vld [vmem:[%s4873_s0 + $0x1b0] sm:$0xff]  ;;  %v309_v16 = vsel %vm140_vm0, %v3464_v35, -inf }
  0x8c   :  { %295 = vmax.xlane.f32.xlu0 %v294_v53  ;;  %4945 = vst [vmem:[#allocation22_spill] sm:$0xff] %v3478_v51  ;;  %v303_v4 = vsel %vm140_vm0, %v3478_v51, -inf  ;;  %v318_v51 = vsel %vm140_vm0, %v3491_v63, -inf  ;;  %v3553_v63 = vsub.f32 %v3100_v7, %v152_v28 }
  0x8e   :  { %v3471_v52 = vpop.xlane.xlu2 %175  ;;  %v3473_v41 = vpop.xlane.xlu1 %172  ;;  %4953 = vst [vmem:[#allocation30_spill] sm:$0xff] %v3553_v63 }
  0x8f   :  { %v3480_v53 = vpop.xlane.xlu0 %169 }
  0x93   :  { %310 = vmax.xlane.f32.xlu2 %v309_v16  ;;  %307 = vmax.xlane.f32.xlu1 %v306_v40  ;;  %v3505_v16 = vld [vmem:[%s4873_s0 + $0x1c8] sm:$0xff]  ;;  %v3510_v40 = vsub.f32 %v3084_v2, %v143_v3  ;;  %v399_v2 = vmul.f32 1.442695, %v3517_v46  ;;  %v3526_v3 = vld [vmem:[%s4873_s0 + $0x1f0] sm:$0xff] }
  0x94   :  { %304 = vmax.xlane.f32.xlu0 %v303_v4  ;;  %4948 = vst [vmem:[#allocation25_spill] sm:$0xff] %v3505_v16  ;;  %v312_v45 = vsel %vm140_vm0, %v3505_v16, -inf  ;;  %v327_v46 = vsel %vm140_vm0, %v3526_v3, -inf }
  0x95   :  { %4949 = vst [vmem:[#allocation26_spill] sm:$0xff] %v3510_v40  ;;  %v397_v17 = vmul.f32 1.442695, %v3510_v40  ;;  %v324_v40 = vsel %vm140_vm0, %v3531_v8, -inf }
  0x96   :  { %v3498_v35 = vpop.xlane.xlu2 %184  ;;  %v3500_v29 = vpop.xlane.xlu1 %181  ;;  %4951 = vst [vmem:[#allocation28_spill] sm:$0xff] %v3526_v3  ;;  %v401_v3 = vmul.f32 1.442695, %v3559_v34 }
  0x97   :  { %v3507_v4 = vpop.xlane.xlu0 %178  ;;  %2772 = vpow2.f32 %v397_v17  ;;  %v403_v17 = vmul.f32 1.442695, %v3553_v63 }
  0x98   :  { %2774 = vpow2.f32 %v399_v2  ;;  %v3571_v2 = vld [vmem:[%s4873_s0 + $0x1f8] sm:$0xff] }
  0x9b   :  { %319 = vmax.xlane.f32.xlu2 %v318_v51  ;;  %316 = vmax.xlane.f32.xlu1 %v315_v23  ;;  %v3546_v51 = vsub.f32 %v3074_v0, %v3396_v58 }
  0x9c   :  { %313 = vmax.xlane.f32.xlu0 %v312_v45  ;;  %v3540_v45 = vld [vmem:[%s4873_s0 + $0x1e0] sm:$0xff] }
  0x9d   :  { %4952 = vst [vmem:[#allocation29_spill] sm:$0xff] %v3546_v51  ;;  %v321_v16 = vsel %vm140_vm0, %v3540_v45, -inf  ;;  %v405_v0 = vmul.f32 1.442695, %v3546_v51  ;;  %v2773_v58 = vpop.eup %2772  ;;  %v3587_v51 = vsub.f32 %v3095_v6, %v3421_v27 }
  0x9e   :  { %v3533_v39 = vpop.xlane.xlu2 %193  ;;  %v3535_v57 = vpop.xlane.xlu1 %190  ;;  %v525_v63 = vsel %vm140_vm0, %v2773_v58, 0.0 }
  0x9f   :  { %v3542_v23 = vpop.xlane.xlu0 %187  ;;  %v2775_v1 = vpop.eup %2774  ;;  %2776 = vpow2.f32 %v405_v0 }
  0xa0   :  { %2778 = vpow2.f32 %v403_v17  ;;  %v528_v0 = vsel %vm140_vm0, %v2775_v1, 0.0  ;;  %v3606_v1 = vsub.f32 %v3147_v20, %v3480_v53 }
  0xa1   :  { %2780 = vpow2.f32 %v401_v3 }
  0xa2   :  { %2782 = vpow2.f32 %v411_v13 }
  0xa3   :  { %328 = vmax.xlane.f32.xlu2 %v327_v46  ;;  %325 = vmax.xlane.f32.xlu1 %v324_v40  ;;  %v330_v40 = vsel %vm140_vm0, %v3571_v2, -inf }
  0xa4   :  { %322 = vmax.xlane.f32.xlu0 %v321_v16  ;;  %v3581_v16 = vsub.f32 %v3126_v14, %v3453_v47  ;;  %v407_v47 = vmul.f32 1.442695, %v3587_v51 }
  0xa5   :  { %v2777_v15 = vpop.eup %2776 }
  0xa6   :  { %v3564_v7 = vpop.xlane.xlu2 %202  ;;  %v3566_v28 = vpop.xlane.xlu1 %199  ;;  %v409_v14 = vmul.f32 1.442695, %v3581_v16  ;;  %v537_v59 = vsel %vm140_vm0, %v2777_v15, 0.0 }
  0xa7   :  { %v3573_v46 = vpop.xlane.xlu0 %196  ;;  %v2779_v6 = vpop.eup %2778 }
  0xa8   :  { %v2781_v58 = vpop.eup %2780  ;;  %2784 = vpow2.f32 %v409_v14 }
  0xa9   :  { %2786 = vpow2.f32 %v407_v47  ;;  %v531_v13 = vsel %vm140_vm0, %v2781_v58, 0.0  ;;  %v2783_v20 = vpop.eup %2782  ;;  %v3634_v58 = vsub.f32 %v3137_v18, %v3471_v52 }
  0xab   :  { %526 = vadd.xlane.f32.xlu1 %v525_v63  ;;  %529 = vadd.xlane.f32.xlu2 %v528_v0  ;;  %v3602_v63 = vsub.f32 %v3142_v19, %v3473_v41  ;;  %v534_v0 = vsel %vm140_vm0, %v2779_v6, 0.0  ;;  %v415_v41 = vmul.f32 1.442695, %v3606_v1  ;;  %v3630_v6 = vsub.f32 %v3168_v26, %v3507_v4 }
  0xac   :  { %331 = vmax.xlane.f32.xlu0 %v330_v40  ;;  %v3610_v40 = vsub.f32 %v3116_v12, %v3444_v11  ;;  %v419_v4 = vmul.f32 1.442695, %v3634_v58 }
  0xad   :  { %v417_v19 = vmul.f32 1.442695, %v3602_v63 }
  0xae   :  { %v3594_v17 = vpop.xlane.xlu2 %211  ;;  %v3596_v3 = vpop.xlane.xlu1 %208  ;;  %v413_v53 = vmul.f32 1.442695, %v3610_v40 }
  0xaf   :  { %v3598_v27 = vpop.xlane.xlu0 %205  ;;  %v2785_v11 = vpop.eup %2784  ;;  %2788 = vpow2.f32 %v417_v19 }
  0xb0   :  { %v2787_v15 = vpop.eup %2786  ;;  %2790 = vpow2.f32 %v415_v41 }
  0xb1   :  { %2792 = vpow2.f32 %v413_v53  ;;  %v540_v19 = vsel %vm140_vm0, %v2787_v15, 0.0  ;;  %v3654_v15 = vsub.f32 %v3189_v32, %v3542_v23 }
  0xb3   :  { %535 = vadd.xlane.f32.xlu1 %v534_v0  ;;  %538 = vadd.xlane.f32.xlu2 %v537_v59  ;;  %v3626_v59 = vsub.f32 %v3163_v25, %v3500_v29  ;;  %v546_v0 = vsel %vm140_vm0, %v2783_v20, 0.0  ;;  %v421_v29 = vmul.f32 1.442695, %v3630_v6 }
  0xb4   :  { %532 = vadd.xlane.f32.xlu0 %v531_v13  ;;  %v543_v13 = vsel %vm140_vm0, %v2785_v11, 0.0  ;;  %v3650_v11 = vsub.f32 %v3184_v31, %v3535_v57  ;;  %v427_v57 = vmul.f32 1.442695, %v3654_v15 }
  0xb5   :  { %v423_v25 = vmul.f32 1.442695, %v3626_v59  ;;  %v2789_v26 = vpop.eup %2788 }
  0xb6   :  { %v3618_v14 = vpop.xlane.xlu2 %220  ;;  %v3620_v12 = vpop.xlane.xlu1 %217  ;;  %v429_v31 = vmul.f32 1.442695, %v3650_v11 }
  0xb7   :  { %v3622_v47 = vpop.xlane.xlu0 %214  ;;  %v2791_v52 = vpop.eup %2790  ;;  %2794 = vpow2.f32 %v423_v25 }
  0xb8   :  { %v2793_v53 = vpop.eup %2792  ;;  %2796 = vpow2.f32 %v421_v29 }
  0xb9   :  { %2798 = vpow2.f32 %v419_v4  ;;  %v549_v25 = vsel %vm140_vm0, %v2793_v53, 0.0  ;;  %v3678_v53 = vsub.f32 %v3210_v38, %v3573_v46 }
  0xba   :  { %2800 = vpow2.f32 %v429_v31 }
  0xbb   :  { %547 = vadd.xlane.f32.xlu2 %v546_v0  ;;  %544 = vadd.xlane.f32.xlu1 %v543_v13  ;;  %v3658_v0 = vsub.f32 %v3158_v24, %v3498_v35  ;;  %v555_v13 = vsel %vm140_vm0, %v2789_v26, 0.0  ;;  %2802 = vpow2.f32 %v427_v57 }
  0xbc   :  { %541 = vadd.xlane.f32.xlu0 %v540_v19  ;;  %v552_v19 = vsel %vm140_vm0, %v2791_v52, 0.0  ;;  %v3674_v52 = vsub.f32 %v3205_v37, %v3566_v28  ;;  %v433_v28 = vmul.f32 1.442695, %v3678_v53 }
  0xbd   :  { %v2795_v32 = vpop.eup %2794  ;;  %v425_v23 = vmul.f32 1.442695, %v3658_v0 }
  0xbe   :  { %v3642_v41 = vpop.xlane.xlu2 %229  ;;  %v3644_v18 = vpop.xlane.xlu1 %226  ;;  %v435_v37 = vmul.f32 1.442695, %v3674_v52 }
  0xbf   :  { %v3646_v20 = vpop.xlane.xlu0 %223  ;;  %v2797_v35 = vpop.eup %2796  ;;  %2804 = vpow2.f32 %v425_v23 }
  0xc0   :  { %v2799_v4 = vpop.eup %2798  ;;  %2806 = vpow2.f32 %v435_v37 }
  0xc1   :  { %v558_v31 = vsel %vm140_vm0, %v2799_v4, 0.0  ;;  %v2801_v38 = vpop.eup %2800  ;;  %2808 = vpow2.f32 %v433_v28  ;;  %v3702_v4 = vsub.f32 %v3231_v44, %v3598_v27 }
  0xc3   :  { %556 = vadd.xlane.f32.xlu2 %v555_v13  ;;  %553 = vadd.xlane.f32.xlu1 %v552_v19  ;;  %v3682_v13 = vsub.f32 %v3179_v30, %v3533_v39  ;;  %v564_v19 = vsel %vm140_vm0, %v2795_v32, 0.0  ;;  %v2803_v39 = vpop.eup %2802 }
  0xc4   :  { %550 = vadd.xlane.f32.xlu0 %v549_v25  ;;  %v561_v25 = vsel %vm140_vm0, %v2797_v35, 0.0  ;;  %v3698_v35 = vsub.f32 %v3226_v43, %v3596_v3  ;;  %v439_v3 = vmul.f32 1.442695, %v3702_v4 }
  0xc5   :  { %v431_v46 = vmul.f32 1.442695, %v3682_v13  ;;  %v2805_v23 = vpop.eup %2804 }
  0xc6   :  { %v3666_v29 = vpop.xlane.xlu2 %238  ;;  %v3668_v24 = vpop.xlane.xlu1 %235  ;;  %v567_v37 = vsel %vm140_vm0, %v2805_v23, 0.0  ;;  %v441_v43 = vmul.f32 1.442695, %v3698_v35  ;;  %v3726_v23 = vsub.f32 %v3252_v50, %v3622_v47 }
  0xc7   :  { %v3670_v26 = vpop.xlane.xlu0 %232  ;;  %2810 = vpow2.f32 %v431_v46  ;;  %v2807_v44 = vpop.eup %2806 }
  0xc8   :  { %2812 = vpow2.f32 %v441_v43 }
  0xc9   :  { %2814 = vpow2.f32 %v439_v3 }
  0xcb   :  { %565 = vadd.xlane.f32.xlu2 %v564_v19  ;;  %562 = vadd.xlane.f32.xlu1 %v561_v25  ;;  %v3706_v19 = vsub.f32 %v3200_v36, %v3564_v7  ;;  %v573_v25 = vsel %vm140_vm0, %v2801_v38, 0.0  ;;  %v2809_v7 = vpop.eup %2808 }
  0xcc   :  { %559 = vadd.xlane.f32.xlu0 %v558_v31  ;;  %v570_v31 = vsel %vm140_vm0, %v2803_v39, 0.0  ;;  %v3722_v39 = vsub.f32 %v3247_v49, %v3620_v12  ;;  %v445_v12 = vmul.f32 1.442695, %v3726_v23 }
  0xcd   :  { %v437_v27 = vmul.f32 1.442695, %v3706_v19  ;;  %v2811_v46 = vpop.eup %2810 }
  0xce   :  { %v3690_v57 = vpop.xlane.xlu2 %247  ;;  %v3692_v30 = vpop.xlane.xlu1 %244  ;;  %v576_v43 = vsel %vm140_vm0, %v2811_v46, 0.0  ;;  %v447_v49 = vmul.f32 1.442695, %v3722_v39  ;;  %v3750_v46 = vsub.f32 %v3273_v56, %v3646_v20 }
  0xcf   :  { %v3694_v32 = vpop.xlane.xlu0 %241  ;;  %2816 = vpow2.f32 %v437_v27  ;;  %v2813_v50 = vpop.eup %2812 }
  0xd0   :  { %2818 = vpow2.f32 %v447_v49 }
  0xd1   :  { %2820 = vpow2.f32 %v445_v12 }
  0xd3   :  { %574 = vadd.xlane.f32.xlu2 %v573_v25  ;;  %571 = vadd.xlane.f32.xlu1 %v570_v31  ;;  %v3730_v25 = vsub.f32 %v3221_v42, %v3594_v17  ;;  %v582_v31 = vsel %vm140_vm0, %v2807_v44, 0.0  ;;  %v2815_v17 = vpop.eup %2814 }
  0xd4   :  { %568 = vadd.xlane.f32.xlu0 %v567_v37  ;;  %v579_v37 = vsel %vm140_vm0, %v2809_v7, 0.0  ;;  %v3746_v7 = vsub.f32 %v3268_v55, %v3644_v18  ;;  %v451_v18 = vmul.f32 1.442695, %v3750_v46 }
  0xd5   :  { %v443_v47 = vmul.f32 1.442695, %v3730_v25  ;;  %v2817_v27 = vpop.eup %2816 }
  0xd6   :  { %v3714_v28 = vpop.xlane.xlu2 %256  ;;  %v3716_v36 = vpop.xlane.xlu1 %253  ;;  %v585_v49 = vsel %vm140_vm0, %v2817_v27, 0.0  ;;  %v453_v55 = vmul.f32 1.442695, %v3746_v7  ;;  %v3774_v27 = vsub.f32 %v3294_v62, %v3670_v26 }
  0xd7   :  { %v3718_v38 = vpop.xlane.xlu0 %250  ;;  %2822 = vpow2.f32 %v443_v47  ;;  %v2819_v56 = vpop.eup %2818 }
  0xd8   :  { %2824 = vpow2.f32 %v453_v55 }
  0xd9   :  { %2826 = vpow2.f32 %v451_v18 }
  0xdb   :  { %583 = vadd.xlane.f32.xlu2 %v582_v31  ;;  %580 = vadd.xlane.f32.xlu1 %v579_v37  ;;  %v3754_v31 = vsub.f32 %v3242_v48, %v3618_v14  ;;  %v591_v37 = vsel %vm140_vm0, %v2813_v50, 0.0  ;;  %v2821_v14 = vpop.eup %2820 }
  0xdc   :  { %577 = vadd.xlane.f32.xlu0 %v576_v43  ;;  %v588_v43 = vsel %vm140_vm0, %v2815_v17, 0.0  ;;  %v3770_v17 = vsub.f32 %v3289_v61, %v3668_v24  ;;  %v457_v24 = vmul.f32 1.442695, %v3774_v27 }
  0xdd   :  { %v449_v20 = vmul.f32 1.442695, %v3754_v31  ;;  %v2823_v47 = vpop.eup %2822 }
  0xde   :  { %v3738_v3 = vpop.xlane.xlu2 %265  ;;  %v3740_v42 = vpop.xlane.xlu1 %262  ;;  %v594_v55 = vsel %vm140_vm0, %v2823_v47, 0.0  ;;  %v459_v61 = vmul.f32 1.442695, %v3770_v17  ;;  %v3798_v47 = vsub.f32 %v3315_v10, %v3694_v32 }
  0xdf   :  { %v3742_v44 = vpop.xlane.xlu0 %259  ;;  %2828 = vpow2.f32 %v449_v20  ;;  %v2825_v62 = vpop.eup %2824 }
  0xe0   :  { %2830 = vpow2.f32 %v459_v61 }
  0xe1   :  { %2832 = vpow2.f32 %v457_v24 }
  0xe3   :  { %592 = vadd.xlane.f32.xlu2 %v591_v37  ;;  %589 = vadd.xlane.f32.xlu1 %v588_v43  ;;  %v3778_v37 = vsub.f32 %v3263_v54, %v3642_v41  ;;  %v600_v43 = vsel %vm140_vm0, %v2819_v56, 0.0  ;;  %v2827_v41 = vpop.eup %2826 }
  0xe4   :  { %586 = vadd.xlane.f32.xlu0 %v585_v49  ;;  %v597_v49 = vsel %vm140_vm0, %v2821_v14, 0.0  ;;  %v3794_v14 = vsub.f32 %v3310_v9, %v3692_v30  ;;  %v463_v30 = vmul.f32 1.442695, %v3798_v47 }
  0xe5   :  { %v455_v26 = vmul.f32 1.442695, %v3778_v37  ;;  %v2829_v20 = vpop.eup %2828 }
  0xe6   :  { %v3762_v12 = vpop.xlane.xlu2 %274  ;;  %v3764_v48 = vpop.xlane.xlu1 %271  ;;  %4955 = vst [vmem:[#allocation32_spill] sm:$0xff] %v3794_v14  ;;  %v603_v61 = vsel %vm140_vm0, %v2829_v20, 0.0  ;;  %v465_v9 = vmul.f32 1.442695, %v3794_v14  ;;  %v3822_v20 = vsub.f32 %v3336_v22, %v3718_v38 }
  0xe7   :  { %v3766_v50 = vpop.xlane.xlu0 %268  ;;  %2834 = vpow2.f32 %v455_v26  ;;  %v2831_v10 = vpop.eup %2830 }
  0xe8   :  { %2836 = vpow2.f32 %v465_v9 }
  0xe9   :  { %2838 = vpow2.f32 %v463_v30 }
  0xeb   :  { %601 = vadd.xlane.f32.xlu2 %v600_v43  ;;  %598 = vadd.xlane.f32.xlu1 %v597_v49  ;;  %v3802_v43 = vsub.f32 %v3284_v60, %v3666_v29  ;;  %v609_v49 = vsel %vm140_vm0, %v2825_v62, 0.0  ;;  %v2833_v29 = vpop.eup %2832 }
  0xec   :  { %595 = vadd.xlane.f32.xlu0 %v594_v55  ;;  %v606_v55 = vsel %vm140_vm0, %v2827_v41, 0.0  ;;  %v3818_v41 = vsub.f32 %v3331_v21, %v3716_v36  ;;  %v469_v36 = vmul.f32 1.442695, %v3822_v20 }
  0xed   :  { %v461_v32 = vmul.f32 1.442695, %v3802_v43  ;;  %v2835_v26 = vpop.eup %2834 }
  0xee   :  { %v3786_v18 = vpop.xlane.xlu2 %283  ;;  %v3788_v54 = vpop.xlane.xlu1 %280  ;;  %4956 = vst [vmem:[#allocation33_spill] sm:$0xff] %v3818_v41  ;;  %v612_v9 = vsel %vm140_vm0, %v2835_v26, 0.0  ;;  %v471_v21 = vmul.f32 1.442695, %v3818_v41  ;;  %v4959_v26 = vld [vmem:[#allocation7_spill] sm:$0xff] }
  0xef   :  { %v3790_v56 = vpop.xlane.xlu0 %277  ;;  %2840 = vpow2.f32 %v461_v32  ;;  %v2837_v22 = vpop.eup %2836 }
  0xf0   :  { %2842 = vpow2.f32 %v471_v21  ;;  %v627_v41 = vsel %vm140_vm0, %v2837_v22, 0.0 }
  0xf1   :  { %2844 = vpow2.f32 %v469_v36 }
  0xf3   :  { %610 = vadd.xlane.f32.xlu2 %v609_v49  ;;  %607 = vadd.xlane.f32.xlu1 %v606_v55  ;;  %v3826_v49 = vsub.f32 %v3305_v5, %v3690_v57  ;;  %v618_v55 = vsel %vm140_vm0, %v2831_v10, 0.0  ;;  %v2839_v57 = vpop.eup %2838 }
  0xf4   :  { %604 = vadd.xlane.f32.xlu0 %v603_v61  ;;  %v615_v61 = vsel %vm140_vm0, %v2833_v29, 0.0  ;;  %v3842_v29 = vsub.f32 %v3352_v33, %v3740_v42  ;;  %v624_v14 = vsel %vm140_vm0, %v2839_v57, 0.0 }
  0xf5   :  { %4957 = vst [vmem:[#allocation34_spill] sm:$0xff] %v3826_v49  ;;  %v467_v38 = vmul.f32 1.442695, %v3826_v49  ;;  %v2841_v32 = vpop.eup %2840 }
  0xf6   :  { %v3810_v24 = vpop.xlane.xlu2 %292  ;;  %v3812_v60 = vpop.xlane.xlu1 %289  ;;  %4958 = vst [vmem:[#allocation35_spill] sm:$0xff] %v3842_v29  ;;  %v621_v21 = vsel %vm140_vm0, %v2841_v32, 0.0  ;;  %v477_v33 = vmul.f32 1.442695, %v3842_v29  ;;  %v4965_v32 = vld [vmem:[#allocation10_spill] sm:$0xff] }
  0xf7   :  { %v3814_v62 = vpop.xlane.xlu0 %286  ;;  %2846 = vpow2.f32 %v467_v38 }
  0xf8   :  { %2848 = vpow2.f32 %v477_v33 }
  0xfb   :  { %619 = vadd.xlane.f32.xlu2 %v618_v55  ;;  %616 = vadd.xlane.f32.xlu1 %v615_v61  ;;  %v3846_v55 = vsub.f32 %v4959_v26, %v3742_v44  ;;  %v4961_v61 = vld [vmem:[#allocation5_spill] sm:$0xff]  ;;  %v2843_v44 = vpop.eup %2842 }
  0xfc   :  { %613 = vadd.xlane.f32.xlu0 %v612_v9  ;;  %v3850_v9 = vsub.f32 %v4961_v61, %v3714_v28  ;;  %v2845_v26 = vpop.eup %2844  ;;  %v3870_v61 = vsub.f32 %v4965_v32, %v3766_v50 }
  0xfd   :  { %4960 = vst [vmem:[#allocation7_spill] sm:$0xff] %v3846_v55  ;;  %v475_v42 = vmul.f32 1.442695, %v3846_v55  ;;  %v2847_v57 = vpop.eup %2846  ;;  %v633_v55 = vsel %vm140_vm0, %v2845_v26, 0.0 }
  0xfe   :  { %v3834_v30 = vpop.xlane.xlu2 %301  ;;  %v3836_v5 = vpop.xlane.xlu1 %298  ;;  %4962 = vst [vmem:[#allocation5_spill] sm:$0xff] %v3850_v9  ;;  %v473_v36 = vmul.f32 1.442695, %v3850_v9  ;;  %v636_v9 = vsel %vm140_vm0, %v2843_v44, 0.0  ;;  %v630_v33 = vsel %vm140_vm0, %v2847_v57, 0.0  ;;  %v4971_v57 = vld [vmem:[#allocation13_spill] sm:$0xff] }
  0xff   :  { %v3838_v10 = vpop.xlane.xlu0 %295  ;;  %2850 = vpow2.f32 %v475_v42  ;;  %4966 = vst [vmem:[#allocation10_spill] sm:$0xff] %v3870_v61  ;;  %v481_v42 = vmul.f32 1.442695, %v3870_v61  ;;  %v2849_v50 = vpop.eup %2848 }
 0x100   :  { %2852 = vpow2.f32 %v473_v36 }
 0x103   :  { %628 = vadd.xlane.f32.xlu2 %v627_v41  ;;  %625 = vadd.xlane.f32.xlu1 %v624_v14  ;;  %v4963_v41 = vld [vmem:[#allocation9_spill] sm:$0xff] }
 0x104   :  { %622 = vadd.xlane.f32.xlu0 %v621_v21  ;;  %v3866_v14 = vsub.f32 %v4963_v41, %v3764_v48  ;;  %v4967_v21 = vld [vmem:[#allocation6_spill] sm:$0xff] }
 0x105   :  { %v3874_v29 = vsub.f32 %v4967_v21, %v3738_v3  ;;  %v2851_v32 = vpop.eup %2850  ;;  %v3894_v21 = vsub.f32 %v4971_v57, %v3790_v56 }
 0x106   :  { %v3858_v38 = vpop.xlane.xlu2 %310  ;;  %v3860_v28 = vpop.xlane.xlu1 %307  ;;  %4964 = vst [vmem:[#allocation9_spill] sm:$0xff] %v3866_v14  ;;  %v483_v48 = vmul.f32 1.442695, %v3866_v14  ;;  %v642_v61 = vsel %vm140_vm0, %v2851_v32, 0.0 }
 0x107   :  { %v3862_v22 = vpop.xlane.xlu0 %304  ;;  %4968 = vst [vmem:[#allocation6_spill] sm:$0xff] %v3874_v29  ;;  %v479_v36 = vmul.f32 1.442695, %v3874_v29  ;;  %v2853_v26 = vpop.eup %2852  ;;  %v645_v29 = vsel %vm140_vm0, %v2849_v50, 0.0 }
 0x108   :  { %2854 = vpow2.f32 %v483_v48  ;;  %4972 = vst [vmem:[#allocation13_spill] sm:$0xff] %v3894_v21  ;;  %v639_v48 = vsel %vm140_vm0, %v2853_v26, 0.0  ;;  %v4977_v26 = vld [vmem:[#allocation16_spill] sm:$0xff] }
 0x109   :  { %2856 = vpow2.f32 %v481_v42  ;;  %v487_v42 = vmul.f32 1.442695, %v3894_v21 }
 0x10a   :  { %2858 = vpow2.f32 %v479_v36 }
 0x10b   :  { %637 = vadd.xlane.f32.xlu2 %v636_v9  ;;  %634 = vadd.xlane.f32.xlu1 %v633_v55  ;;  %v4969_v9 = vld [vmem:[#allocation12_spill] sm:$0xff] }
 0x10c   :  { %631 = vadd.xlane.f32.xlu0 %v630_v33  ;;  %v3890_v55 = vsub.f32 %v4969_v9, %v3788_v54  ;;  %v4973_v33 = vld [vmem:[#allocation8_spill] sm:$0xff] }
 0x10d   :  { %v3898_v14 = vsub.f32 %v4973_v33, %v3762_v12  ;;  %v3918_v33 = vsub.f32 %v4977_v26, %v3814_v62 }
 0x10e   :  { %v3882_v41 = vpop.xlane.xlu2 %319  ;;  %v3884_v3 = vpop.xlane.xlu1 %316  ;;  %4970 = vst [vmem:[#allocation12_spill] sm:$0xff] %v3890_v55  ;;  %v489_v54 = vmul.f32 1.442695, %v3890_v55 }
 0x10f   :  { %v3886_v44 = vpop.xlane.xlu0 %313  ;;  %4974 = vst [vmem:[#allocation8_spill] sm:$0xff] %v3898_v14  ;;  %v2855_v56 = vpop.eup %2854  ;;  %v485_v36 = vmul.f32 1.442695, %v3898_v14 }
 0x110   :  { %v2857_v57 = vpop.eup %2856  ;;  %2860 = vpow2.f32 %v489_v54  ;;  %4978 = vst [vmem:[#allocation16_spill] sm:$0xff] %v3918_v33  ;;  %v654_v14 = vsel %vm140_vm0, %v2855_v56, 0.0 }
 0x111   :  { %v2859_v32 = vpop.eup %2858  ;;  %2862 = vpow2.f32 %v487_v42  ;;  %v651_v21 = vsel %vm140_vm0, %v2857_v57, 0.0  ;;  %v493_v42 = vmul.f32 1.442695, %v3918_v33  ;;  %v4981_v57 = vld [vmem:[#allocation18_spill] sm:$0xff] }
 0x112   :  { %2864 = vpow2.f32 %v485_v36  ;;  %v648_v54 = vsel %vm140_vm0, %v2859_v32, 0.0  ;;  %v3934_v32 = vsub.f32 %v4981_v57, %v3836_v5 }
 0x113   :  { %646 = vadd.xlane.f32.xlu2 %v645_v29  ;;  %643 = vadd.xlane.f32.xlu1 %v642_v61  ;;  %v4975_v29 = vld [vmem:[#allocation15_spill] sm:$0xff] }
 0x114   :  { %640 = vadd.xlane.f32.xlu0 %v639_v48  ;;  %v3914_v61 = vsub.f32 %v4975_v29, %v3812_v60  ;;  %v4979_v48 = vld [vmem:[#allocation11_spill] sm:$0xff]  ;;  %4982 = vst [vmem:[#allocation18_spill] sm:$0xff] %v3934_v32  ;;  %v501_v5 = vmul.f32 1.442695, %v3934_v32 }
 0x115   :  { %v3922_v55 = vsub.f32 %v4979_v48, %v3786_v18 }
 0x116   :  { %v3906_v9 = vpop.xlane.xlu2 %328  ;;  %v3908_v12 = vpop.xlane.xlu1 %325  ;;  %4976 = vst [vmem:[#allocation15_spill] sm:$0xff] %v3914_v61  ;;  %v495_v60 = vmul.f32 1.442695, %v3914_v61 }
 0x117   :  { %v3910_v50 = vpop.xlane.xlu0 %322  ;;  %4980 = vst [vmem:[#allocation11_spill] sm:$0xff] %v3922_v55  ;;  %v2861_v62 = vpop.eup %2860  ;;  %v491_v36 = vmul.f32 1.442695, %v3922_v55 }
 0x118   :  { %v2863_v18 = vpop.eup %2862  ;;  %2866 = vpow2.f32 %v495_v60  ;;  %v663_v55 = vsel %vm140_vm0, %v2861_v62, 0.0 }
 0x119   :  { %v2865_v56 = vpop.eup %2864  ;;  %2868 = vpow2.f32 %v493_v42  ;;  %v660_v33 = vsel %vm140_vm0, %v2863_v18, 0.0  ;;  %v4987_v18 = vld [vmem:[#allocation21_spill] sm:$0xff] }
 0x11a   :  { %2870 = vpow2.f32 %v491_v36  ;;  %v657_v60 = vsel %vm140_vm0, %v2865_v56, 0.0 }
 0x11b   :  { %655 = vadd.xlane.f32.xlu2 %v654_v14  ;;  %652 = vadd.xlane.f32.xlu1 %v651_v21  ;;  %v4983_v14 = vld [vmem:[#allocation19_spill] sm:$0xff]  ;;  %2872 = vpow2.f32 %v501_v5 }
 0x11c   :  { %649 = vadd.xlane.f32.xlu0 %v648_v54  ;;  %v3938_v21 = vsub.f32 %v4983_v14, %v3838_v10  ;;  %v4985_v54 = vld [vmem:[#allocation14_spill] sm:$0xff] }
 0x11d   :  { %v3942_v61 = vsub.f32 %v4985_v54, %v3810_v24 }
 0x11e   :  { %v527_v29 = vpop.xlane.xlu1 %526  ;;  %v530_v26 = vpop.xlane.xlu2 %529  ;;  %4984 = vst [vmem:[#allocation19_spill] sm:$0xff] %v3938_v21  ;;  %v499_v42 = vmul.f32 1.442695, %v3938_v21 }
 0x11f   :  { %v3930_v48 = vpop.xlane.xlu0 %331  ;;  %4986 = vst [vmem:[#allocation14_spill] sm:$0xff] %v3942_v61  ;;  %v2867_v10 = vpop.eup %2866  ;;  %v497_v36 = vmul.f32 1.442695, %v3942_v61 }
 0x120   :  { %v2869_v14 = vpop.eup %2868  ;;  %2874 = vpow2.f32 %v499_v42  ;;  %v672_v61 = vsel %vm140_vm0, %v2867_v10, 0.0 }
 0x121   :  { %v2871_v54 = vpop.eup %2870  ;;  %2876 = vpow2.f32 %v497_v36  ;;  %v669_v21 = vsel %vm140_vm0, %v2869_v14, 0.0 }
 0x122   :  { %v666_v5 = vsel %vm140_vm0, %v2871_v54, 0.0  ;;  %2878 = vlog2.f32 %v527_v29  ;;  %v4995_v29 = vld [vmem:[#allocation20_spill] sm:$0xff] }
 0x123   :  { %664 = vadd.xlane.f32.xlu2 %v663_v55  ;;  %661 = vadd.xlane.f32.xlu1 %v660_v33  ;;  %v3956_v55 = vsub.f32 %v4987_v18, %v3860_v28  ;;  %v4989_v33 = vld [vmem:[#allocation22_spill] sm:$0xff]  ;;  %v3984_v54 = vsub.f32 %v4995_v29, %v3858_v38 }
 0x124   :  { %658 = vadd.xlane.f32.xlu0 %v657_v60  ;;  %v3960_v56 = vsub.f32 %v4989_v33, %v3862_v22  ;;  %v4991_v60 = vld [vmem:[#allocation17_spill] sm:$0xff]  ;;  %v2873_v22 = vpop.eup %2872 }
 0x125   :  { %4988 = vst [vmem:[#allocation21_spill] sm:$0xff] %v3956_v55  ;;  %v3964_v32 = vsub.f32 %v4991_v60, %v3834_v30  ;;  %v507_v28 = vmul.f32 1.442695, %v3956_v55  ;;  %v681_v60 = vsel %vm140_vm0, %v2873_v22, 0.0 }
 0x126   :  { %v3950_v57 = vpop.xlane.xlu1 %535  ;;  %v3952_v24 = vpop.xlane.xlu2 %538  ;;  %4990 = vst [vmem:[#allocation22_spill] sm:$0xff] %v3960_v56  ;;  %v505_v42 = vmul.f32 1.442695, %v3960_v56 }
 0x127   :  { %v533_v62 = vpop.xlane.xlu0 %532  ;;  %4992 = vst [vmem:[#allocation17_spill] sm:$0xff] %v3964_v32  ;;  %v503_v36 = vmul.f32 1.442695, %v3964_v32  ;;  %v2875_v10 = vpop.eup %2874  ;;  %2880 = vpow2.f32 %v507_v28 }
 0x128   :  { %v2877_v14 = vpop.eup %2876  ;;  %2882 = vpow2.f32 %v505_v42  ;;  %4996 = vst [vmem:[#allocation20_spill] sm:$0xff] %v3984_v54  ;;  %v509_v42 = vmul.f32 1.442695, %v3984_v54  ;;  %v4999_v54 = vld [vmem:[#allocation26_spill] sm:$0xff] }
 0x129   :  { %2884 = vpow2.f32 %v503_v36  ;;  %v2879_v55 = vpop.eup %2878  ;;  %v675_v32 = vsel %vm140_vm0, %v2877_v14, 0.0  ;;  %v4997_v14 = vld [vmem:[#allocation23_spill] sm:$0xff] }
 0x12a   :  { %2886 = vlog2.f32 %v530_v26  ;;  %v718_v36 = vmul.f32 0.6931472, %v2879_v55 }
 0x12b   :  { %673 = vadd.xlane.f32.xlu2 %v672_v61  ;;  %670 = vadd.xlane.f32.xlu1 %v669_v21  ;;  %v4993_v61 = vld [vmem:[#allocation25_spill] sm:$0xff] }
 0x12c   :  { %667 = vadd.xlane.f32.xlu0 %v666_v5  ;;  %v3980_v21 = vsub.f32 %v4993_v61, %v3886_v44  ;;  %v678_v5 = vsel %vm140_vm0, %v2875_v10, 0.0 }
 0x12d   :  { %v2881_v44 = vpop.eup %2880 }
 0x12e   :  { %v3972_v18 = vpop.xlane.xlu2 %547  ;;  %v3974_v30 = vpop.xlane.xlu1 %544  ;;  %4994 = vst [vmem:[#allocation25_spill] sm:$0xff] %v3980_v21  ;;  %v511_v28 = vmul.f32 1.442695, %v3980_v21  ;;  %v690_v26 = vsel %vm140_vm0, %v2881_v44, 0.0  ;;  %v845_v21 = vsub.f32 %v4999_v54, %v718_v36 }
 0x12f   :  { %v3976_v33 = vpop.xlane.xlu0 %541  ;;  %v2883_v22 = vpop.eup %2882 }
 0x130   :  { %v2885_v10 = vpop.eup %2884  ;;  %2888 = vpow2.f32 %v511_v28  ;;  %v687_v55 = vsel %vm140_vm0, %v2883_v22, 0.0 }
 0x131   :  { %2890 = vpow2.f32 %v509_v42  ;;  %v2887_v56 = vpop.eup %2886  ;;  %v684_v49 = vsel %vm140_vm0, %v2885_v10, 0.0 }
 0x132   :  { %2892 = vlog2.f32 %v533_v62  ;;  %v720_v44 = vmul.f32 0.6931472, %v2887_v56 }
 0x133   :  { %682 = vadd.xlane.f32.xlu2 %v681_v60  ;;  %679 = vadd.xlane.f32.xlu1 %v678_v5  ;;  %v3999_v60 = vsub.f32 %v4997_v14, %v3882_v41  ;;  %v76_v41 = vld [vmem:[%s4874_s1] sm:$0xff] }
 0x134   :  { %676 = vadd.xlane.f32.xlu0 %v675_v32  ;;  %v4998_v32 = vld [vmem:[#allocation24_spill] sm:$0xff]  ;;  %v909_v54 = vmul.f32 %v845_v21, %v76_v41 }
 0x135   :  { %v4003_v5 = vsub.f32 %v4998_v32, %v3884_v3  ;;  %v515_v3 = vmul.f32 1.442695, %v3999_v60  ;;  %v4022_v32 = vsub.f32 %v3531_v8, %v3908_v12  ;;  %v77_v8 = vld [vmem:[%s4874_s1 + $0x8] sm:$0xff] }
 0x136   :  { %v3991_v61 = vpop.xlane.xlu2 %556  ;;  %v3993_v38 = vpop.xlane.xlu1 %553  ;;  %v973_v62 = vsel %vm140_vm0, %v909_v54, 0.0 }
 0x137   :  { %v3995_v29 = vpop.xlane.xlu0 %550  ;;  %v513_v28 = vmul.f32 1.442695, %v4003_v5  ;;  %v2889_v36 = vpop.eup %2888  ;;  %2894 = vpow2.f32 %v515_v3  ;;  %v519_v12 = vmul.f32 1.442695, %v4022_v32 }
 0x138   :  { %v2891_v14 = vpop.eup %2890  ;;  %v696_v56 = vsel %vm140_vm0, %v2889_v36, 0.0 }
 0x139   :  { %2896 = vpow2.f32 %v513_v28  ;;  %v693_v41 = vsel %vm140_vm0, %v2891_v14, 0.0 }
 0x13a   :  { %2898 = vlog2.f32 %v3950_v57  ;;  %v4050_v57 = vsub.f32 %v3571_v2, %v3930_v48 }
 0x13b   :  { %691 = vadd.xlane.f32.xlu2 %v690_v26  ;;  %688 = vadd.xlane.f32.xlu1 %v687_v55  ;;  %v5000_v26 = vld [vmem:[#allocation27_spill] sm:$0xff]  ;;  %v2893_v55 = vpop.eup %2892  ;;  %2900 = vpow2.f32 %v519_v12 }
 0x13c   :  { %685 = vadd.xlane.f32.xlu0 %v684_v49  ;;  %v4026_v49 = vsub.f32 %v3540_v45, %v3910_v50  ;;  %v846_v21 = vsub.f32 %v5000_v26, %v720_v44  ;;  %v722_v3 = vmul.f32 0.6931472, %v2893_v55  ;;  %5003 = vst [vmem:[#allocation24_spill] sm:$0xff] %v4050_v57  ;;  %v523_v2 = vmul.f32 1.442695, %v4050_v57 }
 0x13d   :  { %v2895_v45 = vpop.eup %2894 }
 0x13e   :  { %v4014_v42 = vpop.xlane.xlu2 %565  ;;  %v4016_v22 = vpop.xlane.xlu1 %562  ;;  %v517_v50 = vmul.f32 1.442695, %v4026_v49  ;;  %v910_v54 = vmul.f32 %v846_v21, %v77_v8  ;;  %v702_v55 = vsel %vm140_vm0, %v2895_v45, 0.0 }
 0x13f   :  { %v4018_v10 = vpop.xlane.xlu0 %559  ;;  %v2897_v36 = vpop.eup %2896 }
 0x140   :  { %2902 = vpow2.f32 %v517_v50  ;;  %v976_v26 = vsel %vm140_vm0, %v910_v54, 0.0  ;;  %v2899_v21 = vpop.eup %2898  ;;  %v699_v8 = vsel %vm140_vm0, %v2897_v36, 0.0 }
 0x141   :  { %2904 = vlog2.f32 %v3974_v30  ;;  %v724_v12 = vmul.f32 0.6931472, %v2899_v21 }
 0x142   :  { %2906 = vlog2.f32 %v3976_v33 }
 0x143   :  { %974 = vadd.xlane.f32.xlu2 %v973_v62  ;;  %697 = vadd.xlane.f32.xlu1 %v696_v56  ;;  %v5001_v62 = vld [vmem:[#allocation28_spill] sm:$0xff]  ;;  %2908 = vlog2.f32 %v3952_v24 }
 0x144   :  { %694 = vadd.xlane.f32.xlu0 %v693_v41  ;;  %v4046_v56 = vsub.f32 %v5001_v62, %v3906_v9  ;;  %v847_v41 = vsub.f32 %v3559_v34, %v722_v3  ;;  %v78_v9 = vld [vmem:[%s4874_s1 + $0x10] sm:$0xff]  ;;  %v2901_v3 = vpop.eup %2900  ;;  %2910 = vpow2.f32 %v523_v2 }
 0x145   :  { %v708_v62 = vsel %vm140_vm0, %v2901_v3, 0.0 }
 0x146   :  { %v4038_v28 = vpop.xlane.xlu2 %574  ;;  %v4040_v44 = vpop.xlane.xlu1 %571  ;;  %5002 = vst [vmem:[#allocation23_spill] sm:$0xff] %v4046_v56  ;;  %v521_v48 = vmul.f32 1.442695, %v4046_v56  ;;  %v911_v50 = vmul.f32 %v847_v41, %v78_v9  ;;  %v79_v41 = vld [vmem:[%s4874_s1 + $0x18] sm:$0xff] }
 0x147   :  { %v4042_v14 = vpop.xlane.xlu0 %568  ;;  %v2903_v36 = vpop.eup %2902 }
 0x148   :  { %v2905_v30 = vpop.eup %2904  ;;  %2912 = vpow2.f32 %v521_v48  ;;  %v979_v33 = vsel %vm140_vm0, %v911_v50, 0.0  ;;  %v705_v24 = vsel %vm140_vm0, %v2903_v36, 0.0 }
 0x149   :  { %v2907_v21 = vpop.eup %2906  ;;  %2914 = vlog2.f32 %v3993_v38  ;;  %v730_v9 = vmul.f32 0.6931472, %v2905_v30 }
 0x14a   :  { %2916 = vlog2.f32 %v3995_v29  ;;  %v728_v2 = vmul.f32 0.6931472, %v2907_v21 }
 0x14b   :  { %977 = vadd.xlane.f32.xlu2 %v976_v26  ;;  %703 = vadd.xlane.f32.xlu1 %v702_v55  ;;  %v5004_v26 = vld [vmem:[#allocation30_spill] sm:$0xff]  ;;  %2918 = vlog2.f32 %v3972_v18  ;;  %v851_v29 = vsub.f32 %v3581_v16, %v730_v9 }
 0x14c   :  { %700 = vadd.xlane.f32.xlu0 %v699_v8  ;;  %v848_v55 = vsub.f32 %v5004_v26, %v724_v12  ;;  %v2909_v8 = vpop.eup %2908  ;;  %v850_v18 = vsub.f32 %v3587_v51, %v728_v2  ;;  %2920 = vlog2.f32 %v3991_v61  ;;  %v80_v51 = vld [vmem:[%s4874_s1 + $0x20] sm:$0xff] }
 0x14d   :  { %v2911_v3 = vpop.eup %2910  ;;  %v726_v36 = vmul.f32 0.6931472, %v2909_v8  ;;  %v82_v8 = vld [vmem:[%s4874_s1 + $0x30] sm:$0xff]  ;;  %2922 = vlog2.f32 %v4016_v22 }
 0x14e   :  { %v4064_v34 = vpop.xlane.xlu2 %583  ;;  %v4066_v45 = vpop.xlane.xlu1 %580  ;;  %v912_v50 = vmul.f32 %v848_v55, %v79_v41  ;;  %v714_v38 = vsel %vm140_vm0, %v2911_v3, 0.0  ;;  %v5005_v55 = vld [vmem:[#allocation29_spill] sm:$0xff]  ;;  %2924 = vlog2.f32 %v4018_v10 }
 0x14f   :  { %v4068_v54 = vpop.xlane.xlu0 %577  ;;  %v849_v41 = vsub.f32 %v5005_v55, %v726_v36  ;;  %v915_v36 = vmul.f32 %v851_v29, %v82_v8  ;;  %2926 = vlog2.f32 %v4014_v42 }
 0x150   :  { %2928 = vlog2.f32 %v4040_v44 }
 0x151   :  { %v913_v55 = vmul.f32 %v849_v41, %v80_v51  ;;  %v991_v56 = vsel %vm140_vm0, %v915_v36, 0.0  ;;  %v85_v41 = vld [vmem:[%s4874_s1 + $0x48] sm:$0xff]  ;;  %2930 = vlog2.f32 %v4042_v14 }
 0x152   :  { %2932 = vlog2.f32 %v4038_v28 }
 0x153   :  { %709 = vadd.xlane.f32.xlu2 %v708_v62  ;;  %980 = vadd.xlane.f32.xlu1 %v979_v33  ;;  %v2913_v33 = vpop.eup %2912  ;;  %v985_v29 = vsel %vm140_vm0, %v913_v55, 0.0  ;;  %2934 = vlog2.f32 %v4066_v45 }
 0x154   :  { %706 = vadd.xlane.f32.xlu0 %v705_v24  ;;  %v2915_v26 = vpop.eup %2914  ;;  %v982_v24 = vsel %vm140_vm0, %v912_v50, 0.0  ;;  %v711_v21 = vsel %vm140_vm0, %v2913_v33, 0.0  ;;  %v81_v50 = vld [vmem:[%s4874_s1 + $0x28] sm:$0xff]  ;;  %2936 = vlog2.f32 %v4068_v54 }
 0x155   :  { %v2917_v30 = vpop.eup %2916  ;;  %v736_v61 = vmul.f32 0.6931472, %v2915_v26  ;;  %v914_v33 = vmul.f32 %v850_v18, %v81_v50  ;;  %v5006_v18 = vld [vmem:[#allocation31_spill] sm:$0xff]  ;;  %2938 = vlog2.f32 %v4064_v34 }
 0x156   :  { %v4080_v48 = vpop.xlane.xlu2 %592  ;;  %v4082_v12 = vpop.xlane.xlu1 %589  ;;  %v734_v9 = vmul.f32 0.6931472, %v2917_v30  ;;  %v84_v50 = vld [vmem:[%s4874_s1 + $0x40] sm:$0xff] }
 0x157   :  { %v4084_v62 = vpop.xlane.xlu0 %586  ;;  %v2919_v16 = vpop.eup %2918  ;;  %v988_v57 = vsel %vm140_vm0, %v914_v33, 0.0  ;;  %v854_v10 = vsub.f32 %v3606_v1, %v736_v61  ;;  %v83_v1 = vld [vmem:[%s4874_s1 + $0x38] sm:$0xff]  ;;  %2940 = vlog2.f32 %v4082_v12 }
 0x158   :  { %v2921_v22 = vpop.eup %2920  ;;  %v853_v26 = vsub.f32 %v3610_v40, %v734_v9  ;;  %2942 = vlog2.f32 %v4084_v62 }
 0x159   :  { %v738_v61 = vmul.f32 0.6931472, %v2921_v22  ;;  %2944 = vlog2.f32 %v4080_v48 }
 0x15a   :  { %v917_v51 = vmul.f32 %v853_v26, %v84_v50  ;;  %v88_v26 = vld [vmem:[%s4874_s1 + $0x60] sm:$0xff] }
 0x15b   :  { %715 = vadd.xlane.f32.xlu2 %v714_v38  ;;  %983 = vadd.xlane.f32.xlu1 %v982_v24  ;;  %v732_v38 = vmul.f32 0.6931472, %v2919_v16  ;;  %v918_v16 = vmul.f32 %v854_v10, %v85_v41  ;;  %v855_v22 = vsub.f32 %v3602_v63, %v738_v61 }
 0x15c   :  { %712 = vadd.xlane.f32.xlu0 %v711_v21  ;;  %v2923_v21 = vpop.eup %2922  ;;  %v997_v55 = vsel %vm140_vm0, %v917_v51, 0.0 }
 0x15d   :  { %v2925_v30 = vpop.eup %2924  ;;  %v852_v8 = vsub.f32 %v5006_v18, %v732_v38  ;;  %v742_v40 = vmul.f32 0.6931472, %v2923_v21  ;;  %v1000_v38 = vsel %vm140_vm0, %v918_v16, 0.0 }
 0x15e   :  { %v4104_v2 = vpop.xlane.xlu2 %601  ;;  %v4106_v3 = vpop.xlane.xlu1 %598  ;;  %v740_v42 = vmul.f32 0.6931472, %v2925_v30 }
 0x15f   :  { %v4108_v24 = vpop.xlane.xlu0 %595  ;;  %v916_v36 = vmul.f32 %v852_v8, %v83_v1  ;;  %v2927_v44 = vpop.eup %2926  ;;  %v857_v14 = vsub.f32 %v3630_v6, %v742_v40  ;;  %v86_v6 = vld [vmem:[%s4874_s1 + $0x50] sm:$0xff]  ;;  %2946 = vlog2.f32 %v4106_v3 }
 0x160   :  { %v2929_v33 = vpop.eup %2928  ;;  %v856_v21 = vsub.f32 %v3634_v58, %v740_v42  ;;  %v744_v50 = vmul.f32 0.6931472, %v2927_v44  ;;  %v919_v40 = vmul.f32 %v855_v22, %v86_v6  ;;  %2948 = vlog2.f32 %v4108_v24 }
 0x161   :  { %v2931_v30 = vpop.eup %2930  ;;  %v994_v10 = vsel %vm140_vm0, %v916_v36, 0.0  ;;  %v748_v58 = vmul.f32 0.6931472, %v2929_v33  ;;  %v921_v8 = vmul.f32 %v857_v14, %v88_v26  ;;  %2950 = vlog2.f32 %v4104_v2 }
 0x162   :  { %v746_v28 = vmul.f32 0.6931472, %v2931_v30  ;;  %v2933_v45 = vpop.eup %2932  ;;  %v1003_v33 = vsel %vm140_vm0, %v919_v40, 0.0  ;;  %v858_v44 = vsub.f32 %v3626_v59, %v744_v50  ;;  %v94_v40 = vld [vmem:[%s4874_s1 + $0x90] sm:$0xff] }
 0x163   :  { %992 = vadd.xlane.f32.xlu2 %v991_v56  ;;  %989 = vadd.xlane.f32.xlu1 %v988_v57  ;;  %v2935_v42 = vpop.eup %2934  ;;  %v1009_v16 = vsel %vm140_vm0, %v921_v8, 0.0  ;;  %v860_v54 = vsub.f32 %v3654_v15, %v748_v58  ;;  %v89_v15 = vld [vmem:[%s4874_s1 + $0x68] sm:$0xff] }
 0x164   :  { %986 = vadd.xlane.f32.xlu0 %v985_v29  ;;  %v87_v29 = vld [vmem:[%s4874_s1 + $0x58] sm:$0xff]  ;;  %v859_v61 = vsub.f32 %v3658_v0, %v746_v28  ;;  %v2937_v36 = vpop.eup %2936  ;;  %v754_v0 = vmul.f32 0.6931472, %v2935_v42  ;;  %v922_v26 = vmul.f32 %v858_v44, %v89_v15 }
 0x165   :  { %v920_v41 = vmul.f32 %v856_v21, %v87_v29  ;;  %v752_v34 = vmul.f32 0.6931472, %v2937_v36  ;;  %v2939_v12 = vpop.eup %2938 }
 0x166   :  { %v4128_v56 = vpop.xlane.xlu2 %610  ;;  %v4130_v57 = vpop.xlane.xlu1 %607  ;;  %v863_v62 = vsub.f32 %v3678_v53, %v754_v0  ;;  %v92_v53 = vld [vmem:[%s4874_s1 + $0x80] sm:$0xff] }
 0x167   :  { %v4132_v9 = vpop.xlane.xlu0 %604  ;;  %v1006_v51 = vsel %vm140_vm0, %v920_v41, 0.0  ;;  %v2941_v29 = vpop.eup %2940  ;;  %v862_v28 = vsub.f32 %v3682_v13, %v752_v34  ;;  %v1012_v41 = vsel %vm140_vm0, %v922_v26, 0.0  ;;  %2952 = vlog2.f32 %v4130_v57 }
 0x168   :  { %v2943_v8 = vpop.eup %2942  ;;  %v760_v13 = vmul.f32 0.6931472, %v2941_v29  ;;  %2954 = vlog2.f32 %v4132_v9 }
 0x169   :  { %v758_v48 = vmul.f32 0.6931472, %v2943_v8  ;;  %v2945_v3 = vpop.eup %2944  ;;  %2956 = vlog2.f32 %v4128_v56 }
 0x16a   :  { %v866_v44 = vsub.f32 %v3702_v4, %v760_v13  ;;  %v96_v4 = vld [vmem:[%s4874_s1 + $0xa0] sm:$0xff]  ;;  %v762_v29 = vmul.f32 0.6931472, %v2945_v3 }
 0x16b   :  { %1001 = vadd.xlane.f32.xlu2 %v1000_v38  ;;  %998 = vadd.xlane.f32.xlu1 %v997_v55  ;;  %v91_v38 = vld [vmem:[%s4874_s1 + $0x78] sm:$0xff]  ;;  %v90_v55 = vld [vmem:[%s4874_s1 + $0x70] sm:$0xff] }
 0x16c   :  { %995 = vadd.xlane.f32.xlu0 %v994_v10  ;;  %v924_v21 = vmul.f32 %v860_v54, %v91_v38  ;;  %v923_v30 = vmul.f32 %v859_v61, %v90_v55  ;;  %v750_v10 = vmul.f32 0.6931472, %v2933_v45  ;;  %v93_v45 = vld [vmem:[%s4874_s1 + $0x88] sm:$0xff]  ;;  %v756_v54 = vmul.f32 0.6931472, %v2939_v12 }
 0x16d   :  { %v865_v38 = vsub.f32 %v3706_v19, %v758_v48 }
 0x16e   :  { %v4152_v63 = vpop.xlane.xlu2 %619  ;;  %v4154_v18 = vpop.xlane.xlu1 %616  ;;  %v1018_v6 = vsel %vm140_vm0, %v924_v21, 0.0  ;;  %v1015_v58 = vsel %vm140_vm0, %v923_v30, 0.0  ;;  %v861_v50 = vsub.f32 %v3650_v11, %v750_v10  ;;  %v864_v0 = vsub.f32 %v3674_v52, %v756_v54  ;;  %v97_v21 = vld [vmem:[%s4874_s1 + $0xa8] sm:$0xff]  ;;  %v95_v52 = vld [vmem:[%s4874_s1 + $0x98] sm:$0xff] }
 0x16f   :  { %v4156_v1 = vpop.xlane.xlu0 %613  ;;  %v930_v26 = vmul.f32 %v866_v44, %v97_v21  ;;  %v929_v12 = vmul.f32 %v865_v38, %v96_v4  ;;  %2958 = vlog2.f32 %v4154_v18 }
 0x170   :  { %v925_v36 = vmul.f32 %v861_v50, %v92_v53  ;;  %v100_v53 = vld [vmem:[%s4874_s1 + $0xc0] sm:$0xff]  ;;  %2960 = vlog2.f32 %v4156_v1 }
 0x171   :  { %v1036_v9 = vsel %vm140_vm0, %v930_v26, 0.0  ;;  %2962 = vlog2.f32 %v4152_v63 }
 0x172   :  { %v1021_v34 = vsel %vm140_vm0, %v925_v36, 0.0 }
 0x173   :  { %1010 = vadd.xlane.f32.xlu2 %v1009_v16  ;;  %1007 = vadd.xlane.f32.xlu1 %v1006_v51  ;;  %v927_v16 = vmul.f32 %v863_v62, %v94_v40  ;;  %v926_v51 = vmul.f32 %v862_v28, %v93_v45  ;;  %v867_v40 = vsub.f32 %v3698_v35, %v762_v29  ;;  %v98_v35 = vld [vmem:[%s4874_s1 + $0xb0] sm:$0xff] }
 0x174   :  { %1004 = vadd.xlane.f32.xlu0 %v1003_v33  ;;  %v2947_v33 = vpop.eup %2946 }
 0x175   :  { %v1027_v24 = vsel %vm140_vm0, %v927_v16, 0.0  ;;  %v1024_v55 = vsel %vm140_vm0, %v926_v51, 0.0  ;;  %v2949_v15 = vpop.eup %2948  ;;  %v766_v19 = vmul.f32 0.6931472, %v2947_v33  ;;  %v931_v36 = vmul.f32 %v867_v40, %v98_v35 }
 0x176   :  { %v4176_v59 = vpop.xlane.xlu2 %628  ;;  %v4178_v14 = vpop.xlane.xlu1 %625  ;;  %v764_v2 = vmul.f32 0.6931472, %v2949_v15 }
 0x177   :  { %v4180_v22 = vpop.xlane.xlu0 %622  ;;  %v2951_v57 = vpop.eup %2950  ;;  %v869_v28 = vsub.f32 %v3726_v23, %v766_v19  ;;  %v99_v23 = vld [vmem:[%s4874_s1 + $0xb8] sm:$0xff]  ;;  %2964 = vlog2.f32 %v4178_v14 }
 0x178   :  { %v2953_v62 = vpop.eup %2952  ;;  %v868_v8 = vsub.f32 %v3730_v25, %v764_v2  ;;  %v768_v54 = vmul.f32 0.6931472, %v2951_v57  ;;  %2966 = vlog2.f32 %v4180_v22 }
 0x179   :  { %v2955_v50 = vpop.eup %2954  ;;  %v772_v25 = vmul.f32 0.6931472, %v2953_v62  ;;  %v933_v16 = vmul.f32 %v869_v28, %v100_v53  ;;  %2968 = vlog2.f32 %v4176_v59 }
 0x17a   :  { %v770_v56 = vmul.f32 0.6931472, %v2955_v50  ;;  %v932_v51 = vmul.f32 %v868_v8, %v99_v23  ;;  %v2957_v3 = vpop.eup %2956  ;;  %v870_v15 = vsub.f32 %v3722_v39, %v768_v54  ;;  %v101_v39 = vld [vmem:[%s4874_s1 + $0xc8] sm:$0xff] }
 0x17b   :  { %1019 = vadd.xlane.f32.xlu2 %v1018_v6  ;;  %1016 = vadd.xlane.f32.xlu1 %v1015_v58  ;;  %v928_v58 = vmul.f32 %v864_v0, %v95_v52  ;;  %v2959_v18 = vpop.eup %2958  ;;  %v872_v44 = vsub.f32 %v3750_v46, %v772_v25  ;;  %v1045_v1 = vsel %vm140_vm0, %v933_v16, 0.0  ;;  %v1039_v0 = vsel %vm140_vm0, %v931_v36, 0.0  ;;  %v102_v46 = vld [vmem:[%s4874_s1 + $0xd0] sm:$0xff] }
 0x17c   :  { %1013 = vadd.xlane.f32.xlu0 %v1012_v41  ;;  %v1033_v41 = vsel %vm140_vm0, %v929_v12, 0.0  ;;  %v871_v38 = vsub.f32 %v3754_v31, %v770_v56  ;;  %v778_v31 = vmul.f32 0.6931472, %v2959_v18  ;;  %v774_v2 = vmul.f32 0.6931472, %v2957_v3  ;;  %v109_v18 = vld [vmem:[%s4874_s1 + $0x108] sm:$0xff] }
 0x17d   :  { %v1030_v45 = vsel %vm140_vm0, %v928_v58, 0.0  ;;  %v934_v26 = vmul.f32 %v870_v15, %v101_v39  ;;  %v5007_v39 = vld [vmem:[#allocation34_spill] sm:$0xff] }
 0x17e   :  { %v4200_v11 = vpop.xlane.xlu2 %637  ;;  %v4202_v42 = vpop.xlane.xlu1 %634  ;;  %v935_v19 = vmul.f32 %v871_v38, %v102_v46  ;;  %v875_v14 = vsub.f32 %v3774_v27, %v778_v31  ;;  %v873_v28 = vsub.f32 %v3746_v7, %v774_v2  ;;  %v106_v27 = vld [vmem:[%s4874_s1 + $0xf0] sm:$0xff]  ;;  %v104_v7 = vld [vmem:[%s4874_s1 + $0xe0] sm:$0xff] }
 0x17f   :  { %v4204_v61 = vpop.xlane.xlu0 %631  ;;  %2970 = vlog2.f32 %v4202_v42 }
 0x180   :  { %v1051_v22 = vsel %vm140_vm0, %v935_v19, 0.0  ;;  %2972 = vlog2.f32 %v4204_v61  ;;  %v937_v35 = vmul.f32 %v873_v28, %v104_v7  ;;  %v5008_v19 = vld [vmem:[#allocation32_spill] sm:$0xff]  ;;  %v5009_v7 = vld [vmem:[#allocation7_spill] sm:$0xff] }
 0x181   :  { %2974 = vlog2.f32 %v4200_v11 }
 0x182   :  { %v1057_v3 = vsel %vm140_vm0, %v937_v35, 0.0  ;;  %v5011_v35 = vld [vmem:[#allocation33_spill] sm:$0xff] }
 0x183   :  { %1028 = vadd.xlane.f32.xlu2 %v1027_v24  ;;  %1025 = vadd.xlane.f32.xlu1 %v1024_v55  ;;  %v1042_v24 = vsel %vm140_vm0, %v932_v51, 0.0  ;;  %v2961_v55 = vpop.eup %2960 }
 0x184   :  { %1022 = vadd.xlane.f32.xlu0 %v1021_v34  ;;  %v103_v34 = vld [vmem:[%s4874_s1 + $0xd8] sm:$0xff]  ;;  %v776_v63 = vmul.f32 0.6931472, %v2961_v55  ;;  %v2963_v12 = vpop.eup %2962 }
 0x185   :  { %v936_v52 = vmul.f32 %v872_v44, %v103_v34  ;;  %v2965_v29 = vpop.eup %2964  ;;  %v780_v23 = vmul.f32 0.6931472, %v2963_v12  ;;  %v112_v12 = vld [vmem:[%s4874_s1 + $0x120] sm:$0xff] }
 0x186   :  { %v4224_v30 = vpop.xlane.xlu2 %646  ;;  %v4226_v10 = vpop.xlane.xlu1 %643  ;;  %v874_v58 = vsub.f32 %v3778_v37, %v776_v63  ;;  %v105_v37 = vld [vmem:[%s4874_s1 + $0xe8] sm:$0xff]  ;;  %v784_v59 = vmul.f32 0.6931472, %v2965_v29  ;;  %v110_v29 = vld [vmem:[%s4874_s1 + $0x110] sm:$0xff] }
 0x187   :  { %v4228_v6 = vpop.xlane.xlu0 %640  ;;  %v1054_v57 = vsel %vm140_vm0, %v936_v52, 0.0  ;;  %v2967_v62 = vpop.eup %2966  ;;  %v876_v36 = vsub.f32 %v3770_v17, %v780_v23  ;;  %2976 = vlog2.f32 %v4226_v10  ;;  %v107_v17 = vld [vmem:[%s4874_s1 + $0xf8] sm:$0xff] }
 0x188   :  { %v938_v53 = vmul.f32 %v874_v58, %v105_v37  ;;  %v2969_v25 = vpop.eup %2968  ;;  %v878_v42 = vsub.f32 %v3798_v47, %v784_v59  ;;  %v108_v47 = vld [vmem:[%s4874_s1 + $0x100] sm:$0xff]  ;;  %2978 = vlog2.f32 %v4228_v6 }
 0x189   :  { %v2971_v56 = vpop.eup %2970  ;;  %v786_v15 = vmul.f32 0.6931472, %v2969_v25  ;;  %2980 = vlog2.f32 %v4224_v30 }
 0x18a   :  { %v1060_v61 = vsel %vm140_vm0, %v938_v53, 0.0  ;;  %v2973_v54 = vpop.eup %2972  ;;  %v790_v11 = vmul.f32 0.6931472, %v2971_v56 }
 0x18b   :  { %1037 = vadd.xlane.f32.xlu2 %v1036_v9  ;;  %1034 = vadd.xlane.f32.xlu1 %v1033_v41  ;;  %v1048_v9 = vsel %vm140_vm0, %v934_v26, 0.0  ;;  %v782_v41 = vmul.f32 0.6931472, %v2967_v62  ;;  %v788_v44 = vmul.f32 0.6931472, %v2973_v54  ;;  %v2975_v10 = vpop.eup %2974  ;;  %v879_v2 = vsub.f32 %v5008_v19, %v786_v15 }
 0x18c   :  { %1031 = vadd.xlane.f32.xlu0 %v1030_v45  ;;  %v939_v45 = vmul.f32 %v875_v14, %v106_v27  ;;  %v881_v46 = vsub.f32 %v3822_v20, %v790_v11  ;;  %v111_v20 = vld [vmem:[%s4874_s1 + $0x118] sm:$0xff]  ;;  %v792_v62 = vmul.f32 0.6931472, %v2975_v10 }
 0x18d   :  { %v877_v16 = vsub.f32 %v3802_v43, %v782_v41  ;;  %v2977_v34 = vpop.eup %2976  ;;  %v880_v31 = vsub.f32 %v5007_v39, %v788_v44  ;;  %v943_v28 = vmul.f32 %v879_v2, %v110_v29  ;;  %v5010_v41 = vld [vmem:[#allocation5_spill] sm:$0xff]  ;;  %v5012_v44 = vld [vmem:[#allocation10_spill] sm:$0xff] }
 0x18e   :  { %v4248_v13 = vpop.xlane.xlu2 %655  ;;  %v4250_v48 = vpop.xlane.xlu1 %652  ;;  %v1063_v51 = vsel %vm140_vm0, %v939_v45, 0.0  ;;  %v796_v30 = vmul.f32 0.6931472, %v2977_v34  ;;  %v882_v25 = vsub.f32 %v5011_v35, %v792_v62  ;;  %v5013_v10 = vld [vmem:[#allocation6_spill] sm:$0xff] }
 0x18f   :  { %v4252_v33 = vpop.xlane.xlu0 %649  ;;  %v941_v55 = vmul.f32 %v877_v16, %v108_v47  ;;  %v2979_v52 = vpop.eup %2978  ;;  %2982 = vlog2.f32 %v4250_v48  ;;  %v1075_v56 = vsel %vm140_vm0, %v943_v28, 0.0  ;;  %v114_v16 = vld [vmem:[%s4874_s1 + $0x130] sm:$0xff] }
 0x190   :  { %2984 = vlog2.f32 %v4252_v33  ;;  %v794_v14 = vmul.f32 0.6931472, %v2979_v52  ;;  %v2981_v48 = vpop.eup %2980  ;;  %v884_v59 = vsub.f32 %v5009_v7, %v796_v30  ;;  %v5014_v52 = vld [vmem:[#allocation35_spill] sm:$0xff] }
 0x191   :  { %v1069_v63 = vsel %vm140_vm0, %v941_v55, 0.0  ;;  %v798_v47 = vmul.f32 0.6931472, %v2981_v48  ;;  %v116_v30 = vld [vmem:[%s4874_s1 + $0x140] sm:$0xff] }
 0x192   :  { %v883_v45 = vsub.f32 %v5010_v41, %v794_v14 }
 0x193   :  { %1046 = vadd.xlane.f32.xlu2 %v1045_v1  ;;  %1043 = vadd.xlane.f32.xlu1 %v1042_v24  ;;  %v942_v24 = vmul.f32 %v878_v42, %v109_v18  ;;  %v115_v42 = vld [vmem:[%s4874_s1 + $0x138] sm:$0xff]  ;;  %v885_v19 = vsub.f32 %v5014_v52, %v798_v47  ;;  %v124_v52 = vld [vmem:[%s4874_s1 + $0x180] sm:$0xff] }
 0x194   :  { %1040 = vadd.xlane.f32.xlu0 %v1039_v0  ;;  %v940_v0 = vmul.f32 %v876_v36, %v107_v17  ;;  %v947_v18 = vmul.f32 %v883_v45, %v114_v16  ;;  %v5015_v45 = vld [vmem:[#allocation13_spill] sm:$0xff] }
 0x195   :  { %v1072_v6 = vsel %vm140_vm0, %v942_v24, 0.0  ;;  %v2983_v37 = vpop.eup %2982  ;;  %v949_v7 = vmul.f32 %v885_v19, %v116_v30  ;;  %v121_v16 = vld [vmem:[%s4874_s1 + $0x168] sm:$0xff] }
 0x196   :  { %v4272_v21 = vpop.xlane.xlu2 %664  ;;  %v4274_v4 = vpop.xlane.xlu1 %661  ;;  %v1066_v26 = vsel %vm140_vm0, %v940_v0, 0.0 }
 0x197   :  { %v4282_v8 = vpop.xlane.xlu0 %658  ;;  %v2985_v23 = vpop.eup %2984  ;;  %2986 = vlog2.f32 %v4274_v4 }
 0x198   :  { %2988 = vlog2.f32 %v4282_v8  ;;  %v800_v54 = vmul.f32 0.6931472, %v2985_v23 }
 0x199   :  { %2990 = vlog2.f32 %v4248_v13 }
 0x19a   :  { %v886_v34 = vsub.f32 %v5013_v10, %v800_v54 }
 0x19b   :  { %1055 = vadd.xlane.f32.xlu2 %v1054_v57  ;;  %1052 = vadd.xlane.f32.xlu1 %v1051_v22  ;;  %v945_v57 = vmul.f32 %v881_v46, %v112_v12  ;;  %v944_v22 = vmul.f32 %v880_v31, %v111_v20  ;;  %v1087_v31 = vsel %vm140_vm0, %v947_v18, 0.0  ;;  %v117_v12 = vld [vmem:[%s4874_s1 + $0x148] sm:$0xff] }
 0x19c   :  { %1049 = vadd.xlane.f32.xlu0 %v1048_v9  ;;  %v950_v48 = vmul.f32 %v886_v34, %v117_v12 }
 0x19d   :  { %v1081_v33 = vsel %vm140_vm0, %v945_v57, 0.0  ;;  %v1078_v53 = vsel %vm140_vm0, %v944_v22, 0.0  ;;  %v2987_v0 = vpop.eup %2986 }
 0x19e   :  { %v4296_v50 = vpop.xlane.xlu2 %673  ;;  %v4298_v40 = vpop.xlane.xlu1 %670  ;;  %v808_v14 = vmul.f32 0.6931472, %v2987_v0 }
 0x19f   :  { %v4318_v43 = vpop.xlane.xlu0 %667  ;;  %2992 = vlog2.f32 %v4298_v40 }
 0x1a0   :  { %2994 = vlog2.f32 %v4318_v43  ;;  %v890_v43 = vsub.f32 %v5015_v45, %v808_v14  ;;  %v122_v14 = vld [vmem:[%s4874_s1 + $0x170] sm:$0xff] }
 0x1a1   :  { %2996 = vlog2.f32 %v4272_v21  ;;  %v1096_v21 = vsel %vm140_vm0, %v950_v48, 0.0 }
 0x1a2   :  { %2998 = vlog2.f32 %v4296_v50  ;;  %v119_v50 = vld [vmem:[%s4874_s1 + $0x158] sm:$0xff] }
 0x1a3   :  { %1064 = vadd.xlane.f32.xlu2 %v1063_v51  ;;  %1061 = vadd.xlane.f32.xlu1 %v1060_v61  ;;  %v113_v51 = vld [vmem:[%s4874_s1 + $0x128] sm:$0xff]  ;;  %v802_v61 = vmul.f32 0.6931472, %v2983_v37 }
 0x1a4   :  { %1058 = vadd.xlane.f32.xlu0 %v1057_v3  ;;  %v948_v3 = vmul.f32 %v884_v59, %v115_v42  ;;  %v946_v11 = vmul.f32 %v882_v25, %v113_v51  ;;  %v5017_v25 = vld [vmem:[#allocation9_spill] sm:$0xff]  ;;  %v1093_v42 = vsel %vm140_vm0, %v949_v7, 0.0  ;;  %v120_v51 = vld [vmem:[%s4874_s1 + $0x160] sm:$0xff] }
 0x1a5   :  { %v887_v24 = vsub.f32 %v5012_v44, %v802_v61 }
 0x1a6   :  { %v4320_v38 = vpop.xlane.xlu2 %682  ;;  %v4322_v1 = vpop.xlane.xlu1 %679  ;;  %v1090_v13 = vsel %vm140_vm0, %v948_v3, 0.0 }
 0x1a7   :  { %v4344_v9 = vpop.xlane.xlu0 %676  ;;  %3000 = vlog2.f32 %v4322_v1 }
 0x1a8   :  { %3002 = vlog2.f32 %v4344_v9  ;;  %v5019_v9 = vld [vmem:[#allocation11_spill] sm:$0xff] }
 0x1a9   :  { %3004 = vlog2.f32 %v4320_v38 }
 0x1ab   :  { %1073 = vadd.xlane.f32.xlu2 %v1072_v6  ;;  %1070 = vadd.xlane.f32.xlu1 %v1069_v63  ;;  %v118_v6 = vld [vmem:[%s4874_s1 + $0x150] sm:$0xff]  ;;  %v2989_v63 = vpop.eup %2988 }
 0x1ac   :  { %1067 = vadd.xlane.f32.xlu0 %v1066_v26  ;;  %v1084_v26 = vsel %vm140_vm0, %v946_v11, 0.0  ;;  %v2991_v20 = vpop.eup %2990  ;;  %v951_v22 = vmul.f32 %v887_v24, %v118_v6  ;;  %v806_v62 = vmul.f32 0.6931472, %v2989_v63 }
 0x1ad   :  { %v804_v40 = vmul.f32 0.6931472, %v2991_v20  ;;  %v2993_v41 = vpop.eup %2992 }
 0x1ae   :  { %v4342_v58 = vpop.xlane.xlu2 %691  ;;  %v4346_v27 = vpop.xlane.xlu1 %688  ;;  %v1099_v59 = vsel %vm140_vm0, %v951_v22, 0.0  ;;  %v814_v3 = vmul.f32 0.6931472, %v2993_v41  ;;  %v5021_v41 = vld [vmem:[#allocation19_spill] sm:$0xff] }
 0x1af   :  { %v4368_v46 = vpop.xlane.xlu0 %685  ;;  %v2995_v35 = vpop.eup %2994  ;;  %3006 = vlog2.f32 %v4346_v27 }
 0x1b0   :  { %v2997_v61 = vpop.eup %2996  ;;  %v812_v18 = vmul.f32 0.6931472, %v2995_v35  ;;  %3008 = vlog2.f32 %v4368_v46  ;;  %v127_v46 = vld [vmem:[%s4874_s1 + $0x198] sm:$0xff] }
 0x1b1   :  { %v810_v44 = vmul.f32 0.6931472, %v2997_v61  ;;  %3010 = vlog2.f32 %v4342_v58 }
 0x1b3   :  { %1082 = vadd.xlane.f32.xlu2 %v1081_v33  ;;  %1079 = vadd.xlane.f32.xlu1 %v1078_v53  ;;  %v5016_v33 = vld [vmem:[#allocation8_spill] sm:$0xff] }
 0x1b4   :  { %1076 = vadd.xlane.f32.xlu0 %v1075_v56  ;;  %v889_v53 = vsub.f32 %v5016_v33, %v806_v62  ;;  %v888_v56 = vsub.f32 %v5017_v25, %v804_v40 }
 0x1b6   :  { %v975_v36 = vpop.xlane.xlu2 %974  ;;  %v4370_v39 = vpop.xlane.xlu1 %697  ;;  %v953_v11 = vmul.f32 %v889_v53, %v120_v51  ;;  %v952_v24 = vmul.f32 %v888_v56, %v119_v50  ;;  %v126_v56 = vld [vmem:[%s4874_s1 + $0x190] sm:$0xff] }
 0x1b7   :  { %v1165_v17 = vsub.f32 0.0, %v975_v36  ;;  %v4404_v54 = vpop.xlane.xlu0 %694  ;;  %3012 = vlog2.f32 %v4370_v39 }
 0x1b8   :  { %v1105_v63 = vsel %vm140_vm0, %v953_v11, 0.0  ;;  %v1102_v20 = vsel %vm140_vm0, %v952_v24, 0.0  ;;  %3014 = vlog2.f32 %v4404_v54  ;;  %v131_v54 = vld [vmem:[%s4874_s1 + $0x1b8] sm:$0xff] }
 0x1b9   :  { %v1293_v4 = vperm.slane %v1165_v17, 0  ;;  %v1294_v55 = vperm.slane %v1165_v17, 1  ;;  %v1295_v15 = vperm.slane %v1165_v17, 2  ;;  %v1296_v8 = vperm.slane %v1165_v17, 3 }
 0x1ba   :  { %v1297_v2 = vperm.slane %v1165_v17, 4  ;;  %v1298_v29 = vperm.slane %v1165_v17, 5  ;;  %v1299_v57 = vperm.slane %v1165_v17, 6  ;;  %v1300_v28 = vperm.slane %v1165_v17, 7 }
 0x1bb   :  { %1805 = vst [vmem:[#allocation1] ss:$9 sm:$0xff] %v1293_v4  ;;  %1091 = vadd.xlane.f32.xlu2 %v1090_v13  ;;  %1088 = vadd.xlane.f32.xlu1 %v1087_v31  ;;  %v954_v17 = vmul.f32 %v890_v43, %v121_v16  ;;  %v892_v13 = vsub.f32 %v5019_v9, %v812_v18  ;;  %v5022_v43 = vld [vmem:[#allocation14_spill] sm:$0xff]  ;;  %v125_v16 = vld [vmem:[%s4874_s1 + $0x188] sm:$0xff] }
 0x1bc   :  { %1807 = vst [vmem:[#allocation1 + $0x1] ss:$9 sm:$0xff] %v1294_v55  ;;  %1085 = vadd.xlane.f32.xlu0 %v1084_v26  ;;  %v2999_v55 = vpop.eup %2998  ;;  %v5024_v9 = vld [vmem:[#allocation18_spill] sm:$0xff] }
 0x1bd   :  { %1809 = vst [vmem:[#allocation1 + $0x2] ss:$9 sm:$0xff] %v1295_v15  ;;  %v5018_v15 = vld [vmem:[#allocation16_spill] sm:$0xff]  ;;  %v1108_v6 = vsel %vm140_vm0, %v954_v17, 0.0  ;;  %v816_v7 = vmul.f32 0.6931472, %v2999_v55 }
 0x1be   :  { %1811 = vst [vmem:[#allocation1 + $0x3] ss:$9 sm:$0xff] %v1296_v8  ;;  %v978_v37 = vpop.xlane.xlu2 %977  ;;  %v4406_v36 = vpop.xlane.xlu1 %703  ;;  %v893_v0 = vsub.f32 %v5018_v15, %v814_v3 }
 0x1bf   :  { %1813 = vst [vmem:[#allocation1 + $0x4] ss:$9 sm:$0xff] %v1297_v2  ;;  %v4391_v23 = vsub.f32 0.0, %v978_v37  ;;  %v3001_v8 = vpop.eup %3000  ;;  %v5020_v2 = vld [vmem:[#allocation12_spill] sm:$0xff]  ;;  %v4439_v48 = vpop.xlane.xlu0 %700  ;;  %3016 = vlog2.f32 %v4406_v36 }
 0x1c0   :  { %1815 = vst [vmem:[#allocation1 + $0x5] ss:$9 sm:$0xff] %v1298_v29  ;;  %v3003_v19 = vpop.eup %3002  ;;  %v891_v26 = vsub.f32 %v5020_v2, %v810_v44  ;;  %v123_v29 = vld [vmem:[%s4874_s1 + $0x178] sm:$0xff]  ;;  %v957_v22 = vmul.f32 %v893_v0, %v124_v52  ;;  %v820_v62 = vmul.f32 0.6931472, %v3001_v8  ;;  %3018 = vlog2.f32 %v4439_v48 }
 0x1c1   :  { %1817 = vst [vmem:[#allocation1 + $0x6] ss:$9 sm:$0xff] %v1299_v57  ;;  %v1301_v47 = vperm.slane %v4391_v23, 0  ;;  %v1302_v1 = vperm.slane %v4391_v23, 1  ;;  %v1303_v4 = vperm.slane %v4391_v23, 2  ;;  %v1304_v34 = vperm.slane %v4391_v23, 3 }
 0x1c2   :  { %1819 = vst [vmem:[#allocation1 + $0x7] ss:$9 sm:$0xff] %v1300_v28  ;;  %v1305_v31 = vperm.slane %v4391_v23, 4  ;;  %v1306_v12 = vperm.slane %v4391_v23, 5  ;;  %v1307_v30 = vperm.slane %v4391_v23, 6  ;;  %v1308_v57 = vperm.slane %v4391_v23, 7  ;;  %v3005_v23 = vpop.eup %3004 }
 0x1c3   :  { %1100 = vadd.xlane.f32.xlu2 %v1099_v59  ;;  %1097 = vadd.xlane.f32.xlu1 %v1096_v21  ;;  %v818_v28 = vmul.f32 0.6931472, %v3003_v19  ;;  %v956_v37 = vmul.f32 %v892_v13, %v123_v29  ;;  %v955_v59 = vmul.f32 %v891_v26, %v122_v14  ;;  %v896_v45 = vsub.f32 %v5021_v41, %v820_v62  ;;  %v5023_v21 = vld [vmem:[#allocation15_spill] sm:$0xff]  ;;  %v5026_v19 = vld [vmem:[#allocation17_spill] sm:$0xff] }
 0x1c4   :  { %1094 = vadd.xlane.f32.xlu0 %v1093_v42  ;;  %v1117_v53 = vsel %vm140_vm0, %v957_v22, 0.0  ;;  %v894_v35 = vsub.f32 %v5023_v21, %v816_v7  ;;  %v3007_v42 = vpop.eup %3006  ;;  %v129_v14 = vld [vmem:[%s4874_s1 + $0x1a8] sm:$0xff] }
 0x1c5   :  { %v895_v33 = vsub.f32 %v5022_v43, %v818_v28  ;;  %v1114_v27 = vsel %vm140_vm0, %v956_v37, 0.0  ;;  %v1111_v25 = vsel %vm140_vm0, %v955_v59, 0.0  ;;  %v3009_v51 = vpop.eup %3008  ;;  %v960_v3 = vmul.f32 %v896_v45, %v127_v46 }
 0x1c6   :  { %v981_v40 = vpop.xlane.xlu1 %980  ;;  %v958_v11 = vmul.f32 %v894_v35, %v125_v16  ;;  %v826_v44 = vmul.f32 0.6931472, %v3007_v42  ;;  %v3011_v35 = vpop.eup %3010  ;;  %v5027_v16 = vld [vmem:[#allocation21_spill] sm:$0xff] }
 0x1c7   :  { %v1167_v38 = vsub.f32 0.0, %v981_v40  ;;  %v959_v18 = vmul.f32 %v895_v33, %v126_v56  ;;  %v4459_v55 = vpop.xlane.xlu0 %706  ;;  %v3013_v46 = vpop.eup %3012 }
 0x1c8   :  { %v3015_v56 = vpop.eup %3014  ;;  %3020 = vlog2.f32 %v4459_v55 }
 0x1c9   :  { %v4416_v10 = vld [vmem:[#allocation1] sm:$0xff]  ;;  %v1309_v61 = vperm.slane %v1167_v38, 0  ;;  %v1310_v50 = vperm.slane %v1167_v38, 1  ;;  %v1311_v17 = vperm.slane %v1167_v38, 2  ;;  %v1313_v15 = vperm.slane %v1167_v38, 4 }
 0x1ca   :  { %1821 = vst [vmem:[#allocation1] ss:$9 sm:$0xff] %v1301_v47  ;;  %v822_v47 = vmul.f32 0.6931472, %v3005_v23  ;;  %v1314_v0 = vperm.slane %v1167_v38, 5  ;;  %v1123_v8 = vsel %vm140_vm0, %v959_v18, 0.0 }
 0x1cb   :  { %1822 = vst [vmem:[#allocation1 + $0x1] ss:$9 sm:$0xff] %v1302_v1  ;;  %1109 = vadd.xlane.f32.xlu2 %v1108_v6  ;;  %1106 = vadd.xlane.f32.xlu1 %v1105_v63  ;;  %v824_v1 = vmul.f32 0.6931472, %v3009_v51  ;;  %v1120_v6 = vsel %vm140_vm0, %v958_v11, 0.0  ;;  %v5025_v63 = vld [vmem:[#allocation22_spill] sm:$0xff]  ;;  %v4492_v11 = vpop.xlane.xlu2 %709 }
 0x1cc   :  { %1823 = vst [vmem:[#allocation1 + $0x2] ss:$9 sm:$0xff] %v1303_v4  ;;  %1103 = vadd.xlane.f32.xlu0 %v1102_v20  ;;  %v1312_v4 = vperm.slane %v1167_v38, 3  ;;  %v897_v13 = vsub.f32 %v5024_v9, %v822_v47  ;;  %v899_v52 = vsub.f32 %v5025_v63, %v826_v44  ;;  %v1316_v26 = vperm.slane %v1167_v38, 7 }
 0x1cd   :  { %1824 = vst [vmem:[#allocation1 + $0x3] ss:$9 sm:$0xff] %v1304_v34  ;;  %v1126_v34 = vsel %vm140_vm0, %v960_v3, 0.0  ;;  %v898_v2 = vsub.f32 %v5026_v19, %v824_v1  ;;  %v830_v39 = vmul.f32 0.6931472, %v3015_v56  ;;  %3022 = vlog2.f32 %v4492_v11 }
 0x1ce   :  { %1825 = vst [vmem:[#allocation1 + $0x4] ss:$9 sm:$0xff] %v1305_v31  ;;  %v1315_v31 = vperm.slane %v1167_v38, 6  ;;  %v984_v20 = vpop.xlane.xlu1 %983 }
 0x1cf   :  { %1826 = vst [vmem:[#allocation1 + $0x5] ss:$9 sm:$0xff] %v1306_v12  ;;  %v128_v12 = vld [vmem:[%s4874_s1 + $0x1a0] sm:$0xff]  ;;  %v962_v62 = vmul.f32 %v898_v2, %v129_v14  ;;  %v4476_v28 = vpop.xlane.xlu0 %712 }
 0x1d0   :  { %1827 = vst [vmem:[#allocation1 + $0x6] ss:$9 sm:$0xff] %v1307_v30  ;;  %v961_v29 = vmul.f32 %v897_v13, %v128_v12  ;;  %v130_v30 = vld [vmem:[%s4874_s1 + $0x1b0] sm:$0xff] }
 0x1d1   :  { %1828 = vst [vmem:[#allocation1 + $0x7] ss:$9 sm:$0xff] %v1308_v57  ;;  %v1168_v57 = vsub.f32 0.0, %v984_v20  ;;  %v963_v22 = vmul.f32 %v899_v52, %v130_v30  ;;  %v1132_v37 = vsel %vm140_vm0, %v962_v62, 0.0 }
 0x1d2   :  { %v1129_v7 = vsel %vm140_vm0, %v961_v29, 0.0 }
 0x1d3   :  { %1118 = vadd.xlane.f32.xlu2 %v1117_v53  ;;  %1115 = vadd.xlane.f32.xlu1 %v1114_v27  ;;  %v1135_v40 = vsel %vm140_vm0, %v963_v22, 0.0  ;;  %v1317_v59 = vperm.slane %v1168_v57, 0  ;;  %v1318_v38 = vperm.slane %v1168_v57, 1  ;;  %v1319_v41 = vperm.slane %v1168_v57, 2  ;;  %v4505_v20 = vpop.xlane.xlu2 %715 }
 0x1d4   :  { %1112 = vadd.xlane.f32.xlu0 %v1111_v25  ;;  %v1320_v43 = vperm.slane %v1168_v57, 3  ;;  %v1321_v33 = vperm.slane %v1168_v57, 4  ;;  %v1322_v53 = vperm.slane %v1168_v57, 5  ;;  %v1323_v27 = vperm.slane %v1168_v57, 6 }
 0x1d5   :  { %v1324_v23 = vperm.slane %v1168_v57, 7  ;;  %v828_v25 = vmul.f32 0.6931472, %v3011_v35  ;;  %3024 = vlog2.f32 %v4505_v20 }
 0x1d6   :  { %v990_v63 = vpop.xlane.xlu1 %989  ;;  %3026 = vlog2.f32 %v4476_v28  ;;  %v137_v28 = vld [vmem:[%s4874_s1 + $0x1e8] sm:$0xff] }
 0x1d7   :  { %v987_v21 = vpop.xlane.xlu0 %986  ;;  %v900_v51 = vsub.f32 %v5027_v16, %v828_v25  ;;  %v1170_v12 = vsub.f32 0.0, %v990_v63  ;;  %v134_v16 = vld [vmem:[%s4874_s1 + $0x1d0] sm:$0xff] }
 0x1d8   :  { %v4457_v24 = vld [vmem:[#allocation1] sm:$0xff]  ;;  %v1169_v58 = vsub.f32 0.0, %v987_v21 }
 0x1d9   :  { %1830 = vst [vmem:[#allocation1] ss:$9 sm:$0xff] %v1309_v61  ;;  %v964_v1 = vmul.f32 %v900_v51, %v131_v54  ;;  %v1333_v29 = vperm.slane %v1170_v12, 0  ;;  %v1334_v30 = vperm.slane %v1170_v12, 1  ;;  %v1335_v57 = vperm.slane %v1170_v12, 2 }
 0x1da   :  { %1831 = vst [vmem:[#allocation1 + $0x1] ss:$9 sm:$0xff] %v1310_v50  ;;  %v1325_v42 = vperm.slane %v1169_v58, 0  ;;  %v1326_v61 = vperm.slane %v1169_v58, 1  ;;  %v832_v50 = vmul.f32 0.6931472, %v3013_v46 }
 0x1db   :  { %1832 = vst [vmem:[#allocation1 + $0x2] ss:$9 sm:$0xff] %v1311_v17  ;;  %1127 = vadd.xlane.f32.xlu2 %v1126_v34  ;;  %1124 = vadd.xlane.f32.xlu1 %v1123_v8  ;;  %v1327_v3 = vperm.slane %v1169_v58, 2  ;;  %v1328_v47 = vperm.slane %v1169_v58, 3  ;;  %v1329_v17 = vperm.slane %v1169_v58, 4  ;;  %v1330_v44 = vperm.slane %v1169_v58, 5 }
 0x1dc   :  { %1833 = vst [vmem:[#allocation1 + $0x3] ss:$9 sm:$0xff] %v1312_v4  ;;  %1121 = vadd.xlane.f32.xlu0 %v1120_v6  ;;  %v5028_v4 = vld [vmem:[#allocation25_spill] sm:$0xff]  ;;  %v1331_v8 = vperm.slane %v1169_v58, 6  ;;  %v1332_v9 = vperm.slane %v1169_v58, 7  ;;  %v1138_v13 = vsel %vm140_vm0, %v964_v1, 0.0 }
 0x1dd   :  { %1834 = vst [vmem:[#allocation1 + $0x4] ss:$9 sm:$0xff] %v1313_v15  ;;  %v902_v15 = vsub.f32 %v5028_v4, %v832_v50  ;;  %v132_v6 = vld [vmem:[%s4874_s1 + $0x1c0] sm:$0xff]  ;;  %v1336_v22 = vperm.slane %v1170_v12, 3  ;;  %v1337_v62 = vperm.slane %v1170_v12, 4 }
 0x1de   :  { %1835 = vst [vmem:[#allocation1 + $0x5] ss:$9 sm:$0xff] %v1314_v0  ;;  %v5029_v0 = vld [vmem:[#allocation20_spill] sm:$0xff] }
 0x1df   :  { %1836 = vst [vmem:[#allocation1 + $0x6] ss:$9 sm:$0xff] %v1315_v31  ;;  %v901_v34 = vsub.f32 %v5029_v0, %v830_v39  ;;  %v133_v31 = vld [vmem:[%s4874_s1 + $0x1c8] sm:$0xff]  ;;  %v996_v50 = vpop.xlane.xlu0 %995 }
 0x1e0   :  { %1837 = vst [vmem:[#allocation1 + $0x7] ss:$9 sm:$0xff] %v1316_v26  ;;  %v966_v52 = vmul.f32 %v902_v15, %v133_v31 }
 0x1e1   :  { %v965_v19 = vmul.f32 %v901_v34, %v132_v6  ;;  %v999_v6 = vpop.xlane.xlu1 %998 }
 0x1e2   :  { %v1144_v2 = vsel %vm140_vm0, %v966_v52, 0.0  ;;  %v1173_v52 = vsub.f32 0.0, %v999_v6 }
 0x1e3   :  { %1136 = vadd.xlane.f32.xlu2 %v1135_v40  ;;  %1133 = vadd.xlane.f32.xlu1 %v1132_v37  ;;  %v1141_v26 = vsel %vm140_vm0, %v965_v19, 0.0  ;;  %v1338_v40 = vperm.slane %v1170_v12, 5  ;;  %v1339_v37 = vperm.slane %v1170_v12, 6 }
 0x1e4   :  { %1130 = vadd.xlane.f32.xlu0 %v1129_v7  ;;  %v1340_v7 = vperm.slane %v1170_v12, 7  ;;  %v1358_v11 = vperm.slane %v1173_v52, 1  ;;  %v1362_v20 = vperm.slane %v1173_v52, 5 }
 0x1e7   :  { %v4482_v45 = vld [vmem:[#allocation1] sm:$0xff] }
 0x1e8   :  { %1839 = vst [vmem:[#allocation1] ss:$9 sm:$0xff] %v1317_v59  ;;  %v993_v59 = vpop.xlane.xlu2 %992 }
 0x1e9   :  { %1840 = vst [vmem:[#allocation1 + $0x1] ss:$9 sm:$0xff] %v1318_v38  ;;  %v3017_v38 = vpop.eup %3016 }
 0x1ea   :  { %1841 = vst [vmem:[#allocation1 + $0x2] ss:$9 sm:$0xff] %v1319_v41  ;;  %v3019_v41 = vpop.eup %3018 }
 0x1eb   :  { %1842 = vst [vmem:[#allocation1 + $0x3] ss:$9 sm:$0xff] %v1320_v43  ;;  %1145 = vadd.xlane.f32.xlu2 %v1144_v2  ;;  %1142 = vadd.xlane.f32.xlu1 %v1141_v26  ;;  %v1171_v43 = vsub.f32 0.0, %v993_v59  ;;  %v834_v36 = vmul.f32 0.6931472, %v3019_v41  ;;  %v3021_v25 = vpop.eup %3020  ;;  %v1357_v2 = vperm.slane %v1173_v52, 0 }
 0x1ec   :  { %1843 = vst [vmem:[#allocation1 + $0x4] ss:$9 sm:$0xff] %v1321_v33  ;;  %1139 = vadd.xlane.f32.xlu0 %v1138_v13  ;;  %v836_v33 = vmul.f32 0.6931472, %v3017_v38  ;;  %v3023_v63 = vpop.eup %3022  ;;  %v1364_v38 = vperm.slane %v1173_v52, 7 }
 0x1ed   :  { %1844 = vst [vmem:[#allocation1 + $0x5] ss:$9 sm:$0xff] %v1322_v53  ;;  %v1341_v53 = vperm.slane %v1171_v43, 0  ;;  %v1343_v48 = vperm.slane %v1171_v43, 2  ;;  %v903_v35 = vsub.f32 %v4003_v5, %v834_v36  ;;  %v1344_v58 = vperm.slane %v1171_v43, 3  ;;  %v3025_v12 = vpop.eup %3024  ;;  %v5031_v36 = vld [vmem:[#allocation23_spill] sm:$0xff] }
 0x1ee   :  { %1845 = vst [vmem:[#allocation1 + $0x6] ss:$9 sm:$0xff] %v1323_v27  ;;  %v1342_v27 = vperm.slane %v1171_v43, 1  ;;  %v904_v21 = vsub.f32 %v3999_v60, %v836_v33  ;;  %v1345_v46 = vperm.slane %v1171_v43, 4  ;;  %v1346_v56 = vperm.slane %v1171_v43, 5 }
 0x1ef   :  { %1846 = vst [vmem:[#allocation1 + $0x7] ss:$9 sm:$0xff] %v1324_v23  ;;  %v1347_v55 = vperm.slane %v1171_v43, 6  ;;  %v838_v60 = vmul.f32 0.6931472, %v3021_v25  ;;  %v1348_v51 = vperm.slane %v1171_v43, 7 }
 0x1f0   :  { %v840_v19 = vmul.f32 0.6931472, %v3023_v63  ;;  %v5030_v43 = vld [vmem:[#allocation24_spill] sm:$0xff] }
 0x1f1   :  { %v905_v54 = vsub.f32 %v4026_v49, %v838_v60 }
 0x1f6   :  { %v4490_v18 = vld [vmem:[#allocation1] sm:$0xff] }
 0x1f7   :  { %1848 = vst [vmem:[#allocation1] ss:$9 sm:$0xff] %v1325_v42  ;;  %v135_v42 = vld [vmem:[%s4874_s1 + $0x1d8] sm:$0xff] }
 0x1f8   :  { %1849 = vst [vmem:[#allocation1 + $0x1] ss:$9 sm:$0xff] %v1326_v61  ;;  %v968_v5 = vmul.f32 %v904_v21, %v135_v42  ;;  %v967_v61 = vmul.f32 %v903_v35, %v134_v16  ;;  %v138_v21 = vld [vmem:[%s4874_s1 + $0x1f0] sm:$0xff] }
 0x1f9   :  { %1850 = vst [vmem:[#allocation1 + $0x2] ss:$9 sm:$0xff] %v1327_v3 }
 0x1fa   :  { %1851 = vst [vmem:[#allocation1 + $0x3] ss:$9 sm:$0xff] %v1328_v47  ;;  %v1150_v39 = vsel %vm140_vm0, %v968_v5, 0.0  ;;  %v1147_v3 = vsel %vm140_vm0, %v967_v61, 0.0  ;;  %v1172_v47 = vsub.f32 0.0, %v996_v50 }
 0x1fb   :  { %1852 = vst [vmem:[#allocation1 + $0x4] ss:$9 sm:$0xff] %v1329_v17  ;;  %1151 = vadd.xlane.f32.xlu1 %v1150_v39  ;;  %1148 = vadd.xlane.f32.xlu0 %v1147_v3  ;;  %v136_v17 = vld [vmem:[%s4874_s1 + $0x1e0] sm:$0xff]  ;;  %v1005_v39 = vpop.xlane.xlu0 %1004 }
 0x1fc   :  { %1853 = vst [vmem:[#allocation1 + $0x5] ss:$9 sm:$0xff] %v1330_v44  ;;  %v1349_v44 = vperm.slane %v1172_v47, 0  ;;  %v969_v1 = vmul.f32 %v905_v54, %v136_v17  ;;  %v1350_v15 = vperm.slane %v1172_v47, 1  ;;  %v1351_v0 = vperm.slane %v1172_v47, 2 }
 0x1fd   :  { %1854 = vst [vmem:[#allocation1 + $0x6] ss:$9 sm:$0xff] %v1331_v8  ;;  %v1352_v8 = vperm.slane %v1172_v47, 3  ;;  %v1353_v49 = vperm.slane %v1172_v47, 4  ;;  %v1355_v13 = vperm.slane %v1172_v47, 6  ;;  %v1356_v31 = vperm.slane %v1172_v47, 7 }
 0x1fe   :  { %1855 = vst [vmem:[#allocation1 + $0x7] ss:$9 sm:$0xff] %v1332_v9  ;;  %v1153_v34 = vsel %vm140_vm0, %v969_v1, 0.0  ;;  %v1354_v9 = vperm.slane %v1172_v47, 5  ;;  %v1175_v3 = vsub.f32 0.0, %v1005_v39 }
 0x1ff   :  { %1154 = vadd.xlane.f32.xlu2 %v1153_v34 }
 0x200   :  { %v1373_v54 = vperm.slane %v1175_v3, 0  ;;  %v1374_v17 = vperm.slane %v1175_v3, 1  ;;  %v1376_v1 = vperm.slane %v1175_v3, 3  ;;  %v1379_v34 = vperm.slane %v1175_v3, 6 }
 0x205   :  { %v4507_v14 = vld [vmem:[#allocation1] sm:$0xff] }
 0x206   :  { %1857 = vst [vmem:[#allocation1] ss:$9 sm:$0xff] %v1333_v29  ;;  %v906_v29 = vsub.f32 %v4022_v32, %v840_v19  ;;  %v1002_v32 = vpop.xlane.xlu2 %1001 }
 0x207   :  { %1858 = vst [vmem:[#allocation1 + $0x1] ss:$9 sm:$0xff] %v1334_v30  ;;  %v1359_v30 = vperm.slane %v1173_v52, 2 }
 0x208   :  { %1859 = vst [vmem:[#allocation1 + $0x2] ss:$9 sm:$0xff] %v1335_v57  ;;  %v3027_v57 = vpop.eup %3026  ;;  %v970_v59 = vmul.f32 %v906_v29, %v137_v28 }
 0x209   :  { %1860 = vst [vmem:[#allocation1 + $0x3] ss:$9 sm:$0xff] %v1336_v22  ;;  %v1360_v22 = vperm.slane %v1173_v52, 3 }
 0x20a   :  { %1861 = vst [vmem:[#allocation1 + $0x4] ss:$9 sm:$0xff] %v1337_v62  ;;  %v1361_v62 = vperm.slane %v1173_v52, 4  ;;  %v1156_v41 = vsel %vm140_vm0, %v970_v59, 0.0 }
 0x20b   :  { %1862 = vst [vmem:[#allocation1 + $0x5] ss:$9 sm:$0xff] %v1338_v40  ;;  %v844_v40 = vmul.f32 0.6931472, %v3025_v12  ;;  %1157 = vadd.xlane.f32.xlu0 %v1156_v41 }
 0x20c   :  { %1863 = vst [vmem:[#allocation1 + $0x6] ss:$9 sm:$0xff] %v1339_v37  ;;  %v842_v37 = vmul.f32 0.6931472, %v3027_v57 }
 0x20d   :  { %1864 = vst [vmem:[#allocation1 + $0x7] ss:$9 sm:$0xff] %v1340_v7  ;;  %v1363_v7 = vperm.slane %v1173_v52, 6  ;;  %v908_v33 = vsub.f32 %v5030_v43, %v844_v40 }
 0x20e   :  { %v1011_v29 = vpop.xlane.xlu2 %1010 }
 0x214   :  { %v4512_v23 = vld [vmem:[#allocation1] sm:$0xff] }
 0x215   :  { %1866 = vst [vmem:[#allocation1] ss:$9 sm:$0xff] %v1341_v53  ;;  %v907_v53 = vsub.f32 %v5031_v36, %v842_v37 }
 0x216   :  { %1867 = vst [vmem:[#allocation1 + $0x1] ss:$9 sm:$0xff] %v1342_v27  ;;  %v1174_v27 = vsub.f32 0.0, %v1002_v32  ;;  %v1020_v39 = vpop.xlane.xlu2 %1019 }
 0x217   :  { %1868 = vst [vmem:[#allocation1 + $0x2] ss:$9 sm:$0xff] %v1343_v48  ;;  %v139_v48 = vld [vmem:[%s4874_s1 + $0x1f8] sm:$0xff]  ;;  %s3055_s1 = smov [#allocation2]  }
 0x218   :  { %1869 = vst [vmem:[#allocation1 + $0x3] ss:$9 sm:$0xff] %v1344_v58  ;;  %v972_v35 = vmul.f32 %v908_v33, %v139_v48  ;;  %v971_v58 = vmul.f32 %v907_v53, %v138_v21  ;;  %v1365_v25 = vperm.slane %v1174_v27, 0  ;;  %v1367_v16 = vperm.slane %v1174_v27, 2  ;;  %s2756_s8 = sshll.u32 %s3055_s1, 4  ;;  %s2757_s8 = int_to_ptr.vmem [resolvable:$true] %s2756_s8 }
 0x219   :  { %1870 = vst [vmem:[#allocation1 + $0x4] ss:$9 sm:$0xff] %v1345_v46  ;;  %v1366_v46 = vperm.slane %v1174_v27, 1  ;;  %v1368_v60 = vperm.slane %v1174_v27, 3  ;;  %v1370_v5 = vperm.slane %v1174_v27, 5  ;;  %v1371_v61 = vperm.slane %v1174_v27, 6 }
 0x21a   :  { %1871 = vst [vmem:[#allocation1 + $0x5] ss:$9 sm:$0xff] %v1346_v56  ;;  %v1159_v42 = vsel %vm140_vm0, %v971_v58, 0.0  ;;  %v1372_v50 = vperm.slane %v1174_v27, 7 }
 0x21b   :  { %1872 = vst [vmem:[#allocation1 + $0x6] ss:$9 sm:$0xff] %v1347_v55  ;;  %v1162_v55 = vsel %vm140_vm0, %v972_v35, 0.0  ;;  %1160 = vadd.xlane.f32.xlu1 %v1159_v42  ;;  %vm2739_vm0 = vcmask 1040384  }
 0x21c   :  { %1873 = vst [vmem:[#allocation1 + $0x7] ss:$9 sm:$0xff] %v1348_v51  ;;  %1163 = vadd.xlane.f32.xlu2 %v1162_v55  ;;  %v1369_v51 = vperm.slane %v1174_v27, 4 }
 0x223   :  { %v4528_v4 = vld [vmem:[#allocation1] sm:$0xff] }
 0x224   :  { %1875 = vst [vmem:[#allocation1] ss:$9 sm:$0xff] %v1349_v44  ;;  %v1375_v44 = vperm.slane %v1175_v3, 2 }
 0x225   :  { %1876 = vst [vmem:[#allocation1 + $0x1] ss:$9 sm:$0xff] %v1350_v15  ;;  %v1377_v15 = vperm.slane %v1175_v3, 4 }
 0x226   :  { %1877 = vst [vmem:[#allocation1 + $0x2] ss:$9 sm:$0xff] %v1351_v0  ;;  %v1378_v0 = vperm.slane %v1175_v3, 5 }
 0x227   :  { %1878 = vst [vmem:[#allocation1 + $0x3] ss:$9 sm:$0xff] %v1352_v8  ;;  %v1380_v8 = vperm.slane %v1175_v3, 7  ;;  %v1180_v3 = vsub.f32 0.0, %v1020_v39 }
 0x228   :  { %1879 = vst [vmem:[#allocation1 + $0x4] ss:$9 sm:$0xff] %v1353_v49  ;;  %v1008_v49 = vpop.xlane.xlu1 %1007 }
 0x229   :  { %1880 = vst [vmem:[#allocation1 + $0x5] ss:$9 sm:$0xff] %v1354_v9  ;;  %v1176_v9 = vsub.f32 0.0, %v1008_v49  ;;  %v1419_v49 = vperm.slane %v1180_v3, 6 }
 0x22a   :  { %1881 = vst [vmem:[#allocation1 + $0x6] ss:$9 sm:$0xff] %v1355_v13 }
 0x22b   :  { %1882 = vst [vmem:[#allocation1 + $0x7] ss:$9 sm:$0xff] %v1356_v31  ;;  %v1381_v13 = vperm.slane %v1176_v9, 0  ;;  %v1382_v31 = vperm.slane %v1176_v9, 1  ;;  %v1383_v63 = vperm.slane %v1176_v9, 2  ;;  %v1384_v52 = vperm.slane %v1176_v9, 3 }
 0x22c   :  { %v1385_v19 = vperm.slane %v1176_v9, 4  ;;  %v1388_v12 = vperm.slane %v1176_v9, 7 }
 0x230   :  { %v1017_v58 = vpop.xlane.xlu1 %1016 }
 0x232   :  { %v4534_v26 = vld [vmem:[#allocation1] sm:$0xff] }
 0x233   :  { %1884 = vst [vmem:[#allocation1] ss:$9 sm:$0xff] %v1357_v2  ;;  %v1386_v2 = vperm.slane %v1176_v9, 5 }
 0x234   :  { %1885 = vst [vmem:[#allocation1 + $0x1] ss:$9 sm:$0xff] %v1358_v11  ;;  %v1387_v11 = vperm.slane %v1176_v9, 6  ;;  %v1420_v9 = vperm.slane %v1180_v3, 7 }
 0x235   :  { %1886 = vst [vmem:[#allocation1 + $0x2] ss:$9 sm:$0xff] %v1359_v30  ;;  %v1177_v30 = vsub.f32 0.0, %v1011_v29 }
 0x236   :  { %1887 = vst [vmem:[#allocation1 + $0x3] ss:$9 sm:$0xff] %v1360_v22 }
 0x237   :  { %1888 = vst [vmem:[#allocation1 + $0x4] ss:$9 sm:$0xff] %v1361_v62  ;;  %v1389_v57 = vperm.slane %v1177_v30, 0  ;;  %v1390_v22 = vperm.slane %v1177_v30, 1  ;;  %v1391_v40 = vperm.slane %v1177_v30, 2  ;;  %v1393_v28 = vperm.slane %v1177_v30, 4 }
 0x238   :  { %1889 = vst [vmem:[#allocation1 + $0x5] ss:$9 sm:$0xff] %v1362_v20  ;;  %v1392_v20 = vperm.slane %v1177_v30, 3  ;;  %v1394_v37 = vperm.slane %v1177_v30, 5  ;;  %v1396_v59 = vperm.slane %v1177_v30, 7 }
 0x239   :  { %1890 = vst [vmem:[#allocation1 + $0x6] ss:$9 sm:$0xff] %v1363_v7  ;;  %v1395_v7 = vperm.slane %v1177_v30, 6 }
 0x23a   :  { %1891 = vst [vmem:[#allocation1 + $0x7] ss:$9 sm:$0xff] %v1364_v38  ;;  %v1014_v38 = vpop.xlane.xlu0 %1013 }
 0x23b   :  { %v1178_v32 = vsub.f32 0.0, %v1014_v38 }
 0x23d   :  { %v1397_v41 = vperm.slane %v1178_v32, 0  ;;  %v1398_v33 = vperm.slane %v1178_v32, 1  ;;  %v1399_v36 = vperm.slane %v1178_v32, 2  ;;  %v1400_v53 = vperm.slane %v1178_v32, 3 }
 0x23e   :  { %v1401_v27 = vperm.slane %v1178_v32, 4  ;;  %v1402_v48 = vperm.slane %v1178_v32, 5  ;;  %v1403_v21 = vperm.slane %v1178_v32, 6  ;;  %v1404_v35 = vperm.slane %v1178_v32, 7 }
 0x241   :  { %v4549_v56 = vld [vmem:[#allocation1] sm:$0xff] }
 0x242   :  { %1893 = vst [vmem:[#allocation1] ss:$9 sm:$0xff] %v1365_v25  ;;  %v1179_v25 = vsub.f32 0.0, %v1017_v58 }
 0x243   :  { %1894 = vst [vmem:[#allocation1 + $0x1] ss:$9 sm:$0xff] %v1366_v46 }
 0x244   :  { %1895 = vst [vmem:[#allocation1 + $0x2] ss:$9 sm:$0xff] %v1367_v16  ;;  %v1405_v46 = vperm.slane %v1179_v25, 0  ;;  %v1406_v55 = vperm.slane %v1179_v25, 1  ;;  %v1407_v16 = vperm.slane %v1179_v25, 2 }
 0x245   :  { %1896 = vst [vmem:[#allocation1 + $0x3] ss:$9 sm:$0xff] %v1368_v60  ;;  %v1408_v60 = vperm.slane %v1179_v25, 3 }
 0x246   :  { %1897 = vst [vmem:[#allocation1 + $0x4] ss:$9 sm:$0xff] %v1369_v51  ;;  %v1409_v51 = vperm.slane %v1179_v25, 4 }
 0x247   :  { %1898 = vst [vmem:[#allocation1 + $0x5] ss:$9 sm:$0xff] %v1370_v5  ;;  %v1410_v5 = vperm.slane %v1179_v25, 5 }
 0x248   :  { %1899 = vst [vmem:[#allocation1 + $0x6] ss:$9 sm:$0xff] %v1371_v61  ;;  %v1411_v61 = vperm.slane %v1179_v25, 6 }
 0x249   :  { %1900 = vst [vmem:[#allocation1 + $0x7] ss:$9 sm:$0xff] %v1372_v50  ;;  %v1412_v50 = vperm.slane %v1179_v25, 7 }
 0x250   :  { %v4553_v47 = vld [vmem:[#allocation1] sm:$0xff] }
 0x251   :  { %1902 = vst [vmem:[#allocation1] ss:$9 sm:$0xff] %v1373_v54  ;;  %v1413_v54 = vperm.slane %v1180_v3, 0 }
 0x252   :  { %1903 = vst [vmem:[#allocation1 + $0x1] ss:$9 sm:$0xff] %v1374_v17  ;;  %v1414_v17 = vperm.slane %v1180_v3, 1 }
 0x253   :  { %1904 = vst [vmem:[#allocation1 + $0x2] ss:$9 sm:$0xff] %v1375_v44 }
 0x254   :  { %1905 = vst [vmem:[#allocation1 + $0x3] ss:$9 sm:$0xff] %v1376_v1  ;;  %v1415_v1 = vperm.slane %v1180_v3, 2 }
 0x255   :  { %1906 = vst [vmem:[#allocation1 + $0x4] ss:$9 sm:$0xff] %v1377_v15  ;;  %v1416_v15 = vperm.slane %v1180_v3, 3 }
 0x256   :  { %1907 = vst [vmem:[#allocation1 + $0x5] ss:$9 sm:$0xff] %v1378_v0  ;;  %v3054_v0 = vmov 0  }
 0x257   :  { %1908 = vst [vmem:[#allocation1 + $0x6] ss:$9 sm:$0xff] %v1379_v34  ;;  %2769 = vset.pattern.permute.xlu0 %v3054_v0  ;;  %2771 = vset.pattern.permute.xlu2 %v3054_v0  ;;  %v1417_v34 = vperm.slane %v1180_v3, 4 }
 0x258   :  { %1909 = vst [vmem:[#allocation1 + $0x7] ss:$9 sm:$0xff] %v1380_v8  ;;  %2389 = vperm.xlu0 %2769, %v4416_v10   ;;  %2770 = vset.pattern.permute.xlu1 %v3054_v0  ;;  %v1418_v8 = vperm.slane %v1180_v3, 5 }
 0x259   :  { %2395 = vperm.xlu2 %2771, %v4482_v45   ;;  %2392 = vperm.xlu1 %2770, %v4457_v24  }
 0x25f   :  { %v4555_v6 = vld [vmem:[#allocation1] sm:$0xff] }
 0x260   :  { %1911 = vst [vmem:[#allocation1] ss:$9 sm:$0xff] %v1381_v13  ;;  %v1023_v13 = vpop.xlane.xlu0 %1022  ;;  %2410 = vperm.xlu0 %2769, %v4534_v26  }
 0x261   :  { %1912 = vst [vmem:[#allocation1 + $0x1] ss:$9 sm:$0xff] %v1382_v31  ;;  %v1181_v31 = vsub.f32 0.0, %v1023_v13  ;;  %2398 = vperm.xlu2 %2771, %v4490_v18   ;;  %2401 = vperm.xlu1 %2770, %v4507_v14   ;;  %v1026_v14 = vpop.xlane.xlu1 %1025 }
 0x262   :  { %1913 = vst [vmem:[#allocation1 + $0x2] ss:$9 sm:$0xff] %v1383_v63  ;;  %v1182_v26 = vsub.f32 0.0, %v1026_v14 }
 0x263   :  { %1914 = vst [vmem:[#allocation1 + $0x3] ss:$9 sm:$0xff] %v1384_v52  ;;  %v1421_v10 = vperm.slane %v1181_v31, 0  ;;  %v1422_v52 = vperm.slane %v1181_v31, 1  ;;  %v1423_v45 = vperm.slane %v1181_v31, 2  ;;  %v1424_v24 = vperm.slane %v1181_v31, 3 }
 0x264   :  { %1915 = vst [vmem:[#allocation1 + $0x4] ss:$9 sm:$0xff] %v1385_v19  ;;  %v1425_v19 = vperm.slane %v1181_v31, 4  ;;  %v1428_v18 = vperm.slane %v1181_v31, 7  ;;  %v1431_v30 = vperm.slane %v1182_v26, 2 }
 0x265   :  { %1916 = vst [vmem:[#allocation1 + $0x5] ss:$9 sm:$0xff] %v1386_v2  ;;  %v1426_v2 = vperm.slane %v1181_v31, 5 }
 0x266   :  { %1917 = vst [vmem:[#allocation1 + $0x6] ss:$9 sm:$0xff] %v1387_v11  ;;  %v1427_v11 = vperm.slane %v1181_v31, 6 }
 0x267   :  { %1918 = vst [vmem:[#allocation1 + $0x7] ss:$9 sm:$0xff] %v1388_v12  ;;  %v1429_v12 = vperm.slane %v1182_v26, 0 }
 0x268   :  { %2419 = vperm.xlu0 %2769, %v4555_v6   ;;  %v1430_v6 = vperm.slane %v1182_v26, 1 }
 0x269   :  { %2404 = vperm.xlu2 %2771, %v4512_v23   ;;  %2407 = vperm.xlu1 %2770, %v4528_v4   ;;  %v1432_v23 = vperm.slane %v1182_v26, 3  ;;  %v1433_v4 = vperm.slane %v1182_v26, 4 }
 0x26e   :  { %v4557_v62 = vld [vmem:[#allocation1] sm:$0xff] }
 0x26f   :  { %1920 = vst [vmem:[#allocation1] ss:$9 sm:$0xff] %v1389_v57  ;;  %v1434_v57 = vperm.slane %v1182_v26, 5 }
 0x270   :  { %1921 = vst [vmem:[#allocation1 + $0x1] ss:$9 sm:$0xff] %v1390_v22  ;;  %v1435_v22 = vperm.slane %v1182_v26, 6 }
 0x271   :  { %1922 = vst [vmem:[#allocation1 + $0x2] ss:$9 sm:$0xff] %v1391_v40  ;;  %2413 = vperm.xlu2 %2771, %v4549_v56   ;;  %2416 = vperm.xlu1 %2770, %v4553_v47   ;;  %v1436_v40 = vperm.slane %v1182_v26, 7  ;;  %v1029_v56 = vpop.xlane.xlu2 %1028 }
 0x272   :  { %1923 = vst [vmem:[#allocation1 + $0x3] ss:$9 sm:$0xff] %v1392_v20  ;;  %v1183_v47 = vsub.f32 0.0, %v1029_v56 }
 0x273   :  { %1924 = vst [vmem:[#allocation1 + $0x4] ss:$9 sm:$0xff] %v1393_v28 }
 0x274   :  { %1925 = vst [vmem:[#allocation1 + $0x5] ss:$9 sm:$0xff] %v1394_v37  ;;  %v1437_v20 = vperm.slane %v1183_v47, 0  ;;  %v1438_v28 = vperm.slane %v1183_v47, 1  ;;  %v1441_v38 = vperm.slane %v1183_v47, 4  ;;  %v1442_v32 = vperm.slane %v1183_v47, 5 }
 0x275   :  { %1926 = vst [vmem:[#allocation1 + $0x6] ss:$9 sm:$0xff] %v1395_v7  ;;  %v1439_v7 = vperm.slane %v1183_v47, 2 }
 0x276   :  { %1927 = vst [vmem:[#allocation1 + $0x7] ss:$9 sm:$0xff] %v1396_v59  ;;  %v1440_v59 = vperm.slane %v1183_v47, 3 }
 0x279   :  { %2422 = vperm.xlu2 %2771, %v4557_v62   ;;  %v1443_v62 = vperm.slane %v1183_v47, 6 }
 0x27d   :  { %v4559_v43 = vld [vmem:[#allocation1] sm:$0xff] }
 0x27e   :  { %1929 = vst [vmem:[#allocation1] ss:$9 sm:$0xff] %v1397_v41  ;;  %2425 = vperm.xlu1 %2770, %v4559_v43   ;;  %v1444_v41 = vperm.slane %v1183_v47, 7  ;;  %v1032_v43 = vpop.xlane.xlu0 %1031 }
 0x27f   :  { %1930 = vst [vmem:[#allocation1 + $0x1] ss:$9 sm:$0xff] %v1398_v33  ;;  %v1184_v33 = vsub.f32 0.0, %v1032_v43 }
 0x280   :  { %1931 = vst [vmem:[#allocation1 + $0x2] ss:$9 sm:$0xff] %v1399_v36 }
 0x281   :  { %1932 = vst [vmem:[#allocation1 + $0x3] ss:$9 sm:$0xff] %v1400_v53  ;;  %v1445_v36 = vperm.slane %v1184_v33, 0  ;;  %v1450_v58 = vperm.slane %v1184_v33, 5  ;;  %v1451_v25 = vperm.slane %v1184_v33, 6 }
 0x282   :  { %1933 = vst [vmem:[#allocation1 + $0x4] ss:$9 sm:$0xff] %v1401_v27  ;;  %v1446_v27 = vperm.slane %v1184_v33, 1 }
 0x283   :  { %1934 = vst [vmem:[#allocation1 + $0x5] ss:$9 sm:$0xff] %v1402_v48  ;;  %v1447_v48 = vperm.slane %v1184_v33, 2 }
 0x284   :  { %1935 = vst [vmem:[#allocation1 + $0x6] ss:$9 sm:$0xff] %v1403_v21  ;;  %v1448_v21 = vperm.slane %v1184_v33, 3 }
 0x285   :  { %1936 = vst [vmem:[#allocation1 + $0x7] ss:$9 sm:$0xff] %v1404_v35  ;;  %v1449_v35 = vperm.slane %v1184_v33, 4 }
 0x28c   :  { %v4561_v42 = vld [vmem:[#allocation1] sm:$0xff] }
 0x28d   :  { %1938 = vst [vmem:[#allocation1] ss:$9 sm:$0xff] %v1405_v46  ;;  %2428 = vperm.xlu0 %2769, %v4561_v42   ;;  %v1452_v46 = vperm.slane %v1184_v33, 7 }
 0x28e   :  { %1939 = vst [vmem:[#allocation1 + $0x1] ss:$9 sm:$0xff] %v1406_v55  ;;  %v1035_v55 = vpop.xlane.xlu1 %1034 }
 0x28f   :  { %1940 = vst [vmem:[#allocation1 + $0x2] ss:$9 sm:$0xff] %v1407_v16  ;;  %v1185_v42 = vsub.f32 0.0, %v1035_v55 }
 0x290   :  { %1941 = vst [vmem:[#allocation1 + $0x3] ss:$9 sm:$0xff] %v1408_v60 }
 0x291   :  { %1942 = vst [vmem:[#allocation1 + $0x4] ss:$9 sm:$0xff] %v1409_v51  ;;  %v1453_v16 = vperm.slane %v1185_v42, 0  ;;  %v1454_v60 = vperm.slane %v1185_v42, 1  ;;  %v1458_v39 = vperm.slane %v1185_v42, 5  ;;  %v1459_v3 = vperm.slane %v1185_v42, 6 }
 0x292   :  { %1943 = vst [vmem:[#allocation1 + $0x5] ss:$9 sm:$0xff] %v1410_v5  ;;  %v1455_v5 = vperm.slane %v1185_v42, 2 }
 0x293   :  { %1944 = vst [vmem:[#allocation1 + $0x6] ss:$9 sm:$0xff] %v1411_v61  ;;  %v1456_v61 = vperm.slane %v1185_v42, 3 }
 0x294   :  { %1945 = vst [vmem:[#allocation1 + $0x7] ss:$9 sm:$0xff] %v1412_v50  ;;  %v1457_v50 = vperm.slane %v1185_v42, 4 }
 0x29b   :  { %v4563_v44 = vld [vmem:[#allocation1] sm:$0xff] }
 0x29c   :  { %1947 = vst [vmem:[#allocation1] ss:$9 sm:$0xff] %v1413_v54  ;;  %2431 = vperm.xlu2 %2771, %v4563_v44   ;;  %v1460_v54 = vperm.slane %v1185_v42, 7 }
 0x29d   :  { %1948 = vst [vmem:[#allocation1 + $0x1] ss:$9 sm:$0xff] %v1414_v17  ;;  %v1038_v17 = vpop.xlane.xlu2 %1037 }
 0x29e   :  { %1949 = vst [vmem:[#allocation1 + $0x2] ss:$9 sm:$0xff] %v1415_v1  ;;  %v1186_v44 = vsub.f32 0.0, %v1038_v17 }
 0x29f   :  { %1950 = vst [vmem:[#allocation1 + $0x3] ss:$9 sm:$0xff] %v1416_v15 }
 0x2a0   :  { %1951 = vst [vmem:[#allocation1 + $0x4] ss:$9 sm:$0xff] %v1417_v34  ;;  %v1461_v1 = vperm.slane %v1186_v44, 0  ;;  %v1462_v15 = vperm.slane %v1186_v44, 1  ;;  %v1463_v34 = vperm.slane %v1186_v44, 2  ;;  %v1467_v13 = vperm.slane %v1186_v44, 6 }
 0x2a1   :  { %1952 = vst [vmem:[#allocation1 + $0x5] ss:$9 sm:$0xff] %v1418_v8  ;;  %v1464_v8 = vperm.slane %v1186_v44, 3  ;;  %v1468_v31 = vperm.slane %v1186_v44, 7 }
 0x2a2   :  { %1953 = vst [vmem:[#allocation1 + $0x6] ss:$9 sm:$0xff] %v1419_v49  ;;  %v1465_v49 = vperm.slane %v1186_v44, 4 }
 0x2a3   :  { %1954 = vst [vmem:[#allocation1 + $0x7] ss:$9 sm:$0xff] %v1420_v9  ;;  %v1466_v9 = vperm.slane %v1186_v44, 5 }
 0x2aa   :  { %v1955_v63 = vld [vmem:[#allocation1] sm:$0xff] }
 0x2ab   :  { %1956 = vst [vmem:[#allocation1] ss:$9 sm:$0xff] %v1421_v10  ;;  %2434 = vperm.xlu1 %2770, %v1955_v63   ;;  %v1041_v10 = vpop.xlane.xlu0 %1040 }
 0x2ac   :  { %1957 = vst [vmem:[#allocation1 + $0x1] ss:$9 sm:$0xff] %v1422_v52  ;;  %v1187_v63 = vsub.f32 0.0, %v1041_v10 }
 0x2ad   :  { %1958 = vst [vmem:[#allocation1 + $0x2] ss:$9 sm:$0xff] %v1423_v45 }
 0x2ae   :  { %1959 = vst [vmem:[#allocation1 + $0x3] ss:$9 sm:$0xff] %v1424_v24  ;;  %v1469_v52 = vperm.slane %v1187_v63, 0  ;;  %v1470_v24 = vperm.slane %v1187_v63, 1  ;;  %v1475_v14 = vperm.slane %v1187_v63, 6  ;;  %v1476_v26 = vperm.slane %v1187_v63, 7 }
 0x2af   :  { %1960 = vst [vmem:[#allocation1 + $0x4] ss:$9 sm:$0xff] %v1425_v19  ;;  %v1471_v19 = vperm.slane %v1187_v63, 2 }
 0x2b0   :  { %1961 = vst [vmem:[#allocation1 + $0x5] ss:$9 sm:$0xff] %v1426_v2  ;;  %v1472_v2 = vperm.slane %v1187_v63, 3 }
 0x2b1   :  { %1962 = vst [vmem:[#allocation1 + $0x6] ss:$9 sm:$0xff] %v1427_v11  ;;  %v1473_v11 = vperm.slane %v1187_v63, 4 }
 0x2b2   :  { %1963 = vst [vmem:[#allocation1 + $0x7] ss:$9 sm:$0xff] %v1428_v18  ;;  %v1474_v18 = vperm.slane %v1187_v63, 5 }
 0x2b9   :  { %v1964_v29 = vld [vmem:[#allocation1] sm:$0xff] }
 0x2ba   :  { %1965 = vst [vmem:[#allocation1] ss:$9 sm:$0xff] %v1429_v12  ;;  %2437 = vperm.xlu0 %2769, %v1964_v29   ;;  %v1044_v12 = vpop.xlane.xlu1 %1043 }
 0x2bb   :  { %1966 = vst [vmem:[#allocation1 + $0x1] ss:$9 sm:$0xff] %v1430_v6  ;;  %v1188_v6 = vsub.f32 0.0, %v1044_v12 }
 0x2bc   :  { %1967 = vst [vmem:[#allocation1 + $0x2] ss:$9 sm:$0xff] %v1431_v30 }
 0x2bd   :  { %1968 = vst [vmem:[#allocation1 + $0x3] ss:$9 sm:$0xff] %v1432_v23  ;;  %v1477_v29 = vperm.slane %v1188_v6, 0  ;;  %v1478_v30 = vperm.slane %v1188_v6, 1  ;;  %v1483_v56 = vperm.slane %v1188_v6, 6  ;;  %v1484_v47 = vperm.slane %v1188_v6, 7 }
 0x2be   :  { %1969 = vst [vmem:[#allocation1 + $0x4] ss:$9 sm:$0xff] %v1433_v4  ;;  %v1479_v4 = vperm.slane %v1188_v6, 2 }
 0x2bf   :  { %1970 = vst [vmem:[#allocation1 + $0x5] ss:$9 sm:$0xff] %v1434_v57  ;;  %v1480_v57 = vperm.slane %v1188_v6, 3 }
 0x2c0   :  { %1971 = vst [vmem:[#allocation1 + $0x6] ss:$9 sm:$0xff] %v1435_v22  ;;  %v1481_v22 = vperm.slane %v1188_v6, 4 }
 0x2c1   :  { %1972 = vst [vmem:[#allocation1 + $0x7] ss:$9 sm:$0xff] %v1436_v40  ;;  %v1482_v40 = vperm.slane %v1188_v6, 5 }
 0x2c8   :  { %v1973_v37 = vld [vmem:[#allocation1] sm:$0xff] }
 0x2c9   :  { %1974 = vst [vmem:[#allocation1] ss:$9 sm:$0xff] %v1437_v20  ;;  %2440 = vperm.xlu2 %2771, %v1973_v37   ;;  %v1047_v20 = vpop.xlane.xlu2 %1046 }
 0x2ca   :  { %1975 = vst [vmem:[#allocation1 + $0x1] ss:$9 sm:$0xff] %v1438_v28  ;;  %v1189_v28 = vsub.f32 0.0, %v1047_v20 }
 0x2cb   :  { %1976 = vst [vmem:[#allocation1 + $0x2] ss:$9 sm:$0xff] %v1439_v7 }
 0x2cc   :  { %1977 = vst [vmem:[#allocation1 + $0x3] ss:$9 sm:$0xff] %v1440_v59  ;;  %v1485_v37 = vperm.slane %v1189_v28, 0  ;;  %v1486_v7 = vperm.slane %v1189_v28, 1  ;;  %v1491_v43 = vperm.slane %v1189_v28, 6  ;;  %v1492_v33 = vperm.slane %v1189_v28, 7 }
 0x2cd   :  { %1978 = vst [vmem:[#allocation1 + $0x4] ss:$9 sm:$0xff] %v1441_v38  ;;  %v1487_v38 = vperm.slane %v1189_v28, 2 }
 0x2ce   :  { %1979 = vst [vmem:[#allocation1 + $0x5] ss:$9 sm:$0xff] %v1442_v32  ;;  %v1488_v32 = vperm.slane %v1189_v28, 3 }
 0x2cf   :  { %1980 = vst [vmem:[#allocation1 + $0x6] ss:$9 sm:$0xff] %v1443_v62  ;;  %v1489_v62 = vperm.slane %v1189_v28, 4 }
 0x2d0   :  { %1981 = vst [vmem:[#allocation1 + $0x7] ss:$9 sm:$0xff] %v1444_v41  ;;  %v1490_v41 = vperm.slane %v1189_v28, 5 }
 0x2d7   :  { %v1982_v53 = vld [vmem:[#allocation1] sm:$0xff] }
 0x2d8   :  { %1983 = vst [vmem:[#allocation1] ss:$9 sm:$0xff] %v1445_v36  ;;  %2443 = vperm.xlu1 %2770, %v1982_v53   ;;  %v1050_v36 = vpop.xlane.xlu0 %1049 }
 0x2d9   :  { %1984 = vst [vmem:[#allocation1 + $0x1] ss:$9 sm:$0xff] %v1446_v27  ;;  %v1190_v53 = vsub.f32 0.0, %v1050_v36 }
 0x2da   :  { %1985 = vst [vmem:[#allocation1 + $0x2] ss:$9 sm:$0xff] %v1447_v48 }
 0x2db   :  { %1986 = vst [vmem:[#allocation1 + $0x3] ss:$9 sm:$0xff] %v1448_v21  ;;  %v1493_v27 = vperm.slane %v1190_v53, 0  ;;  %v1494_v21 = vperm.slane %v1190_v53, 1  ;;  %v1499_v55 = vperm.slane %v1190_v53, 6  ;;  %v1500_v42 = vperm.slane %v1190_v53, 7 }
 0x2dc   :  { %1987 = vst [vmem:[#allocation1 + $0x4] ss:$9 sm:$0xff] %v1449_v35  ;;  %v1495_v35 = vperm.slane %v1190_v53, 2 }
 0x2dd   :  { %1988 = vst [vmem:[#allocation1 + $0x5] ss:$9 sm:$0xff] %v1450_v58  ;;  %v1496_v58 = vperm.slane %v1190_v53, 3 }
 0x2de   :  { %1989 = vst [vmem:[#allocation1 + $0x6] ss:$9 sm:$0xff] %v1451_v25  ;;  %v1497_v25 = vperm.slane %v1190_v53, 4 }
 0x2df   :  { %1990 = vst [vmem:[#allocation1 + $0x7] ss:$9 sm:$0xff] %v1452_v46  ;;  %v1498_v46 = vperm.slane %v1190_v53, 5 }
 0x2e6   :  { %v1991_v51 = vld [vmem:[#allocation1] sm:$0xff] }
 0x2e7   :  { %1992 = vst [vmem:[#allocation1] ss:$9 sm:$0xff] %v1453_v16  ;;  %2446 = vperm.xlu0 %2769, %v1991_v51   ;;  %v1053_v16 = vpop.xlane.xlu1 %1052 }
 0x2e8   :  { %1993 = vst [vmem:[#allocation1 + $0x1] ss:$9 sm:$0xff] %v1454_v60  ;;  %v1191_v60 = vsub.f32 0.0, %v1053_v16 }
 0x2e9   :  { %1994 = vst [vmem:[#allocation1 + $0x2] ss:$9 sm:$0xff] %v1455_v5 }
 0x2ea   :  { %1995 = vst [vmem:[#allocation1 + $0x3] ss:$9 sm:$0xff] %v1456_v61  ;;  %v1501_v51 = vperm.slane %v1191_v60, 0  ;;  %v1502_v5 = vperm.slane %v1191_v60, 1  ;;  %v1507_v17 = vperm.slane %v1191_v60, 6  ;;  %v1508_v44 = vperm.slane %v1191_v60, 7 }
 0x2eb   :  { %1996 = vst [vmem:[#allocation1 + $0x4] ss:$9 sm:$0xff] %v1457_v50  ;;  %v1503_v50 = vperm.slane %v1191_v60, 2 }
 0x2ec   :  { %1997 = vst [vmem:[#allocation1 + $0x5] ss:$9 sm:$0xff] %v1458_v39  ;;  %v1504_v39 = vperm.slane %v1191_v60, 3 }
 0x2ed   :  { %1998 = vst [vmem:[#allocation1 + $0x6] ss:$9 sm:$0xff] %v1459_v3  ;;  %v1505_v3 = vperm.slane %v1191_v60, 4 }
 0x2ee   :  { %1999 = vst [vmem:[#allocation1 + $0x7] ss:$9 sm:$0xff] %v1460_v54  ;;  %v1506_v54 = vperm.slane %v1191_v60, 5 }
 0x2f5   :  { %v2000_v0 = vld [vmem:[#allocation1] sm:$0xff] }
 0x2f6   :  { %2001 = vst [vmem:[#allocation1] ss:$9 sm:$0xff] %v1461_v1  ;;  %2449 = vperm.xlu2 %2771, %v2000_v0   ;;  %v1056_v1 = vpop.xlane.xlu2 %1055 }
 0x2f7   :  { %2002 = vst [vmem:[#allocation1 + $0x1] ss:$9 sm:$0xff] %v1462_v15  ;;  %v1192_v15 = vsub.f32 0.0, %v1056_v1 }
 0x2f8   :  { %2003 = vst [vmem:[#allocation1 + $0x2] ss:$9 sm:$0xff] %v1463_v34 }
 0x2f9   :  { %2004 = vst [vmem:[#allocation1 + $0x3] ss:$9 sm:$0xff] %v1464_v8  ;;  %v1509_v0 = vperm.slane %v1192_v15, 0  ;;  %v1510_v34 = vperm.slane %v1192_v15, 1  ;;  %v1515_v10 = vperm.slane %v1192_v15, 6  ;;  %v1516_v63 = vperm.slane %v1192_v15, 7 }
 0x2fa   :  { %2005 = vst [vmem:[#allocation1 + $0x4] ss:$9 sm:$0xff] %v1465_v49  ;;  %v1511_v49 = vperm.slane %v1192_v15, 2 }
 0x2fb   :  { %2006 = vst [vmem:[#allocation1 + $0x5] ss:$9 sm:$0xff] %v1466_v9  ;;  %v1512_v9 = vperm.slane %v1192_v15, 3 }
 0x2fc   :  { %2007 = vst [vmem:[#allocation1 + $0x6] ss:$9 sm:$0xff] %v1467_v13  ;;  %v1513_v13 = vperm.slane %v1192_v15, 4 }
 0x2fd   :  { %2008 = vst [vmem:[#allocation1 + $0x7] ss:$9 sm:$0xff] %v1468_v31  ;;  %v1514_v31 = vperm.slane %v1192_v15, 5 }
 0x304   :  { %v2009_v45 = vld [vmem:[#allocation1] sm:$0xff] }
 0x305   :  { %2010 = vst [vmem:[#allocation1] ss:$9 sm:$0xff] %v1469_v52  ;;  %2452 = vperm.xlu1 %2770, %v2009_v45   ;;  %v1059_v52 = vpop.xlane.xlu0 %1058 }
 0x306   :  { %2011 = vst [vmem:[#allocation1 + $0x1] ss:$9 sm:$0xff] %v1470_v24  ;;  %v1193_v45 = vsub.f32 0.0, %v1059_v52 }
 0x307   :  { %2012 = vst [vmem:[#allocation1 + $0x2] ss:$9 sm:$0xff] %v1471_v19  ;;  %v1065_v19 = vpop.xlane.xlu2 %1064 }
 0x308   :  { %2013 = vst [vmem:[#allocation1 + $0x3] ss:$9 sm:$0xff] %v1472_v2  ;;  %v1517_v24 = vperm.slane %v1193_v45, 0  ;;  %v1522_v12 = vperm.slane %v1193_v45, 5  ;;  %v1523_v6 = vperm.slane %v1193_v45, 6 }
 0x309   :  { %2014 = vst [vmem:[#allocation1 + $0x4] ss:$9 sm:$0xff] %v1473_v11  ;;  %v1518_v11 = vperm.slane %v1193_v45, 1 }
 0x30a   :  { %2015 = vst [vmem:[#allocation1 + $0x5] ss:$9 sm:$0xff] %v1474_v18  ;;  %v1519_v18 = vperm.slane %v1193_v45, 2 }
 0x30b   :  { %2016 = vst [vmem:[#allocation1 + $0x6] ss:$9 sm:$0xff] %v1475_v14  ;;  %v1520_v14 = vperm.slane %v1193_v45, 3 }
 0x30c   :  { %2017 = vst [vmem:[#allocation1 + $0x7] ss:$9 sm:$0xff] %v1476_v26  ;;  %v1521_v26 = vperm.slane %v1193_v45, 4 }
 0x313   :  { %v2018_v23 = vld [vmem:[#allocation1] sm:$0xff] }
 0x314   :  { %2019 = vst [vmem:[#allocation1] ss:$9 sm:$0xff] %v1477_v29  ;;  %2455 = vperm.xlu0 %2769, %v2018_v23   ;;  %v1524_v29 = vperm.slane %v1193_v45, 7 }
 0x315   :  { %2020 = vst [vmem:[#allocation1 + $0x1] ss:$9 sm:$0xff] %v1478_v30  ;;  %v1062_v30 = vpop.xlane.xlu1 %1061 }
 0x316   :  { %2021 = vst [vmem:[#allocation1 + $0x2] ss:$9 sm:$0xff] %v1479_v4  ;;  %v1194_v23 = vsub.f32 0.0, %v1062_v30  ;;  %v4580_v4 = vpop.xlane.xlu2 %1073 }
 0x317   :  { %2022 = vst [vmem:[#allocation1 + $0x3] ss:$9 sm:$0xff] %v1480_v57 }
 0x318   :  { %2023 = vst [vmem:[#allocation1 + $0x4] ss:$9 sm:$0xff] %v1481_v22  ;;  %v1525_v57 = vperm.slane %v1194_v23, 0  ;;  %v1526_v22 = vperm.slane %v1194_v23, 1  ;;  %v1529_v20 = vperm.slane %v1194_v23, 4  ;;  %v1530_v28 = vperm.slane %v1194_v23, 5 }
 0x319   :  { %2024 = vst [vmem:[#allocation1 + $0x5] ss:$9 sm:$0xff] %v1482_v40 }
 0x31a   :  { %2025 = vst [vmem:[#allocation1 + $0x6] ss:$9 sm:$0xff] %v1483_v56  ;;  %v1527_v56 = vperm.slane %v1194_v23, 2 }
 0x31b   :  { %2026 = vst [vmem:[#allocation1 + $0x7] ss:$9 sm:$0xff] %v1484_v47  ;;  %v1528_v47 = vperm.slane %v1194_v23, 3 }
 0x322   :  { %v2027_v59 = vld [vmem:[#allocation1] sm:$0xff] }
 0x323   :  { %2028 = vst [vmem:[#allocation1] ss:$9 sm:$0xff] %v1485_v37  ;;  %2458 = vperm.xlu2 %2771, %v2027_v59   ;;  %v1531_v37 = vperm.slane %v1194_v23, 6  ;;  %v4582_v59 = vpop.xlane.xlu2 %1082 }
 0x324   :  { %2029 = vst [vmem:[#allocation1 + $0x1] ss:$9 sm:$0xff] %v1486_v7  ;;  %v1068_v7 = vpop.xlane.xlu0 %1067 }
 0x325   :  { %2030 = vst [vmem:[#allocation1 + $0x2] ss:$9 sm:$0xff] %v1487_v38  ;;  %v1532_v38 = vperm.slane %v1194_v23, 7 }
 0x326   :  { %2031 = vst [vmem:[#allocation1 + $0x3] ss:$9 sm:$0xff] %v1488_v32  ;;  %v1071_v32 = vpop.xlane.xlu1 %1070 }
 0x327   :  { %2032 = vst [vmem:[#allocation1 + $0x4] ss:$9 sm:$0xff] %v1489_v62  ;;  %v1195_v62 = vsub.f32 0.0, %v1065_v19 }
 0x328   :  { %2033 = vst [vmem:[#allocation1 + $0x5] ss:$9 sm:$0xff] %v1490_v41 }
 0x329   :  { %2034 = vst [vmem:[#allocation1 + $0x6] ss:$9 sm:$0xff] %v1491_v43  ;;  %v1533_v41 = vperm.slane %v1195_v62, 0  ;;  %v1534_v43 = vperm.slane %v1195_v62, 1 }
 0x32a   :  { %2035 = vst [vmem:[#allocation1 + $0x7] ss:$9 sm:$0xff] %v1492_v33 }
 0x32b   :  { %v4586_v53 = vpop.xlane.xlu2 %1091 }
 0x32c   :  { %v4584_v36 = vpop.xlane.xlu0 %1076 }
 0x331   :  { %v2036_v48 = vld [vmem:[#allocation1] sm:$0xff] }
 0x332   :  { %2037 = vst [vmem:[#allocation1] ss:$9 sm:$0xff] %v1493_v27  ;;  %2461 = vperm.xlu1 %2770, %v2036_v48   ;;  %v1535_v27 = vperm.slane %v1195_v62, 2  ;;  %v1536_v48 = vperm.slane %v1195_v62, 3 }
 0x333   :  { %2038 = vst [vmem:[#allocation1 + $0x1] ss:$9 sm:$0xff] %v1494_v21  ;;  %v4588_v21 = vpop.xlane.xlu1 %1079  ;;  %v4592_v16 = vpop.xlane.xlu2 %1100 }
 0x334   :  { %2039 = vst [vmem:[#allocation1 + $0x2] ss:$9 sm:$0xff] %v1495_v35  ;;  %v1537_v35 = vperm.slane %v1195_v62, 4 }
 0x335   :  { %2040 = vst [vmem:[#allocation1 + $0x3] ss:$9 sm:$0xff] %v1496_v58  ;;  %v1538_v58 = vperm.slane %v1195_v62, 5 }
 0x336   :  { %2041 = vst [vmem:[#allocation1 + $0x4] ss:$9 sm:$0xff] %v1497_v25  ;;  %v1539_v25 = vperm.slane %v1195_v62, 6 }
 0x337   :  { %2042 = vst [vmem:[#allocation1 + $0x5] ss:$9 sm:$0xff] %v1498_v46  ;;  %v1540_v46 = vperm.slane %v1195_v62, 7 }
 0x338   :  { %2043 = vst [vmem:[#allocation1 + $0x6] ss:$9 sm:$0xff] %v1499_v55  ;;  %v1196_v55 = vsub.f32 0.0, %v1068_v7 }
 0x339   :  { %2044 = vst [vmem:[#allocation1 + $0x7] ss:$9 sm:$0xff] %v1500_v42  ;;  %v4590_v42 = vpop.xlane.xlu0 %1085 }
 0x33a   :  { %v1548_v15 = vperm.slane %v1196_v55, 7 }
 0x33b   :  { %v4594_v60 = vpop.xlane.xlu1 %1088  ;;  %v4598_v1 = vpop.xlane.xlu2 %1109 }
 0x340   :  { %v2045_v61 = vld [vmem:[#allocation1] sm:$0xff] }
 0x341   :  { %2046 = vst [vmem:[#allocation1] ss:$9 sm:$0xff] %v1501_v51  ;;  %2464 = vperm.xlu0 %2769, %v2045_v61   ;;  %v1541_v51 = vperm.slane %v1196_v55, 0  ;;  %v1542_v61 = vperm.slane %v1196_v55, 1 }
 0x342   :  { %2047 = vst [vmem:[#allocation1 + $0x1] ss:$9 sm:$0xff] %v1502_v5 }
 0x343   :  { %2048 = vst [vmem:[#allocation1 + $0x2] ss:$9 sm:$0xff] %v1503_v50  ;;  %v1543_v50 = vperm.slane %v1196_v55, 2 }
 0x344   :  { %2049 = vst [vmem:[#allocation1 + $0x3] ss:$9 sm:$0xff] %v1504_v39  ;;  %v1544_v39 = vperm.slane %v1196_v55, 3 }
 0x345   :  { %2050 = vst [vmem:[#allocation1 + $0x4] ss:$9 sm:$0xff] %v1505_v3  ;;  %v1545_v3 = vperm.slane %v1196_v55, 4 }
 0x346   :  { %2051 = vst [vmem:[#allocation1 + $0x5] ss:$9 sm:$0xff] %v1506_v54  ;;  %v1546_v54 = vperm.slane %v1196_v55, 5 }
 0x347   :  { %2052 = vst [vmem:[#allocation1 + $0x6] ss:$9 sm:$0xff] %v1507_v17  ;;  %v1547_v17 = vperm.slane %v1196_v55, 6 }
 0x348   :  { %2053 = vst [vmem:[#allocation1 + $0x7] ss:$9 sm:$0xff] %v1508_v44  ;;  %v4596_v44 = vpop.xlane.xlu0 %1094 }
 0x34f   :  { %v2054_v8 = vld [vmem:[#allocation1] sm:$0xff] }
 0x350   :  { %2055 = vst [vmem:[#allocation1] ss:$9 sm:$0xff] %v1509_v0  ;;  %2467 = vperm.xlu2 %2771, %v2054_v8   ;;  %v4600_v0 = vpop.xlane.xlu1 %1097 }
 0x351   :  { %2056 = vst [vmem:[#allocation1 + $0x1] ss:$9 sm:$0xff] %v1510_v34  ;;  %v1197_v34 = vsub.f32 0.0, %v1071_v32 }
 0x352   :  { %2057 = vst [vmem:[#allocation1 + $0x2] ss:$9 sm:$0xff] %v1511_v49 }
 0x353   :  { %2058 = vst [vmem:[#allocation1 + $0x3] ss:$9 sm:$0xff] %v1512_v9  ;;  %v1549_v8 = vperm.slane %v1197_v34, 0  ;;  %v1550_v49 = vperm.slane %v1197_v34, 1  ;;  %v1553_v45 = vperm.slane %v1197_v34, 4  ;;  %v1555_v19 = vperm.slane %v1197_v34, 6 }
 0x354   :  { %2059 = vst [vmem:[#allocation1 + $0x4] ss:$9 sm:$0xff] %v1513_v13  ;;  %v4602_v13 = vpop.xlane.xlu0 %1103 }
 0x355   :  { %2060 = vst [vmem:[#allocation1 + $0x5] ss:$9 sm:$0xff] %v1514_v31  ;;  %v4604_v31 = vpop.xlane.xlu2 %1118 }
 0x356   :  { %2061 = vst [vmem:[#allocation1 + $0x6] ss:$9 sm:$0xff] %v1515_v10  ;;  %v1551_v10 = vperm.slane %v1197_v34, 2 }
 0x357   :  { %2062 = vst [vmem:[#allocation1 + $0x7] ss:$9 sm:$0xff] %v1516_v63  ;;  %v1552_v63 = vperm.slane %v1197_v34, 3 }
 0x358   :  { %v4606_v52 = vpop.xlane.xlu1 %1106 }
 0x35e   :  { %v2063_v2 = vld [vmem:[#allocation1] sm:$0xff] }
 0x35f   :  { %2064 = vst [vmem:[#allocation1] ss:$9 sm:$0xff] %v1517_v24  ;;  %2470 = vperm.xlu1 %2770, %v2063_v2   ;;  %v1554_v24 = vperm.slane %v1197_v34, 5  ;;  %v1556_v2 = vperm.slane %v1197_v34, 7 }
 0x360   :  { %2065 = vst [vmem:[#allocation1 + $0x1] ss:$9 sm:$0xff] %v1518_v11  ;;  %v1198_v11 = vsub.f32 0.0, %v4580_v4 }
 0x361   :  { %2066 = vst [vmem:[#allocation1 + $0x2] ss:$9 sm:$0xff] %v1519_v18  ;;  %v4609_v18 = vpop.xlane.xlu0 %1112 }
 0x362   :  { %2067 = vst [vmem:[#allocation1 + $0x3] ss:$9 sm:$0xff] %v1520_v14  ;;  %v4611_v14 = vpop.xlane.xlu2 %1127  ;;  %v1559_v30 = vperm.slane %v1198_v11, 2  ;;  %v1560_v23 = vperm.slane %v1198_v11, 3 }
 0x363   :  { %2068 = vst [vmem:[#allocation1 + $0x4] ss:$9 sm:$0xff] %v1521_v26  ;;  %v4613_v26 = vpop.xlane.xlu1 %1115 }
 0x364   :  { %2069 = vst [vmem:[#allocation1 + $0x5] ss:$9 sm:$0xff] %v1522_v12  ;;  %v1557_v12 = vperm.slane %v1198_v11, 0 }
 0x365   :  { %2070 = vst [vmem:[#allocation1 + $0x6] ss:$9 sm:$0xff] %v1523_v6  ;;  %v1558_v6 = vperm.slane %v1198_v11, 1 }
 0x366   :  { %2071 = vst [vmem:[#allocation1 + $0x7] ss:$9 sm:$0xff] %v1524_v29 }
 0x369   :  { %v4615_v4 = vpop.xlane.xlu0 %1121 }
 0x36d   :  { %v2072_v40 = vld [vmem:[#allocation1] sm:$0xff] }
 0x36e   :  { %2073 = vst [vmem:[#allocation1] ss:$9 sm:$0xff] %v1525_v57  ;;  %2473 = vperm.xlu0 %2769, %v2072_v40   ;;  %v1561_v57 = vperm.slane %v1198_v11, 4  ;;  %v1563_v40 = vperm.slane %v1198_v11, 6 }
 0x36f   :  { %2074 = vst [vmem:[#allocation1 + $0x1] ss:$9 sm:$0xff] %v1526_v22  ;;  %v1562_v22 = vperm.slane %v1198_v11, 5 }
 0x370   :  { %2075 = vst [vmem:[#allocation1 + $0x2] ss:$9 sm:$0xff] %v1527_v56  ;;  %v4617_v56 = vpop.xlane.xlu2 %1136 }
 0x371   :  { %2076 = vst [vmem:[#allocation1 + $0x3] ss:$9 sm:$0xff] %v1528_v47  ;;  %v1564_v47 = vperm.slane %v1198_v11, 7  ;;  %v4622_v32 = vpop.xlane.xlu0 %1130 }
 0x372   :  { %2077 = vst [vmem:[#allocation1 + $0x4] ss:$9 sm:$0xff] %v1529_v20  ;;  %v4619_v20 = vpop.xlane.xlu1 %1124 }
 0x373   :  { %2078 = vst [vmem:[#allocation1 + $0x5] ss:$9 sm:$0xff] %v1530_v28  ;;  %v1199_v28 = vsub.f32 0.0, %v4584_v36 }
 0x374   :  { %2079 = vst [vmem:[#allocation1 + $0x6] ss:$9 sm:$0xff] %v1531_v37 }
 0x375   :  { %2080 = vst [vmem:[#allocation1 + $0x7] ss:$9 sm:$0xff] %v1532_v38  ;;  %v1565_v37 = vperm.slane %v1199_v28, 0  ;;  %v1566_v38 = vperm.slane %v1199_v28, 1  ;;  %v1572_v36 = vperm.slane %v1199_v28, 7 }
 0x378   :  { %v4624_v62 = vpop.xlane.xlu2 %1145 }
 0x37c   :  { %v2081_v33 = vld [vmem:[#allocation1] sm:$0xff] }
 0x37d   :  { %2082 = vst [vmem:[#allocation1] ss:$9 sm:$0xff] %v1533_v41  ;;  %2476 = vperm.xlu2 %2771, %v2081_v33   ;;  %v1567_v41 = vperm.slane %v1199_v28, 2  ;;  %v4626_v33 = vpop.xlane.xlu1 %1133 }
 0x37e   :  { %2083 = vst [vmem:[#allocation1 + $0x1] ss:$9 sm:$0xff] %v1534_v43  ;;  %v1568_v43 = vperm.slane %v1199_v28, 3 }
 0x37f   :  { %2084 = vst [vmem:[#allocation1 + $0x2] ss:$9 sm:$0xff] %v1535_v27  ;;  %v1569_v27 = vperm.slane %v1199_v28, 4 }
 0x380   :  { %2085 = vst [vmem:[#allocation1 + $0x3] ss:$9 sm:$0xff] %v1536_v48  ;;  %v1570_v48 = vperm.slane %v1199_v28, 5 }
 0x381   :  { %2086 = vst [vmem:[#allocation1 + $0x4] ss:$9 sm:$0xff] %v1537_v35  ;;  %v1571_v35 = vperm.slane %v1199_v28, 6 }
 0x382   :  { %2087 = vst [vmem:[#allocation1 + $0x5] ss:$9 sm:$0xff] %v1538_v58  ;;  %v4628_v58 = vpop.xlane.xlu2 %1154 }
 0x383   :  { %2088 = vst [vmem:[#allocation1 + $0x6] ss:$9 sm:$0xff] %v1539_v25  ;;  %v1200_v25 = vsub.f32 0.0, %v4588_v21 }
 0x384   :  { %2089 = vst [vmem:[#allocation1 + $0x7] ss:$9 sm:$0xff] %v1540_v46  ;;  %v4631_v46 = vpop.xlane.xlu0 %1139 }
 0x385   :  { %v4633_v55 = vpop.xlane.xlu1 %1142  ;;  %v1580_v34 = vperm.slane %v1200_v25, 7 }
 0x38b   :  { %v2090_v5 = vld [vmem:[#allocation1] sm:$0xff] }
 0x38c   :  { %2091 = vst [vmem:[#allocation1] ss:$9 sm:$0xff] %v1541_v51  ;;  %2479 = vperm.xlu1 %2770, %v2090_v5   ;;  %v1573_v51 = vperm.slane %v1200_v25, 0  ;;  %v1574_v5 = vperm.slane %v1200_v25, 1  ;;  %v4637_v21 = vpop.xlane.xlu0 %1148 }
 0x38d   :  { %2092 = vst [vmem:[#allocation1 + $0x1] ss:$9 sm:$0xff] %v1542_v61 }
 0x38e   :  { %2093 = vst [vmem:[#allocation1 + $0x2] ss:$9 sm:$0xff] %v1543_v50  ;;  %v1575_v50 = vperm.slane %v1200_v25, 2 }
 0x38f   :  { %2094 = vst [vmem:[#allocation1 + $0x3] ss:$9 sm:$0xff] %v1544_v39  ;;  %v4635_v39 = vpop.xlane.xlu2 %1163 }
 0x390   :  { %2095 = vst [vmem:[#allocation1 + $0x4] ss:$9 sm:$0xff] %v1545_v3  ;;  %v1576_v3 = vperm.slane %v1200_v25, 3 }
 0x391   :  { %2096 = vst [vmem:[#allocation1 + $0x5] ss:$9 sm:$0xff] %v1546_v54  ;;  %v1577_v54 = vperm.slane %v1200_v25, 4 }
 0x392   :  { %2097 = vst [vmem:[#allocation1 + $0x6] ss:$9 sm:$0xff] %v1547_v17  ;;  %v1578_v17 = vperm.slane %v1200_v25, 5 }
 0x393   :  { %2098 = vst [vmem:[#allocation1 + $0x7] ss:$9 sm:$0xff] %v1548_v15  ;;  %v1579_v15 = vperm.slane %v1200_v25, 6 }
 0x39a   :  { %v2099_v9 = vld [vmem:[#allocation1] sm:$0xff] }
 0x39b   :  { %2100 = vst [vmem:[#allocation1] ss:$9 sm:$0xff] %v1549_v8  ;;  %2482 = vperm.xlu0 %2769, %v2099_v9   ;;  %v4639_v8 = vpop.xlane.xlu1 %1151  ;;  %v1201_v9 = vsub.f32 0.0, %v4582_v59 }
 0x39c   :  { %2101 = vst [vmem:[#allocation1 + $0x1] ss:$9 sm:$0xff] %v1550_v49  ;;  %v2396_v49 = vpop.permute.xlu2 %2395 }
 0x39d   :  { %2102 = vst [vmem:[#allocation1 + $0x2] ss:$9 sm:$0xff] %v1551_v10  ;;  %v1581_v10 = vperm.slane %v1201_v9, 0  ;;  %v1584_v11 = vperm.slane %v1201_v9, 3 }
 0x39e   :  { %2103 = vst [vmem:[#allocation1 + $0x3] ss:$9 sm:$0xff] %v1552_v63  ;;  %v1582_v63 = vperm.slane %v1201_v9, 1 }
 0x39f   :  { %2104 = vst [vmem:[#allocation1 + $0x4] ss:$9 sm:$0xff] %v1553_v45 }
 0x3a0   :  { %2105 = vst [vmem:[#allocation1 + $0x5] ss:$9 sm:$0xff] %v1554_v24  ;;  %v4642_v24 = vpop.xlane.xlu0 %1157 }
 0x3a1   :  { %2106 = vst [vmem:[#allocation1 + $0x6] ss:$9 sm:$0xff] %v1555_v19  ;;  %v2580_v19 = vlaneseq }
 0x3a2   :  { %2107 = vst [vmem:[#allocation1 + $0x7] ss:$9 sm:$0xff] %v1556_v2  ;;  %v1583_v2 = vperm.slane %v1201_v9, 2 }
 0x3a3   :  { %v4647_v59 = vand.u32 127, %v2580_v19 }
 0x3a5   :  { %v4656_v28 = vadd.s32 4294967288, %v4647_v59 }
 0x3a9   :  { %v2108_v29 = vld [vmem:[#allocation1] sm:$0xff] }
 0x3aa   :  { %2109 = vst [vmem:[#allocation1] ss:$9 sm:$0xff] %v1557_v12  ;;  %2485 = vperm.xlu2 %2771, %v2108_v29   ;;  %v4644_v12 = vpop.xlane.xlu1 %1160  ;;  %v1585_v29 = vperm.slane %v1201_v9, 4 }
 0x3ab   :  { %2110 = vst [vmem:[#allocation1 + $0x1] ss:$9 sm:$0xff] %v1558_v6  ;;  %v2399_v6 = vpop.permute.xlu2 %2398 }
 0x3ac   :  { %2111 = vst [vmem:[#allocation1 + $0x2] ss:$9 sm:$0xff] %v1559_v30  ;;  %v1586_v30 = vperm.slane %v1201_v9, 5 }
 0x3ad   :  { %2112 = vst [vmem:[#allocation1 + $0x3] ss:$9 sm:$0xff] %v1560_v23  ;;  %v1587_v23 = vperm.slane %v1201_v9, 6 }
 0x3ae   :  { %2113 = vst [vmem:[#allocation1 + $0x4] ss:$9 sm:$0xff] %v1561_v57  ;;  %v1588_v57 = vperm.slane %v1201_v9, 7 }
 0x3af   :  { %2114 = vst [vmem:[#allocation1 + $0x5] ss:$9 sm:$0xff] %v1562_v22  ;;  %v4650_v22 = vadd.s32 4294967280, %v4647_v59 }
 0x3b0   :  { %2115 = vst [vmem:[#allocation1 + $0x6] ss:$9 sm:$0xff] %v1563_v40  ;;  %v2390_v40 = vpop.permute.xlu0 %2389 }
 0x3b1   :  { %2116 = vst [vmem:[#allocation1 + $0x7] ss:$9 sm:$0xff] %v1564_v47  ;;  %v4653_v47 = vadd.s32 4294967272, %v4647_v59 }
 0x3b8   :  { %v2117_v7 = vld [vmem:[#allocation1] sm:$0xff] }
 0x3b9   :  { %2118 = vst [vmem:[#allocation1] ss:$9 sm:$0xff] %v1565_v37  ;;  %2488 = vperm.xlu1 %2770, %v2117_v7   ;;  %v1202_v37 = vsub.f32 0.0, %v4590_v42  ;;  %v2393_v7 = vpop.permute.xlu1 %2392 }
 0x3ba   :  { %2119 = vst [vmem:[#allocation1 + $0x1] ss:$9 sm:$0xff] %v1566_v38  ;;  %v2582_v38 = vperm.slane %v2390_v40, %v4647_v59 }
 0x3bb   :  { %2120 = vst [vmem:[#allocation1 + $0x2] ss:$9 sm:$0xff] %v1567_v41  ;;  %v2584_v41 = vperm.slane %v2393_v7, %v4656_v28  ;;  %v1590_v42 = vperm.slane %v1202_v37, 1  ;;  %v1595_v9 = vperm.slane %v1202_v37, 6 }
 0x3bc   :  { %2121 = vst [vmem:[#allocation1 + $0x3] ss:$9 sm:$0xff] %v1568_v43  ;;  %v2588_v43 = vperm.slane %v2396_v49, %v4650_v22 }
 0x3bd   :  { %2122 = vst [vmem:[#allocation1 + $0x4] ss:$9 sm:$0xff] %v1569_v27  ;;  %v2405_v27 = vpop.permute.xlu2 %2404 }
 0x3be   :  { %2123 = vst [vmem:[#allocation1 + $0x5] ss:$9 sm:$0xff] %v1570_v48  ;;  %v2592_v48 = vperm.slane %v2399_v6, %v4653_v47  ;;  %v2411_v6 = vpop.permute.xlu0 %2410 }
 0x3bf   :  { %2124 = vst [vmem:[#allocation1 + $0x6] ss:$9 sm:$0xff] %v1571_v35  ;;  %v2586_v35 = vsel %vm2585_vm1, %v2584_v41, %v2582_v38 }
 0x3c0   :  { %2125 = vst [vmem:[#allocation1 + $0x7] ss:$9 sm:$0xff] %v1572_v36  ;;  %v1589_v36 = vperm.slane %v1202_v37, 0  ;;  %v2590_v25 = vsel %vm2589_vm2, %v2588_v43, %v2586_v35 }
 0x3c7   :  { %v2126_v61 = vld [vmem:[#allocation1] sm:$0xff] }
 0x3c8   :  { %2127 = vst [vmem:[#allocation1] ss:$9 sm:$0xff] %v1573_v51  ;;  %2491 = vperm.xlu0 %2769, %v2126_v61   ;;  %v1591_v61 = vperm.slane %v1202_v37, 2 }
 0x3c9   :  { %2128 = vst [vmem:[#allocation1 + $0x1] ss:$9 sm:$0xff] %v1574_v5  ;;  %v2594_v5 = vsel %vm2593_vm3, %v2592_v48, %v2590_v25 }
 0x3ca   :  { %2129 = vst [vmem:[#allocation1 + $0x2] ss:$9 sm:$0xff] %v1575_v50  ;;  %v4667_v50 = vadd.s32 4294967256, %v4647_v59 }
 0x3cb   :  { %2130 = vst [vmem:[#allocation1 + $0x3] ss:$9 sm:$0xff] %v1576_v3  ;;  %v1592_v3 = vperm.slane %v1202_v37, 3 }
 0x3cc   :  { %2131 = vst [vmem:[#allocation1 + $0x4] ss:$9 sm:$0xff] %v1577_v54  ;;  %v4670_v54 = vadd.s32 4294967264, %v4647_v59 }
 0x3cd   :  { %2132 = vst [vmem:[#allocation1 + $0x5] ss:$9 sm:$0xff] %v1578_v17  ;;  %v1593_v17 = vperm.slane %v1202_v37, 4 }
 0x3ce   :  { %2133 = vst [vmem:[#allocation1 + $0x6] ss:$9 sm:$0xff] %v1579_v15  ;;  %v2402_v15 = vpop.permute.xlu1 %2401 }
 0x3cf   :  { %2134 = vst [vmem:[#allocation1 + $0x7] ss:$9 sm:$0xff] %v1580_v34  ;;  %v1594_v34 = vperm.slane %v1202_v37, 5  ;;  %v2596_v49 = vperm.slane %v2402_v15, %v4670_v54 }
 0x3d6   :  { %v2135_v45 = vld [vmem:[#allocation1] sm:$0xff]  ;;  %v2408_v40 = vpop.permute.xlu1 %2407 }
 0x3d7   :  { %2136 = vst [vmem:[#allocation1] ss:$9 sm:$0xff] %v1581_v10  ;;  %2494 = vperm.xlu2 %2771, %v2135_v45   ;;  %v2600_v10 = vperm.slane %v2405_v27, %v4667_v50  ;;  %v2598_v45 = vsel %vm2597_vm4, %v2596_v49, %v2594_v5 }
 0x3d8   :  { %2137 = vst [vmem:[#allocation1 + $0x1] ss:$9 sm:$0xff] %v1582_v63  ;;  %v1596_v63 = vperm.slane %v1202_v37, 7 }
 0x3d9   :  { %2138 = vst [vmem:[#allocation1 + $0x2] ss:$9 sm:$0xff] %v1583_v2  ;;  %v2414_v2 = vpop.permute.xlu2 %2413 }
 0x3da   :  { %2139 = vst [vmem:[#allocation1 + $0x3] ss:$9 sm:$0xff] %v1584_v11  ;;  %v2602_v11 = vsel %vm2601_vm5, %v2600_v10, %v2598_v45 }
 0x3db   :  { %2140 = vst [vmem:[#allocation1 + $0x4] ss:$9 sm:$0xff] %v1585_v29  ;;  %v4677_v29 = vadd.s32 4294967240, %v4647_v59 }
 0x3dc   :  { %2141 = vst [vmem:[#allocation1 + $0x5] ss:$9 sm:$0xff] %v1586_v30  ;;  %v1203_v30 = vsub.f32 0.0, %v4594_v60 }
 0x3dd   :  { %2142 = vst [vmem:[#allocation1 + $0x6] ss:$9 sm:$0xff] %v1587_v23  ;;  %v4681_v23 = vadd.s32 4294967232, %v4647_v59  ;;  %v2608_v7 = vperm.slane %v2411_v6, %v4677_v29 }
 0x3de   :  { %2143 = vst [vmem:[#allocation1 + $0x7] ss:$9 sm:$0xff] %v1588_v57  ;;  %v4684_v57 = vadd.s32 4294967248, %v4647_v59  ;;  %v1597_v38 = vperm.slane %v1203_v30, 0  ;;  %v1598_v27 = vperm.slane %v1203_v30, 1  ;;  %v1599_v35 = vperm.slane %v1203_v30, 2 }
 0x3df   :  { %v2612_v41 = vperm.slane %v2414_v2, %v4681_v23  ;;  %v1600_v25 = vperm.slane %v1203_v30, 3  ;;  %v1601_v5 = vperm.slane %v1203_v30, 4  ;;  %v1602_v15 = vperm.slane %v1203_v30, 5 }
 0x3e0   :  { %v2604_v37 = vperm.slane %v2408_v40, %v4684_v57  ;;  %v1603_v49 = vperm.slane %v1203_v30, 6  ;;  %v1604_v10 = vperm.slane %v1203_v30, 7  ;;  %v1204_v40 = vsub.f32 0.0, %v4586_v53 }
 0x3e1   :  { %v4709_v30 = vadd.s32 4294967192, %v4647_v59 }
 0x3e2   :  { %v2606_v43 = vsel %vm2605_vm6, %v2604_v37, %v2602_v11 }
 0x3e3   :  { %v2610_v48 = vsel %vm2609_vm7, %v2608_v7, %v2606_v43  ;;  %v4712_v7 = vadd.s32 4294967184, %v4647_v59 }
 0x3e5   :  { %v2144_v51 = vld [vmem:[#allocation1] sm:$0xff] }
 0x3e6   :  { %2145 = vst [vmem:[#allocation1] ss:$9 sm:$0xff] %v1589_v36  ;;  %2497 = vperm.xlu1 %2770, %v2144_v51   ;;  %v2614_v36 = vsel %vm2613_vm8, %v2612_v41, %v2610_v48  ;;  %v4693_v51 = vadd.s32 4294967216, %v4647_v59 }
 0x3e7   :  { %2146 = vst [vmem:[#allocation1 + $0x1] ss:$9 sm:$0xff] %v1590_v42  ;;  %v2423_v42 = vpop.permute.xlu2 %2422 }
 0x3e8   :  { %2147 = vst [vmem:[#allocation1 + $0x2] ss:$9 sm:$0xff] %v1591_v61  ;;  %v2420_v61 = vpop.permute.xlu0 %2419 }
 0x3e9   :  { %2148 = vst [vmem:[#allocation1 + $0x3] ss:$9 sm:$0xff] %v1592_v3  ;;  %v4696_v3 = vadd.s32 4294967208, %v4647_v59 }
 0x3ea   :  { %2149 = vst [vmem:[#allocation1 + $0x4] ss:$9 sm:$0xff] %v1593_v17  ;;  %v4699_v17 = vadd.s32 4294967224, %v4647_v59 }
 0x3eb   :  { %2150 = vst [vmem:[#allocation1 + $0x5] ss:$9 sm:$0xff] %v1594_v34  ;;  %v2417_v34 = vpop.permute.xlu1 %2416  ;;  %v2624_v45 = vperm.slane %v2423_v42, %v4696_v3  ;;  %v1607_v42 = vperm.slane %v1204_v40, 2 }
 0x3ec   :  { %2151 = vst [vmem:[#allocation1 + $0x6] ss:$9 sm:$0xff] %v1595_v9  ;;  %v2616_v9 = vperm.slane %v2417_v34, %v4699_v17  ;;  %v1609_v34 = vperm.slane %v1204_v40, 4 }
 0x3ed   :  { %2152 = vst [vmem:[#allocation1 + $0x7] ss:$9 sm:$0xff] %v1596_v63  ;;  %v2620_v63 = vperm.slane %v2420_v61, %v4693_v51  ;;  %v1608_v61 = vperm.slane %v1204_v40, 3 }
 0x3ee   :  { %v2618_v2 = vsel %vm2617_vm9, %v2616_v9, %v2614_v36  ;;  %v4724_v9 = vadd.s32 4294967176, %v4647_v59 }
 0x3ef   :  { %v2622_v11 = vsel %vm2621_vm10, %v2620_v63, %v2618_v2  ;;  %v2432_v41 = vpop.permute.xlu2 %2431 }
 0x3f0   :  { %v2626_v6 = vsel %vm2625_vm11, %v2624_v45, %v2622_v11  ;;  %v2429_v37 = vpop.permute.xlu0 %2428  ;;  %v2636_v36 = vperm.slane %v2432_v41, %v4712_v7  ;;  %v1612_v45 = vperm.slane %v1204_v40, 7 }
 0x3f1   :  { %v2632_v48 = vperm.slane %v2429_v37, %v4709_v30 }
 0x3f3   :  { %v2426_v43 = vpop.permute.xlu1 %2425 }
 0x3f4   :  { %v2153_v60 = vld [vmem:[#allocation1] sm:$0xff] }
 0x3f5   :  { %2154 = vst [vmem:[#allocation1] ss:$9 sm:$0xff] %v1597_v38  ;;  %2500 = vperm.xlu0 %2769, %v2153_v60   ;;  %v4715_v38 = vadd.s32 4294967200, %v4647_v59  ;;  %v1605_v60 = vperm.slane %v1204_v40, 0 }
 0x3f6   :  { %2155 = vst [vmem:[#allocation1 + $0x1] ss:$9 sm:$0xff] %v1598_v27 }
 0x3f7   :  { %2156 = vst [vmem:[#allocation1 + $0x2] ss:$9 sm:$0xff] %v1599_v35  ;;  %v2628_v27 = vperm.slane %v2426_v43, %v4715_v38  ;;  %v1606_v35 = vperm.slane %v1204_v40, 1  ;;  %v2441_v37 = vpop.permute.xlu2 %2440 }
 0x3f8   :  { %2157 = vst [vmem:[#allocation1 + $0x3] ss:$9 sm:$0xff] %v1600_v25  ;;  %v2438_v41 = vpop.permute.xlu0 %2437  ;;  %v2644_v43 = vperm.slane %v2441_v37, %v4656_v28 }
 0x3f9   :  { %2158 = vst [vmem:[#allocation1 + $0x4] ss:$9 sm:$0xff] %v1601_v5  ;;  %v2630_v25 = vsel %vm2629_vm12, %v2628_v27, %v2626_v6  ;;  %v1205_v6 = vsub.f32 0.0, %v4596_v44  ;;  %v2643_v27 = vperm.slane %v2438_v41, %v4647_v59 }
 0x3fa   :  { %2159 = vst [vmem:[#allocation1 + $0x5] ss:$9 sm:$0xff] %v1602_v15  ;;  %v2634_v5 = vsel %vm2633_vm13, %v2632_v48, %v2630_v25 }
 0x3fb   :  { %2160 = vst [vmem:[#allocation1 + $0x6] ss:$9 sm:$0xff] %v1603_v49  ;;  %v2638_v15 = vsel %vm2637_vm14, %v2636_v36, %v2634_v5  ;;  %v1610_v49 = vperm.slane %v1204_v40, 5  ;;  %v2435_v63 = vpop.permute.xlu1 %2434  ;;  %v1616_v36 = vperm.slane %v1205_v6, 3  ;;  %v1617_v25 = vperm.slane %v1205_v6, 4 }
 0x3fc   :  { %2161 = vst [vmem:[#allocation1 + $0x7] ss:$9 sm:$0xff] %v1604_v10  ;;  %v1611_v10 = vperm.slane %v1204_v40, 6  ;;  %v2640_v2 = vperm.slane %v2435_v63, %v4724_v9  ;;  %v1614_v40 = vperm.slane %v1205_v6, 1  ;;  %v1619_v44 = vperm.slane %v1205_v6, 6 }
 0x3fd   :  { %v1620_v5 = vperm.slane %v1205_v6, 7 }
 0x3fe   :  { %v4728_v11 = vsel %vm2641_vm15, %v2640_v2, %v2638_v15 }
 0x403   :  { %v2162_v53 = vld [vmem:[#allocation1] sm:$0xff]  ;;  %v2444_v15 = vpop.permute.xlu1 %2443 }
 0x404   :  { %2163 = vst [vmem:[#allocation1] ss:$9 sm:$0xff] %v1605_v60  ;;  %2503 = vperm.xlu2 %2771, %v2162_v53   ;;  %v1613_v60 = vperm.slane %v1205_v6, 0  ;;  %v1615_v53 = vperm.slane %v1205_v6, 2 }
 0x405   :  { %2164 = vst [vmem:[#allocation1 + $0x1] ss:$9 sm:$0xff] %v1606_v35  ;;  %v2645_v35 = vsel %vm2585_vm1, %v2644_v43, %v2643_v27 }
 0x406   :  { %2165 = vst [vmem:[#allocation1 + $0x2] ss:$9 sm:$0xff] %v1607_v42  ;;  %v1618_v42 = vperm.slane %v1205_v6, 5 }
 0x407   :  { %2166 = vst [vmem:[#allocation1 + $0x3] ss:$9 sm:$0xff] %v1608_v61  ;;  %v1206_v61 = vsub.f32 0.0, %v4600_v0  ;;  %v2450_v0 = vpop.permute.xlu2 %2449 }
 0x408   :  { %2167 = vst [vmem:[#allocation1 + $0x4] ss:$9 sm:$0xff] %v1609_v34 }
 0x409   :  { %2168 = vst [vmem:[#allocation1 + $0x5] ss:$9 sm:$0xff] %v1610_v49  ;;  %v1621_v34 = vperm.slane %v1206_v61, 0  ;;  %v2646_v49 = vperm.slane %v2444_v15, %v4650_v22  ;;  %v1624_v37 = vperm.slane %v1206_v61, 3  ;;  %v1625_v41 = vperm.slane %v1206_v61, 4 }
 0x40a   :  { %2169 = vst [vmem:[#allocation1 + $0x6] ss:$9 sm:$0xff] %v1611_v10  ;;  %v1622_v10 = vperm.slane %v1206_v61, 1  ;;  %v1626_v6 = vperm.slane %v1206_v61, 5  ;;  %v1627_v43 = vperm.slane %v1206_v61, 6  ;;  %v1628_v27 = vperm.slane %v1206_v61, 7 }
 0x40b   :  { %2170 = vst [vmem:[#allocation1 + $0x7] ss:$9 sm:$0xff] %v1612_v45  ;;  %v1623_v45 = vperm.slane %v1206_v61, 2  ;;  %v2647_v2 = vsel %vm2589_vm2, %v2646_v49, %v2645_v35 }
 0x412   :  { %v2171_v48 = vld [vmem:[#allocation1] sm:$0xff] }
 0x413   :  { %2172 = vst [vmem:[#allocation1] ss:$9 sm:$0xff] %v1613_v60  ;;  %2506 = vperm.xlu1 %2770, %v2171_v48   ;;  %v2447_v60 = vpop.permute.xlu0 %2446 }
 0x414   :  { %2173 = vst [vmem:[#allocation1 + $0x1] ss:$9 sm:$0xff] %v1614_v40  ;;  %v2648_v48 = vperm.slane %v2447_v60, %v4653_v47  ;;  %v2650_v40 = vperm.slane %v2450_v0, %v4670_v54 }
 0x415   :  { %2174 = vst [vmem:[#allocation1 + $0x2] ss:$9 sm:$0xff] %v1615_v53  ;;  %v1207_v53 = vsub.f32 0.0, %v4592_v16  ;;  %v2453_v16 = vpop.permute.xlu1 %2452 }
 0x416   :  { %2175 = vst [vmem:[#allocation1 + $0x3] ss:$9 sm:$0xff] %v1616_v36  ;;  %v2649_v35 = vsel %vm2593_vm3, %v2648_v48, %v2647_v2 }
 0x417   :  { %2176 = vst [vmem:[#allocation1 + $0x4] ss:$9 sm:$0xff] %v1617_v25  ;;  %v2651_v36 = vsel %vm2597_vm4, %v2650_v40, %v2649_v35  ;;  %v1629_v25 = vperm.slane %v1207_v53, 0  ;;  %v1632_v61 = vperm.slane %v1207_v53, 3  ;;  %v1633_v15 = vperm.slane %v1207_v53, 4 }
 0x418   :  { %2177 = vst [vmem:[#allocation1 + $0x5] ss:$9 sm:$0xff] %v1618_v42  ;;  %v1630_v42 = vperm.slane %v1207_v53, 1  ;;  %v1635_v49 = vperm.slane %v1207_v53, 6 }
 0x419   :  { %2178 = vst [vmem:[#allocation1 + $0x6] ss:$9 sm:$0xff] %v1619_v44 }
 0x41a   :  { %2179 = vst [vmem:[#allocation1 + $0x7] ss:$9 sm:$0xff] %v1620_v5  ;;  %v1631_v5 = vperm.slane %v1207_v53, 2 }
 0x41b   :  { %v2456_v0 = vpop.permute.xlu0 %2455 }
 0x41c   :  { %v2654_v60 = vperm.slane %v2456_v0, %v4684_v57 }
 0x421   :  { %v2180_v63 = vld [vmem:[#allocation1] sm:$0xff] }
 0x422   :  { %2181 = vst [vmem:[#allocation1] ss:$9 sm:$0xff] %v1621_v34  ;;  %2509 = vperm.xlu0 %2769, %v2180_v63   ;;  %v1634_v34 = vperm.slane %v1207_v53, 5  ;;  %v2652_v63 = vperm.slane %v2453_v16, %v4667_v50 }
 0x423   :  { %2182 = vst [vmem:[#allocation1 + $0x1] ss:$9 sm:$0xff] %v1622_v10  ;;  %v1636_v10 = vperm.slane %v1207_v53, 7 }
 0x424   :  { %2183 = vst [vmem:[#allocation1 + $0x2] ss:$9 sm:$0xff] %v1623_v45  ;;  %v1208_v45 = vsub.f32 0.0, %v4602_v13  ;;  %v2653_v2 = vsel %vm2601_vm5, %v2652_v63, %v2651_v36 }
 0x425   :  { %2184 = vst [vmem:[#allocation1 + $0x3] ss:$9 sm:$0xff] %v1624_v37  ;;  %v2655_v13 = vsel %vm2605_vm6, %v2654_v60, %v2653_v2 }
 0x426   :  { %2185 = vst [vmem:[#allocation1 + $0x4] ss:$9 sm:$0xff] %v1625_v41  ;;  %v1637_v37 = vperm.slane %v1208_v45, 0  ;;  %v2459_v41 = vpop.permute.xlu2 %2458  ;;  %v1640_v48 = vperm.slane %v1208_v45, 3  ;;  %v1641_v35 = vperm.slane %v1208_v45, 4  ;;  %v1642_v53 = vperm.slane %v1208_v45, 5 }
 0x427   :  { %2186 = vst [vmem:[#allocation1 + $0x5] ss:$9 sm:$0xff] %v1626_v6  ;;  %v2656_v40 = vperm.slane %v2459_v41, %v4677_v29 }
 0x428   :  { %2187 = vst [vmem:[#allocation1 + $0x6] ss:$9 sm:$0xff] %v1627_v43  ;;  %v1638_v43 = vperm.slane %v1208_v45, 1 }
 0x429   :  { %2188 = vst [vmem:[#allocation1 + $0x7] ss:$9 sm:$0xff] %v1628_v27  ;;  %v1639_v27 = vperm.slane %v1208_v45, 2  ;;  %v2657_v36 = vsel %vm2609_vm7, %v2656_v40, %v2655_v13 }
 0x42e   :  { %v2468_v41 = vpop.permute.xlu2 %2467 }
 0x430   :  { %v2189_v44 = vld [vmem:[#allocation1] sm:$0xff] }
 0x431   :  { %2190 = vst [vmem:[#allocation1] ss:$9 sm:$0xff] %v1629_v25  ;;  %2512 = vperm.xlu2 %2771, %v2189_v44   ;;  %v1643_v25 = vperm.slane %v1208_v45, 6  ;;  %v1209_v44 = vsub.f32 0.0, %v4606_v52 }
 0x432   :  { %2191 = vst [vmem:[#allocation1 + $0x1] ss:$9 sm:$0xff] %v1630_v42  ;;  %v1644_v42 = vperm.slane %v1208_v45, 7 }
 0x433   :  { %2192 = vst [vmem:[#allocation1 + $0x2] ss:$9 sm:$0xff] %v1631_v5  ;;  %v1645_v5 = vperm.slane %v1209_v44, 0  ;;  %v1649_v63 = vperm.slane %v1209_v44, 4  ;;  %v1650_v2 = vperm.slane %v1209_v44, 5  ;;  %v1652_v52 = vperm.slane %v1209_v44, 7 }
 0x434   :  { %2193 = vst [vmem:[#allocation1 + $0x3] ss:$9 sm:$0xff] %v1632_v61  ;;  %v1646_v61 = vperm.slane %v1209_v44, 1 }
 0x435   :  { %2194 = vst [vmem:[#allocation1 + $0x4] ss:$9 sm:$0xff] %v1633_v15 }
 0x436   :  { %2195 = vst [vmem:[#allocation1 + $0x5] ss:$9 sm:$0xff] %v1634_v34  ;;  %v1647_v34 = vperm.slane %v1209_v44, 2 }
 0x437   :  { %2196 = vst [vmem:[#allocation1 + $0x6] ss:$9 sm:$0xff] %v1635_v49  ;;  %v2462_v49 = vpop.permute.xlu1 %2461 }
 0x438   :  { %2197 = vst [vmem:[#allocation1 + $0x7] ss:$9 sm:$0xff] %v1636_v10  ;;  %v1648_v10 = vperm.slane %v1209_v44, 3  ;;  %v2658_v16 = vperm.slane %v2462_v49, %v4681_v23 }
 0x43a   :  { %v2659_v45 = vsel %vm2613_vm8, %v2658_v16, %v2657_v36 }
 0x43f   :  { %v2198_v6 = vld [vmem:[#allocation1] sm:$0xff] }
 0x440   :  { %2199 = vst [vmem:[#allocation1] ss:$9 sm:$0xff] %v1637_v37  ;;  %2515 = vperm.xlu1 %2770, %v2198_v6   ;;  %v1651_v37 = vperm.slane %v1209_v44, 6  ;;  %v2465_v6 = vpop.permute.xlu0 %2464 }
 0x441   :  { %2200 = vst [vmem:[#allocation1 + $0x1] ss:$9 sm:$0xff] %v1638_v43  ;;  %v1210_v43 = vsub.f32 0.0, %v4598_v1  ;;  %v2660_v0 = vperm.slane %v2465_v6, %v4699_v17 }
 0x442   :  { %2201 = vst [vmem:[#allocation1 + $0x2] ss:$9 sm:$0xff] %v1639_v27  ;;  %v2662_v27 = vperm.slane %v2468_v41, %v4693_v51 }
 0x443   :  { %2202 = vst [vmem:[#allocation1 + $0x3] ss:$9 sm:$0xff] %v1640_v48  ;;  %v2661_v60 = vsel %vm2617_vm9, %v2660_v0, %v2659_v45  ;;  %v1653_v40 = vperm.slane %v1210_v43, 0  ;;  %v1656_v36 = vperm.slane %v1210_v43, 3  ;;  %v1659_v1 = vperm.slane %v1210_v43, 6  ;;  %v2477_v45 = vpop.permute.xlu2 %2476 }
 0x444   :  { %2203 = vst [vmem:[#allocation1 + $0x4] ss:$9 sm:$0xff] %v1641_v35  ;;  %v2663_v48 = vsel %vm2621_vm10, %v2662_v27, %v2661_v60  ;;  %v1654_v35 = vperm.slane %v1210_v43, 1  ;;  %v1660_v44 = vperm.slane %v1210_v43, 7 }
 0x445   :  { %2204 = vst [vmem:[#allocation1 + $0x5] ss:$9 sm:$0xff] %v1642_v53  ;;  %v1655_v53 = vperm.slane %v1210_v43, 2 }
 0x446   :  { %2205 = vst [vmem:[#allocation1 + $0x6] ss:$9 sm:$0xff] %v1643_v25  ;;  %v1657_v25 = vperm.slane %v1210_v43, 4 }
 0x447   :  { %2206 = vst [vmem:[#allocation1 + $0x7] ss:$9 sm:$0xff] %v1644_v42  ;;  %v1658_v42 = vperm.slane %v1210_v43, 5  ;;  %v2668_v43 = vperm.slane %v2477_v45, %v4709_v30 }
 0x44e   :  { %v2207_v15 = vld [vmem:[#allocation1] sm:$0xff] }
 0x44f   :  { %2208 = vst [vmem:[#allocation1] ss:$9 sm:$0xff] %v1645_v5  ;;  %2518 = vperm.xlu0 %2769, %v2207_v15   ;;  %v1211_v5 = vsub.f32 0.0, %v4609_v18 }
 0x450   :  { %2209 = vst [vmem:[#allocation1 + $0x1] ss:$9 sm:$0xff] %v1646_v61  ;;  %v2471_v61 = vpop.permute.xlu1 %2470 }
 0x451   :  { %2210 = vst [vmem:[#allocation1 + $0x2] ss:$9 sm:$0xff] %v1647_v34  ;;  %v2664_v15 = vperm.slane %v2471_v61, %v4696_v3  ;;  %v1661_v49 = vperm.slane %v1211_v5, 0  ;;  %v1662_v16 = vperm.slane %v1211_v5, 1  ;;  %v1666_v41 = vperm.slane %v1211_v5, 5 }
 0x452   :  { %2211 = vst [vmem:[#allocation1 + $0x3] ss:$9 sm:$0xff] %v1648_v10  ;;  %v1667_v6 = vperm.slane %v1211_v5, 6  ;;  %v1668_v0 = vperm.slane %v1211_v5, 7 }
 0x453   :  { %2212 = vst [vmem:[#allocation1 + $0x4] ss:$9 sm:$0xff] %v1649_v63  ;;  %v2665_v34 = vsel %vm2625_vm11, %v2664_v15, %v2663_v48  ;;  %v1663_v63 = vperm.slane %v1211_v5, 2  ;;  %v1212_v48 = vsub.f32 0.0, %v4613_v26  ;;  %v1213_v15 = vsub.f32 0.0, %v4604_v31 }
 0x454   :  { %2213 = vst [vmem:[#allocation1 + $0x5] ss:$9 sm:$0xff] %v1650_v2  ;;  %v1664_v2 = vperm.slane %v1211_v5, 3 }
 0x455   :  { %2214 = vst [vmem:[#allocation1 + $0x6] ss:$9 sm:$0xff] %v1651_v37  ;;  %v1665_v37 = vperm.slane %v1211_v5, 4  ;;  %v1676_v61 = vperm.slane %v1212_v48, 7  ;;  %v1679_v45 = vperm.slane %v1213_v15, 2  ;;  %v1684_v31 = vperm.slane %v1213_v15, 7 }
 0x456   :  { %2215 = vst [vmem:[#allocation1 + $0x7] ss:$9 sm:$0xff] %v1652_v52  ;;  %v2474_v52 = vpop.permute.xlu0 %2473 }
 0x457   :  { %v2666_v18 = vperm.slane %v2474_v52, %v4715_v38  ;;  %v1681_v52 = vperm.slane %v1213_v15, 4 }
 0x459   :  { %v2667_v27 = vsel %vm2629_vm12, %v2666_v18, %v2665_v34  ;;  %v1683_v18 = vperm.slane %v1213_v15, 6 }
 0x45a   :  { %v2669_v60 = vsel %vm2633_vm13, %v2668_v43, %v2667_v27  ;;  %v2486_v43 = vpop.permute.xlu2 %2485 }
 0x45d   :  { %v2216_v13 = vld [vmem:[#allocation1] sm:$0xff] }
 0x45e   :  { %2217 = vst [vmem:[#allocation1] ss:$9 sm:$0xff] %v1653_v40  ;;  %2521 = vperm.xlu2 %2771, %v2216_v13   ;;  %v1669_v40 = vperm.slane %v1212_v48, 0  ;;  %v2483_v34 = vpop.permute.xlu0 %2482 }
 0x45f   :  { %2218 = vst [vmem:[#allocation1 + $0x1] ss:$9 sm:$0xff] %v1654_v35  ;;  %v1670_v35 = vperm.slane %v1212_v48, 1 }
 0x460   :  { %2219 = vst [vmem:[#allocation1 + $0x2] ss:$9 sm:$0xff] %v1655_v53  ;;  %v1671_v53 = vperm.slane %v1212_v48, 2 }
 0x461   :  { %2220 = vst [vmem:[#allocation1 + $0x3] ss:$9 sm:$0xff] %v1656_v36  ;;  %v1672_v36 = vperm.slane %v1212_v48, 3 }
 0x462   :  { %2221 = vst [vmem:[#allocation1 + $0x4] ss:$9 sm:$0xff] %v1657_v25  ;;  %v1673_v25 = vperm.slane %v1212_v48, 4 }
 0x463   :  { %2222 = vst [vmem:[#allocation1 + $0x5] ss:$9 sm:$0xff] %v1658_v42  ;;  %v1674_v42 = vperm.slane %v1212_v48, 5 }
 0x464   :  { %2223 = vst [vmem:[#allocation1 + $0x6] ss:$9 sm:$0xff] %v1659_v1  ;;  %v2480_v1 = vpop.permute.xlu1 %2479 }
 0x465   :  { %2224 = vst [vmem:[#allocation1 + $0x7] ss:$9 sm:$0xff] %v1660_v44  ;;  %v1675_v44 = vperm.slane %v1212_v48, 6  ;;  %v2670_v5 = vperm.slane %v2480_v1, %v4712_v7 }
 0x467   :  { %v2671_v26 = vsel %vm2637_vm14, %v2670_v5, %v2669_v60  ;;  %v2674_v60 = vperm.slane %v2486_v43, %v4647_v59 }
 0x46c   :  { %v2225_v10 = vld [vmem:[#allocation1] sm:$0xff] }
 0x46d   :  { %2226 = vst [vmem:[#allocation1] ss:$9 sm:$0xff] %v1661_v49  ;;  %2524 = vperm.xlu1 %2770, %v2225_v10   ;;  %v2672_v49 = vperm.slane %v2483_v34, %v4724_v9  ;;  %v1677_v10 = vperm.slane %v1213_v15, 0 }
 0x46e   :  { %2227 = vst [vmem:[#allocation1 + $0x1] ss:$9 sm:$0xff] %v1662_v16  ;;  %v1678_v16 = vperm.slane %v1213_v15, 1 }
 0x46f   :  { %2228 = vst [vmem:[#allocation1 + $0x2] ss:$9 sm:$0xff] %v1663_v63 }
 0x470   :  { %2229 = vst [vmem:[#allocation1 + $0x3] ss:$9 sm:$0xff] %v1664_v2  ;;  %v4770_v2 = vsel %vm2641_vm15, %v2672_v49, %v2671_v26 }
 0x471   :  { %2230 = vst [vmem:[#allocation1 + $0x4] ss:$9 sm:$0xff] %v1665_v37  ;;  %v1680_v37 = vperm.slane %v1213_v15, 3 }
 0x472   :  { %2231 = vst [vmem:[#allocation1 + $0x5] ss:$9 sm:$0xff] %v1666_v41  ;;  %v1682_v41 = vperm.slane %v1213_v15, 5 }
 0x473   :  { %2232 = vst [vmem:[#allocation1 + $0x6] ss:$9 sm:$0xff] %v1667_v6  ;;  %v1214_v6 = vsub.f32 0.0, %v4615_v4 }
 0x474   :  { %2233 = vst [vmem:[#allocation1 + $0x7] ss:$9 sm:$0xff] %v1668_v0  ;;  %v2489_v0 = vpop.permute.xlu1 %2488 }
 0x475   :  { %v1685_v27 = vperm.slane %v1214_v6, 0  ;;  %v2675_v48 = vperm.slane %v2489_v0, %v4656_v28  ;;  %v1690_v4 = vperm.slane %v1214_v6, 5  ;;  %v1692_v1 = vperm.slane %v1214_v6, 7 }
 0x47b   :  { %v2234_v13 = vld [vmem:[#allocation1] sm:$0xff] }
 0x47c   :  { %2235 = vst [vmem:[#allocation1] ss:$9 sm:$0xff] %v1669_v40  ;;  %2527 = vperm.xlu0 %2769, %v2234_v13   ;;  %v1687_v13 = vperm.slane %v1214_v6, 2 }
 0x47d   :  { %2236 = vst [vmem:[#allocation1 + $0x1] ss:$9 sm:$0xff] %v1670_v35  ;;  %v1686_v35 = vperm.slane %v1214_v6, 1 }
 0x47e   :  { %2237 = vst [vmem:[#allocation1 + $0x2] ss:$9 sm:$0xff] %v1671_v53  ;;  %v4776_v53 = vsel %vm2585_vm1, %v2675_v48, %v2674_v60 }
 0x47f   :  { %2238 = vst [vmem:[#allocation1 + $0x3] ss:$9 sm:$0xff] %v1672_v36  ;;  %v1688_v36 = vperm.slane %v1214_v6, 3 }
 0x480   :  { %2239 = vst [vmem:[#allocation1 + $0x4] ss:$9 sm:$0xff] %v1673_v25  ;;  %v1689_v25 = vperm.slane %v1214_v6, 4 }
 0x481   :  { %2240 = vst [vmem:[#allocation1 + $0x5] ss:$9 sm:$0xff] %v1674_v42  ;;  %v1691_v42 = vperm.slane %v1214_v6, 6 }
 0x482   :  { %2241 = vst [vmem:[#allocation1 + $0x6] ss:$9 sm:$0xff] %v1675_v44  ;;  %v1215_v44 = vsub.f32 0.0, %v4619_v20  ;;  %v1216_v20 = vsub.f32 0.0, %v4611_v14  ;;  %v1217_v14 = vsub.f32 0.0, %v4622_v32  ;;  %v2736_v32 = vrot.slane %v4770_v2, 7 }
 0x483   :  { %2242 = vst [vmem:[#allocation1 + $0x7] ss:$9 sm:$0xff] %v1676_v61 }
 0x484   :  { %v1693_v5 = vperm.slane %v1215_v44, 0  ;;  %v1694_v61 = vperm.slane %v1215_v44, 1  ;;  %v1695_v15 = vperm.slane %v1215_v44, 2  ;;  %v1696_v34 = vperm.slane %v1215_v44, 3 }
 0x485   :  { %v1697_v49 = vperm.slane %v1215_v44, 4  ;;  %v1706_v6 = vperm.slane %v1216_v20, 5  ;;  %v1707_v43 = vperm.slane %v1216_v20, 6  ;;  %v1708_v0 = vperm.slane %v1216_v20, 7 }
 0x486   :  { %v1710_v48 = vperm.slane %v1217_v14, 1 }
 0x48a   :  { %v2243_v63 = vld [vmem:[#allocation1] sm:$0xff] }
 0x48b   :  { %2244 = vst [vmem:[#allocation1] ss:$9 sm:$0xff] %v1677_v10  ;;  %2530 = vperm.xlu2 %2771, %v2243_v63   ;;  %v1698_v10 = vperm.slane %v1215_v44, 5  ;;  %v1700_v63 = vperm.slane %v1215_v44, 7 }
 0x48c   :  { %2245 = vst [vmem:[#allocation1 + $0x1] ss:$9 sm:$0xff] %v1678_v16  ;;  %v1699_v16 = vperm.slane %v1215_v44, 6 }
 0x48d   :  { %2246 = vst [vmem:[#allocation1 + $0x2] ss:$9 sm:$0xff] %v1679_v45  ;;  %v1701_v45 = vperm.slane %v1216_v20, 0 }
 0x48e   :  { %2247 = vst [vmem:[#allocation1 + $0x3] ss:$9 sm:$0xff] %v1680_v37  ;;  %v1702_v37 = vperm.slane %v1216_v20, 1 }
 0x48f   :  { %2248 = vst [vmem:[#allocation1 + $0x4] ss:$9 sm:$0xff] %v1681_v52 }
 0x490   :  { %2249 = vst [vmem:[#allocation1 + $0x5] ss:$9 sm:$0xff] %v1682_v41  ;;  %v1703_v41 = vperm.slane %v1216_v20, 2 }
 0x491   :  { %2250 = vst [vmem:[#allocation1 + $0x6] ss:$9 sm:$0xff] %v1683_v18  ;;  %v1704_v18 = vperm.slane %v1216_v20, 3 }
 0x492   :  { %2251 = vst [vmem:[#allocation1 + $0x7] ss:$9 sm:$0xff] %v1684_v31  ;;  %v1705_v31 = vperm.slane %v1216_v20, 4 }
 0x499   :  { %v2252_v40 = vld [vmem:[#allocation1] sm:$0xff] }
 0x49a   :  { %2253 = vst [vmem:[#allocation1] ss:$9 sm:$0xff] %v1685_v27  ;;  %2533 = vperm.xlu1 %2770, %v2252_v40   ;;  %v1709_v27 = vperm.slane %v1217_v14, 0  ;;  %v1711_v40 = vperm.slane %v1217_v14, 2 }
 0x49b   :  { %2254 = vst [vmem:[#allocation1 + $0x1] ss:$9 sm:$0xff] %v1686_v35  ;;  %v1712_v35 = vperm.slane %v1217_v14, 3 }
 0x49c   :  { %2255 = vst [vmem:[#allocation1 + $0x2] ss:$9 sm:$0xff] %v1687_v13  ;;  %v1713_v13 = vperm.slane %v1217_v14, 4 }
 0x49d   :  { %2256 = vst [vmem:[#allocation1 + $0x3] ss:$9 sm:$0xff] %v1688_v36  ;;  %v1714_v36 = vperm.slane %v1217_v14, 5 }
 0x49e   :  { %2257 = vst [vmem:[#allocation1 + $0x4] ss:$9 sm:$0xff] %v1689_v25  ;;  %v1715_v25 = vperm.slane %v1217_v14, 6 }
 0x49f   :  { %2258 = vst [vmem:[#allocation1 + $0x5] ss:$9 sm:$0xff] %v1690_v4  ;;  %v1716_v4 = vperm.slane %v1217_v14, 7 }
 0x4a0   :  { %2259 = vst [vmem:[#allocation1 + $0x6] ss:$9 sm:$0xff] %v1691_v42  ;;  %v1218_v42 = vsub.f32 0.0, %v4626_v33  ;;  %v1219_v33 = vsub.f32 0.0, %v4617_v56  ;;  %v1220_v56 = vsub.f32 0.0, %v4631_v46  ;;  %v1221_v46 = vsub.f32 0.0, %v4633_v55 }
 0x4a1   :  { %2260 = vst [vmem:[#allocation1 + $0x7] ss:$9 sm:$0xff] %v1692_v1  ;;  %v4784_v1 = vsel %vm2739_vm0, %v4728_v11, %v2736_v32  ;;  %v1222_v55 = vsub.f32 0.0, %v4624_v62  ;;  %v1223_v62 = vsub.f32 0.0, %v4637_v21  ;;  %v1224_v21 = vsub.f32 0.0, %v4639_v8 }
 0x4a2   :  { %v1717_v44 = vperm.slane %v1218_v42, 0  ;;  %v1724_v2 = vperm.slane %v1218_v42, 7  ;;  %v1725_v11 = vperm.slane %v1219_v33, 0  ;;  %v1727_v20 = vperm.slane %v1219_v33, 2 }
 0x4a3   :  { %v1736_v14 = vperm.slane %v1220_v56, 3  ;;  %v1745_v32 = vperm.slane %v1221_v46, 4  ;;  %v1225_v8 = vsub.f32 0.0, %v4628_v58  ;;  %v1226_v58 = vsub.f32 0.0, %v4642_v24 }
 0x4a4   :  { %v1227_v24 = vsub.f32 0.0, %v4644_v12  ;;  %v1228_v12 = vsub.f32 0.0, %v4635_v39  ;;  %v2492_v39 = vpop.permute.xlu0 %2491 }
 0x4a8   :  { %v2261_v26 = vld [vmem:[#allocation1] sm:$0xff] }
 0x4a9   :  { %2262 = vst [vmem:[#allocation1] ss:$9 sm:$0xff] %v1693_v5  ;;  %2536 = vperm.xlu0 %2769, %v2261_v26   ;;  %v1718_v5 = vperm.slane %v1218_v42, 1  ;;  %v1719_v26 = vperm.slane %v1218_v42, 2 }
 0x4aa   :  { %2263 = vst [vmem:[#allocation1 + $0x1] ss:$9 sm:$0xff] %v1694_v61 }
 0x4ab   :  { %2264 = vst [vmem:[#allocation1 + $0x2] ss:$9 sm:$0xff] %v1695_v15  ;;  %v1720_v15 = vperm.slane %v1218_v42, 3 }
 0x4ac   :  { %2265 = vst [vmem:[#allocation1 + $0x3] ss:$9 sm:$0xff] %v1696_v34  ;;  %v1721_v34 = vperm.slane %v1218_v42, 4 }
 0x4ad   :  { %2266 = vst [vmem:[#allocation1 + $0x4] ss:$9 sm:$0xff] %v1697_v49  ;;  %v1722_v49 = vperm.slane %v1218_v42, 5 }
 0x4ae   :  { %2267 = vst [vmem:[#allocation1 + $0x5] ss:$9 sm:$0xff] %v1698_v10  ;;  %v1723_v10 = vperm.slane %v1218_v42, 6  ;;  %v1746_v42 = vperm.slane %v1221_v46, 5 }
 0x4af   :  { %2268 = vst [vmem:[#allocation1 + $0x6] ss:$9 sm:$0xff] %v1699_v16  ;;  %v1726_v16 = vperm.slane %v1219_v33, 1 }
 0x4b0   :  { %2269 = vst [vmem:[#allocation1 + $0x7] ss:$9 sm:$0xff] %v1700_v63 }
 0x4b7   :  { %v2270_v52 = vld [vmem:[#allocation1] sm:$0xff] }
 0x4b8   :  { %2271 = vst [vmem:[#allocation1] ss:$9 sm:$0xff] %v1701_v45  ;;  %2539 = vperm.xlu2 %2771, %v2270_v52   ;;  %v1728_v45 = vperm.slane %v1219_v33, 3  ;;  %v1730_v52 = vperm.slane %v1219_v33, 5 }
 0x4b9   :  { %2272 = vst [vmem:[#allocation1 + $0x1] ss:$9 sm:$0xff] %v1702_v37  ;;  %v1729_v37 = vperm.slane %v1219_v33, 4 }
 0x4ba   :  { %2273 = vst [vmem:[#allocation1 + $0x2] ss:$9 sm:$0xff] %v1703_v41  ;;  %v1731_v41 = vperm.slane %v1219_v33, 6 }
 0x4bb   :  { %2274 = vst [vmem:[#allocation1 + $0x3] ss:$9 sm:$0xff] %v1704_v18  ;;  %v1732_v18 = vperm.slane %v1219_v33, 7  ;;  %v1755_v33 = vperm.slane %v1222_v55, 6 }
 0x4bc   :  { %2275 = vst [vmem:[#allocation1 + $0x4] ss:$9 sm:$0xff] %v1705_v31  ;;  %v1733_v31 = vperm.slane %v1220_v56, 0 }
 0x4bd   :  { %2276 = vst [vmem:[#allocation1 + $0x5] ss:$9 sm:$0xff] %v1706_v6  ;;  %v1734_v6 = vperm.slane %v1220_v56, 1 }
 0x4be   :  { %2277 = vst [vmem:[#allocation1 + $0x6] ss:$9 sm:$0xff] %v1707_v43 }
 0x4bf   :  { %2278 = vst [vmem:[#allocation1 + $0x7] ss:$9 sm:$0xff] %v1708_v0  ;;  %v1735_v0 = vperm.slane %v1220_v56, 2 }
 0x4c6   :  { %v2279_v60 = vld [vmem:[#allocation1] sm:$0xff] }
 0x4c7   :  { %2280 = vst [vmem:[#allocation1] ss:$9 sm:$0xff] %v1709_v27  ;;  %2542 = vperm.xlu1 %2770, %v2279_v60   ;;  %v1737_v27 = vperm.slane %v1220_v56, 4  ;;  %v1738_v60 = vperm.slane %v1220_v56, 5 }
 0x4c8   :  { %2281 = vst [vmem:[#allocation1 + $0x1] ss:$9 sm:$0xff] %v1710_v48  ;;  %v1739_v48 = vperm.slane %v1220_v56, 6 }
 0x4c9   :  { %2282 = vst [vmem:[#allocation1 + $0x2] ss:$9 sm:$0xff] %v1711_v40  ;;  %v1740_v40 = vperm.slane %v1220_v56, 7  ;;  %v1764_v56 = vperm.slane %v1223_v62, 7 }
 0x4ca   :  { %2283 = vst [vmem:[#allocation1 + $0x3] ss:$9 sm:$0xff] %v1712_v35  ;;  %v1741_v35 = vperm.slane %v1221_v46, 0 }
 0x4cb   :  { %2284 = vst [vmem:[#allocation1 + $0x4] ss:$9 sm:$0xff] %v1713_v13  ;;  %v1742_v13 = vperm.slane %v1221_v46, 1 }
 0x4cc   :  { %2285 = vst [vmem:[#allocation1 + $0x5] ss:$9 sm:$0xff] %v1714_v36 }
 0x4cd   :  { %2286 = vst [vmem:[#allocation1 + $0x6] ss:$9 sm:$0xff] %v1715_v25  ;;  %v1743_v25 = vperm.slane %v1221_v46, 2 }
 0x4ce   :  { %2287 = vst [vmem:[#allocation1 + $0x7] ss:$9 sm:$0xff] %v1716_v4  ;;  %v1744_v4 = vperm.slane %v1221_v46, 3 }
 0x4d5   :  { %v2288_v61 = vld [vmem:[#allocation1] sm:$0xff] }
 0x4d6   :  { %2289 = vst [vmem:[#allocation1] ss:$9 sm:$0xff] %v1717_v44  ;;  %2545 = vperm.xlu0 %2769, %v2288_v61   ;;  %v1747_v44 = vperm.slane %v1221_v46, 6  ;;  %v1749_v61 = vperm.slane %v1222_v55, 0 }
 0x4d7   :  { %2290 = vst [vmem:[#allocation1 + $0x1] ss:$9 sm:$0xff] %v1718_v5  ;;  %v1748_v5 = vperm.slane %v1221_v46, 7  ;;  %v1773_v46 = vperm.slane %v1225_v8, 0 }
 0x4d8   :  { %2291 = vst [vmem:[#allocation1 + $0x2] ss:$9 sm:$0xff] %v1719_v26  ;;  %v1750_v26 = vperm.slane %v1222_v55, 1 }
 0x4d9   :  { %2292 = vst [vmem:[#allocation1 + $0x3] ss:$9 sm:$0xff] %v1720_v15 }
 0x4da   :  { %2293 = vst [vmem:[#allocation1 + $0x4] ss:$9 sm:$0xff] %v1721_v34  ;;  %v1751_v34 = vperm.slane %v1222_v55, 2 }
 0x4db   :  { %2294 = vst [vmem:[#allocation1 + $0x5] ss:$9 sm:$0xff] %v1722_v49  ;;  %v1752_v49 = vperm.slane %v1222_v55, 3 }
 0x4dc   :  { %2295 = vst [vmem:[#allocation1 + $0x6] ss:$9 sm:$0xff] %v1723_v10  ;;  %v1753_v10 = vperm.slane %v1222_v55, 4 }
 0x4dd   :  { %2296 = vst [vmem:[#allocation1 + $0x7] ss:$9 sm:$0xff] %v1724_v2  ;;  %v1754_v2 = vperm.slane %v1222_v55, 5 }
 0x4e4   :  { %v2297_v63 = vld [vmem:[#allocation1] sm:$0xff] }
 0x4e5   :  { %2548 = vperm.xlu2 %2771, %v2297_v63   ;;  %2298 = vst [vmem:[#allocation1] ss:$9 sm:$0xff] %v1725_v11  ;;  %v1756_v11 = vperm.slane %v1222_v55, 7  ;;  %v1758_v63 = vperm.slane %v1223_v62, 1  ;;  %v1782_v55 = vperm.slane %v1226_v58, 1 }
 0x4e6   :  { %2299 = vst [vmem:[#allocation1 + $0x1] ss:$9 sm:$0xff] %v1726_v16  ;;  %v1757_v16 = vperm.slane %v1223_v62, 0 }
 0x4e7   :  { %2300 = vst [vmem:[#allocation1 + $0x2] ss:$9 sm:$0xff] %v1727_v20 }
 0x4e8   :  { %2301 = vst [vmem:[#allocation1 + $0x3] ss:$9 sm:$0xff] %v1728_v45  ;;  %v1759_v45 = vperm.slane %v1223_v62, 2 }
 0x4e9   :  { %2302 = vst [vmem:[#allocation1 + $0x4] ss:$9 sm:$0xff] %v1729_v37  ;;  %v1760_v37 = vperm.slane %v1223_v62, 3 }
 0x4ea   :  { %2303 = vst [vmem:[#allocation1 + $0x5] ss:$9 sm:$0xff] %v1730_v52  ;;  %v1761_v52 = vperm.slane %v1223_v62, 4 }
 0x4eb   :  { %2304 = vst [vmem:[#allocation1 + $0x6] ss:$9 sm:$0xff] %v1731_v41  ;;  %v1762_v41 = vperm.slane %v1223_v62, 5 }
 0x4ec   :  { %2305 = vst [vmem:[#allocation1 + $0x7] ss:$9 sm:$0xff] %v1732_v18  ;;  %v1763_v18 = vperm.slane %v1223_v62, 6 }
 0x4f3   :  { %v2306_v43 = vld [vmem:[#allocation1] sm:$0xff] }
 0x4f4   :  { %2551 = vperm.xlu1 %2770, %v2306_v43   ;;  %2307 = vst [vmem:[#allocation1] ss:$9 sm:$0xff] %v1733_v31  ;;  %v1765_v31 = vperm.slane %v1224_v21, 0 }
 0x4f5   :  { %2308 = vst [vmem:[#allocation1 + $0x1] ss:$9 sm:$0xff] %v1734_v6  ;;  %v1766_v6 = vperm.slane %v1224_v21, 1 }
 0x4f6   :  { %2309 = vst [vmem:[#allocation1 + $0x2] ss:$9 sm:$0xff] %v1735_v0  ;;  %v1767_v0 = vperm.slane %v1224_v21, 2 }
 0x4f7   :  { %2310 = vst [vmem:[#allocation1 + $0x3] ss:$9 sm:$0xff] %v1736_v14  ;;  %v1768_v14 = vperm.slane %v1224_v21, 3 }
 0x4f8   :  { %2311 = vst [vmem:[#allocation1 + $0x4] ss:$9 sm:$0xff] %v1737_v27  ;;  %v1769_v27 = vperm.slane %v1224_v21, 4 }
 0x4f9   :  { %2312 = vst [vmem:[#allocation1 + $0x5] ss:$9 sm:$0xff] %v1738_v60  ;;  %v1770_v60 = vperm.slane %v1224_v21, 5 }
 0x4fa   :  { %2313 = vst [vmem:[#allocation1 + $0x6] ss:$9 sm:$0xff] %v1739_v48  ;;  %v1771_v48 = vperm.slane %v1224_v21, 6 }
 0x4fb   :  { %2314 = vst [vmem:[#allocation1 + $0x7] ss:$9 sm:$0xff] %v1740_v40  ;;  %v1772_v40 = vperm.slane %v1224_v21, 7  ;;  %v1799_v21 = vperm.slane %v1228_v12, 2 }
 0x502   :  { %v2315_v36 = vld [vmem:[#allocation1] sm:$0xff] }
 0x503   :  { %2554 = vperm.xlu0 %2769, %v2315_v36   ;;  %2316 = vst [vmem:[#allocation1] ss:$9 sm:$0xff] %v1741_v35  ;;  %v1774_v35 = vperm.slane %v1225_v8, 1  ;;  %v1775_v36 = vperm.slane %v1225_v8, 2 }
 0x504   :  { %2317 = vst [vmem:[#allocation1 + $0x1] ss:$9 sm:$0xff] %v1742_v13 }
 0x505   :  { %2318 = vst [vmem:[#allocation1 + $0x2] ss:$9 sm:$0xff] %v1743_v25  ;;  %v1776_v25 = vperm.slane %v1225_v8, 3 }
 0x506   :  { %2319 = vst [vmem:[#allocation1 + $0x3] ss:$9 sm:$0xff] %v1744_v4  ;;  %v1777_v4 = vperm.slane %v1225_v8, 4 }
 0x507   :  { %2320 = vst [vmem:[#allocation1 + $0x4] ss:$9 sm:$0xff] %v1745_v32  ;;  %v1778_v32 = vperm.slane %v1225_v8, 5 }
 0x508   :  { %2321 = vst [vmem:[#allocation1 + $0x5] ss:$9 sm:$0xff] %v1746_v42  ;;  %v1779_v42 = vperm.slane %v1225_v8, 6 }
 0x509   :  { %2322 = vst [vmem:[#allocation1 + $0x6] ss:$9 sm:$0xff] %v1747_v44  ;;  %v1780_v44 = vperm.slane %v1225_v8, 7 }
 0x50a   :  { %2323 = vst [vmem:[#allocation1 + $0x7] ss:$9 sm:$0xff] %v1748_v5  ;;  %v1781_v5 = vperm.slane %v1226_v58, 0 }
 0x511   :  { %v2324_v15 = vld [vmem:[#allocation1] sm:$0xff] }
 0x512   :  { %2557 = vperm.xlu2 %2771, %v2324_v15   ;;  %2325 = vst [vmem:[#allocation1] ss:$9 sm:$0xff] %v1749_v61  ;;  %v1784_v15 = vperm.slane %v1226_v58, 3 }
 0x513   :  { %2326 = vst [vmem:[#allocation1 + $0x1] ss:$9 sm:$0xff] %v1750_v26  ;;  %v1783_v26 = vperm.slane %v1226_v58, 2 }
 0x514   :  { %2327 = vst [vmem:[#allocation1 + $0x2] ss:$9 sm:$0xff] %v1751_v34  ;;  %v1785_v34 = vperm.slane %v1226_v58, 4 }
 0x515   :  { %2328 = vst [vmem:[#allocation1 + $0x3] ss:$9 sm:$0xff] %v1752_v49  ;;  %v1786_v49 = vperm.slane %v1226_v58, 5 }
 0x516   :  { %2329 = vst [vmem:[#allocation1 + $0x4] ss:$9 sm:$0xff] %v1753_v10  ;;  %v1787_v10 = vperm.slane %v1226_v58, 6 }
 0x517   :  { %2330 = vst [vmem:[#allocation1 + $0x5] ss:$9 sm:$0xff] %v1754_v2  ;;  %v1788_v2 = vperm.slane %v1226_v58, 7 }
 0x518   :  { %2331 = vst [vmem:[#allocation1 + $0x6] ss:$9 sm:$0xff] %v1755_v33  ;;  %v1789_v33 = vperm.slane %v1227_v24, 0 }
 0x519   :  { %2332 = vst [vmem:[#allocation1 + $0x7] ss:$9 sm:$0xff] %v1756_v11  ;;  %v1790_v11 = vperm.slane %v1227_v24, 1 }
 0x520   :  { %v2333_v20 = vld [vmem:[#allocation1] sm:$0xff] }
 0x521   :  { %2560 = vperm.xlu1 %2770, %v2333_v20   ;;  %2334 = vst [vmem:[#allocation1] ss:$9 sm:$0xff] %v1757_v16  ;;  %v1791_v16 = vperm.slane %v1227_v24, 2  ;;  %v1793_v20 = vperm.slane %v1227_v24, 4 }
 0x522   :  { %2335 = vst [vmem:[#allocation1 + $0x1] ss:$9 sm:$0xff] %v1758_v63  ;;  %v1792_v63 = vperm.slane %v1227_v24, 3 }
 0x523   :  { %2336 = vst [vmem:[#allocation1 + $0x2] ss:$9 sm:$0xff] %v1759_v45  ;;  %v1794_v45 = vperm.slane %v1227_v24, 5 }
 0x524   :  { %2337 = vst [vmem:[#allocation1 + $0x3] ss:$9 sm:$0xff] %v1760_v37  ;;  %v1795_v37 = vperm.slane %v1227_v24, 6 }
 0x525   :  { %2338 = vst [vmem:[#allocation1 + $0x4] ss:$9 sm:$0xff] %v1761_v52  ;;  %v1796_v52 = vperm.slane %v1227_v24, 7 }
 0x526   :  { %2339 = vst [vmem:[#allocation1 + $0x5] ss:$9 sm:$0xff] %v1762_v41  ;;  %v1797_v41 = vperm.slane %v1228_v12, 0 }
 0x527   :  { %2340 = vst [vmem:[#allocation1 + $0x6] ss:$9 sm:$0xff] %v1763_v18  ;;  %v1798_v18 = vperm.slane %v1228_v12, 1 }
 0x528   :  { %2341 = vst [vmem:[#allocation1 + $0x7] ss:$9 sm:$0xff] %v1764_v56 }
 0x52f   :  { %v2342_v43 = vld [vmem:[#allocation1] sm:$0xff] }
 0x530   :  { %2563 = vperm.xlu0 %2769, %v2342_v43   ;;  %2343 = vst [vmem:[#allocation1] ss:$9 sm:$0xff] %v1765_v31  ;;  %v1800_v31 = vperm.slane %v1228_v12, 3  ;;  %v1802_v43 = vperm.slane %v1228_v12, 5 }
 0x531   :  { %2344 = vst [vmem:[#allocation1 + $0x1] ss:$9 sm:$0xff] %v1766_v6  ;;  %v1801_v6 = vperm.slane %v1228_v12, 4 }
 0x532   :  { %2345 = vst [vmem:[#allocation1 + $0x2] ss:$9 sm:$0xff] %v1767_v0  ;;  %v1803_v0 = vperm.slane %v1228_v12, 6 }
 0x533   :  { %2346 = vst [vmem:[#allocation1 + $0x3] ss:$9 sm:$0xff] %v1768_v14  ;;  %v1804_v14 = vperm.slane %v1228_v12, 7 }
 0x534   :  { %2347 = vst [vmem:[#allocation1 + $0x4] ss:$9 sm:$0xff] %v1769_v27 }
 0x535   :  { %2348 = vst [vmem:[#allocation1 + $0x5] ss:$9 sm:$0xff] %v1770_v60  ;;  %v2495_v60 = vpop.permute.xlu2 %2494 }
 0x536   :  { %2349 = vst [vmem:[#allocation1 + $0x6] ss:$9 sm:$0xff] %v1771_v48  ;;  %v2498_v48 = vpop.permute.xlu1 %2497 }
 0x537   :  { %2350 = vst [vmem:[#allocation1 + $0x7] ss:$9 sm:$0xff] %v1772_v40  ;;  %v2501_v40 = vpop.permute.xlu0 %2500 }
 0x53d   :  { %v2504_v8 = vpop.permute.xlu2 %2503 }
 0x53e   :  { %v2351_v13 = vld [vmem:[#allocation1] sm:$0xff] }
 0x53f   :  { %2566 = vperm.xlu2 %2771, %v2351_v13   ;;  %2352 = vst [vmem:[#allocation1] ss:$9 sm:$0xff] %v1773_v46  ;;  %v2507_v46 = vpop.permute.xlu1 %2506 }
 0x540   :  { %2353 = vst [vmem:[#allocation1 + $0x1] ss:$9 sm:$0xff] %v1774_v35  ;;  %v2510_v35 = vpop.permute.xlu0 %2509 }
 0x541   :  { %2354 = vst [vmem:[#allocation1 + $0x2] ss:$9 sm:$0xff] %v1775_v36 }
 0x542   :  { %2355 = vst [vmem:[#allocation1 + $0x3] ss:$9 sm:$0xff] %v1776_v25 }
 0x543   :  { %2356 = vst [vmem:[#allocation1 + $0x4] ss:$9 sm:$0xff] %v1777_v4 }
 0x544   :  { %2357 = vst [vmem:[#allocation1 + $0x5] ss:$9 sm:$0xff] %v1778_v32 }
 0x545   :  { %2358 = vst [vmem:[#allocation1 + $0x6] ss:$9 sm:$0xff] %v1779_v42  ;;  %v2513_v13 = vpop.permute.xlu2 %2512 }
 0x546   :  { %2359 = vst [vmem:[#allocation1 + $0x7] ss:$9 sm:$0xff] %v1780_v44 }
 0x547   :  { %v2516_v36 = vpop.permute.xlu1 %2515 }
 0x548   :  { %v2519_v25 = vpop.permute.xlu0 %2518 }
 0x54d   :  { %v2360_v61 = vld [vmem:[#allocation1] sm:$0xff]  ;;  %v4796_v4 = vpop.permute.xlu2 %2521 }
 0x54e   :  { %2569 = vperm.xlu1 %2770, %v2360_v61   ;;  %2361 = vst [vmem:[#allocation1] ss:$9 sm:$0xff] %v1781_v5 }
 0x54f   :  { %2362 = vst [vmem:[#allocation1 + $0x1] ss:$9 sm:$0xff] %v1782_v55  ;;  %v4798_v32 = vpop.permute.xlu1 %2524 }
 0x550   :  { %2363 = vst [vmem:[#allocation1 + $0x2] ss:$9 sm:$0xff] %v1783_v26  ;;  %v4800_v42 = vpop.permute.xlu0 %2527 }
 0x551   :  { %2364 = vst [vmem:[#allocation1 + $0x3] ss:$9 sm:$0xff] %v1784_v15 }
 0x552   :  { %2365 = vst [vmem:[#allocation1 + $0x4] ss:$9 sm:$0xff] %v1785_v34  ;;  %v2677_v34 = vperm.slane %v2492_v39, %v4650_v22 }
 0x553   :  { %2366 = vst [vmem:[#allocation1 + $0x5] ss:$9 sm:$0xff] %v1786_v49 }
 0x554   :  { %2367 = vst [vmem:[#allocation1 + $0x6] ss:$9 sm:$0xff] %v1787_v10 }
 0x555   :  { %2368 = vst [vmem:[#allocation1 + $0x7] ss:$9 sm:$0xff] %v1788_v2  ;;  %v4802_v44 = vpop.permute.xlu2 %2530 }
 0x557   :  { %v2534_v58 = vpop.permute.xlu1 %2533 }
 0x558   :  { %v2537_v5 = vpop.permute.xlu0 %2536  ;;  %v2705_v24 = vperm.slane %v2534_v58, %v4647_v59 }
 0x559   :  { %v2706_v49 = vperm.slane %v2537_v5, %v4656_v28 }
 0x55c   :  { %v2369_v62 = vld [vmem:[#allocation1] sm:$0xff] }
 0x55d   :  { %2572 = vperm.xlu0 %2769, %v2369_v62   ;;  %2370 = vst [vmem:[#allocation1] ss:$9 sm:$0xff] %v1789_v33  ;;  %v2540_v55 = vpop.permute.xlu2 %2539  ;;  %v2678_v33 = vsel %vm2589_vm2, %v2677_v34, %v4776_v53  ;;  %v2679_v62 = vperm.slane %v2495_v60, %v4653_v47  ;;  %v2693_v60 = vperm.slane %v2516_v36, %v4693_v51 }
 0x55e   :  { %2371 = vst [vmem:[#allocation1 + $0x1] ss:$9 sm:$0xff] %v1790_v11  ;;  %v2681_v11 = vperm.slane %v2498_v48, %v4670_v54 }
 0x55f   :  { %2372 = vst [vmem:[#allocation1 + $0x2] ss:$9 sm:$0xff] %v1791_v16  ;;  %v2543_v61 = vpop.permute.xlu1 %2542  ;;  %v2683_v16 = vperm.slane %v2501_v40, %v4667_v50  ;;  %v2691_v40 = vperm.slane %v2513_v13, %v4699_v17 }
 0x560   :  { %2373 = vst [vmem:[#allocation1 + $0x3] ss:$9 sm:$0xff] %v1792_v63  ;;  %v2546_v26 = vpop.permute.xlu0 %2545  ;;  %v2707_v63 = vsel %vm2585_vm1, %v2706_v49, %v2705_v24  ;;  %vm2741_vm1 = vcmask 1042434  }
 0x561   :  { %2374 = vst [vmem:[#allocation1 + $0x4] ss:$9 sm:$0xff] %v1793_v20  ;;  %v2710_v20 = vperm.slane %v2543_v61, %v4653_v47  ;;  %v2712_v28 = vperm.slane %v2546_v26, %v4670_v54  ;;  %v2685_v47 = vperm.slane %v2504_v8, %v4684_v57 }
 0x562   :  { %2375 = vst [vmem:[#allocation1 + $0x5] ss:$9 sm:$0xff] %v1794_v45  ;;  %v2708_v45 = vperm.slane %v2540_v55, %v4650_v22  ;;  %v2689_v22 = vperm.slane %v2510_v35, %v4681_v23 }
 0x563   :  { %2376 = vst [vmem:[#allocation1 + $0x6] ss:$9 sm:$0xff] %v1795_v37  ;;  %v2680_v37 = vsel %vm2593_vm3, %v2679_v62, %v2678_v33 }
 0x564   :  { %2377 = vst [vmem:[#allocation1 + $0x7] ss:$9 sm:$0xff] %v1796_v52  ;;  %v2682_v52 = vsel %vm2597_vm4, %v2681_v11, %v2680_v37  ;;  %v2709_v53 = vsel %vm2589_vm2, %v2708_v45, %v2707_v63  ;;  %vm2743_vm2 = vcmask 1041408  }
 0x565   :  { %v2549_v15 = vpop.permute.xlu2 %2548  ;;  %v2684_v12 = vsel %vm2601_vm5, %v2683_v16, %v2682_v52 }
 0x567   :  { %v2552_v10 = vpop.permute.xlu1 %2551 }
 0x56b   :  { %v2378_v56 = vld [vmem:[#allocation1] sm:$0xff] }
 0x56c   :  { %2575 = vperm.xlu2 %2771, %v2378_v56   ;;  %2379 = vst [vmem:[#allocation1] ss:$9 sm:$0xff] %v1797_v41  ;;  %v2687_v41 = vperm.slane %v2507_v46, %v4677_v29 }
 0x56d   :  { %2380 = vst [vmem:[#allocation1 + $0x1] ss:$9 sm:$0xff] %v1798_v18  ;;  %v2558_v59 = vpop.permute.xlu2 %2557  ;;  %v2711_v18 = vsel %vm2593_vm3, %v2710_v20, %v2709_v53  ;;  %vm2748_vm3 = vcmp.lt.s32.totalorder %v2580_v19, 512 }
 0x56e   :  { %2381 = vst [vmem:[#allocation1 + $0x2] ss:$9 sm:$0xff] %v1799_v21  ;;  %v2713_v54 = vsel %vm2597_vm4, %v2712_v28, %v2711_v18  ;;  %v2716_v21 = vperm.slane %v2552_v10, %v4684_v57  ;;  %v2695_v57 = vperm.slane %v2519_v25, %v4696_v3  ;;  %v2720_v46 = vperm.slane %v2558_v59, %v4681_v23 }
 0x56f   :  { %2382 = vst [vmem:[#allocation1 + $0x3] ss:$9 sm:$0xff] %v1800_v31  ;;  %v2699_v25 = vperm.slane %v4798_v32, %v4709_v30  ;;  %v2697_v23 = vperm.slane %v4796_v4, %v4715_v38 }
 0x570   :  { %2383 = vst [vmem:[#allocation1 + $0x4] ss:$9 sm:$0xff] %v1801_v6  ;;  %v2714_v6 = vperm.slane %v2549_v15, %v4667_v50 }
 0x571   :  { %2384 = vst [vmem:[#allocation1 + $0x5] ss:$9 sm:$0xff] %v1802_v43 }
 0x572   :  { %2385 = vst [vmem:[#allocation1 + $0x6] ss:$9 sm:$0xff] %v1803_v0  ;;  %v2686_v0 = vsel %vm2605_vm6, %v2685_v47, %v2684_v12 }
 0x573   :  { %2386 = vst [vmem:[#allocation1 + $0x7] ss:$9 sm:$0xff] %v1804_v14  ;;  %v2688_v14 = vsel %vm2609_vm7, %v2687_v41, %v2686_v0 }
 0x574   :  { %v2690_v39 = vsel %vm2613_vm8, %v2689_v22, %v2688_v14 }
 0x575   :  { %v2555_v2 = vpop.permute.xlu0 %2554  ;;  %v2692_v58 = vsel %vm2617_vm9, %v2691_v40, %v2690_v39 }
 0x576   :  { %v2718_v43 = vperm.slane %v2555_v2, %v4677_v29  ;;  %v2694_v36 = vsel %vm2621_vm10, %v2693_v60, %v2692_v58 }
 0x577   :  { %v2696_v13 = vsel %vm2625_vm11, %v2695_v57, %v2694_v36 }
 0x578   :  { %v2698_v10 = vsel %vm2629_vm12, %v2697_v23, %v2696_v13 }
 0x579   :  { %v2700_v32 = vsel %vm2633_vm13, %v2699_v25, %v2698_v10 }
 0x57a   :  { %v2387_v27 = vld [vmem:[#allocation1] sm:$0xff] }
 0x57b   :  { %2578 = vperm.xlu1 %2770, %v2387_v27   ;;  %v2715_v27 = vsel %vm2601_vm5, %v2714_v6, %v2713_v54 }
 0x57c   :  { %v2717_v48 = vsel %vm2605_vm6, %v2716_v21, %v2715_v27 }
 0x57d   :  { %v2719_v50 = vsel %vm2609_vm7, %v2718_v43, %v2717_v48 }
 0x57e   :  { %v2721_v55 = vsel %vm2613_vm8, %v2720_v46, %v2719_v50 }
 0x593   :  { %v2561_v56 = vpop.permute.xlu1 %2560 }
 0x594   :  { %v2722_v29 = vperm.slane %v2561_v56, %v4699_v17 }
 0x596   :  { %v2723_v26 = vsel %vm2617_vm9, %v2722_v29, %v2721_v55 }
 0x599   :  { %v2567_v8 = vpop.permute.xlu2 %2566 }
 0x59a   :  { %v2726_v34 = vperm.slane %v2567_v8, %v4696_v3 }
 0x5a2   :  { %v2564_v31 = vpop.permute.xlu0 %2563 }
 0x5a3   :  { %v2724_v35 = vperm.slane %v2564_v31, %v4693_v51  ;;  %v2701_v51 = vperm.slane %v4800_v42, %v4712_v7  ;;  %v2703_v42 = vperm.slane %v4802_v44, %v4724_v9 }
 0x5a5   :  { %v2725_v17 = vsel %vm2621_vm10, %v2724_v35, %v2723_v26  ;;  %v2702_v4 = vsel %vm2637_vm14, %v2701_v51, %v2700_v32 }
 0x5a6   :  { %v2727_v24 = vsel %vm2625_vm11, %v2726_v34, %v2725_v17 }
 0x5c0   :  { %v2570_v5 = vpop.permute.xlu1 %2569 }
 0x5c1   :  { %v2728_v15 = vperm.slane %v2570_v5, %v4715_v38 }
 0x5c3   :  { %v2729_v33 = vsel %vm2629_vm12, %v2728_v15, %v2727_v24 }
 0x5c6   :  { %v2576_v2 = vpop.permute.xlu2 %2575 }
 0x5c7   :  { %v2732_v3 = vperm.slane %v2576_v2, %v4712_v7 }
 0x5cf   :  { %v2573_v61 = vpop.permute.xlu0 %2572 }
 0x5d0   :  { %v2730_v49 = vperm.slane %v2573_v61, %v4709_v30  ;;  %v2704_v30 = vsel %vm2641_vm15, %v2703_v42, %v2702_v4 }
 0x5d1   :  { %v2737_v44 = vrot.slane %v2704_v30, 6 }
 0x5d2   :  { %v2731_v38 = vsel %vm2633_vm13, %v2730_v49, %v2729_v33 }
 0x5d3   :  { %v2733_v16 = vsel %vm2637_vm14, %v2732_v3, %v2731_v38 }
 0x5ed   :  { %v2579_v11 = vpop.permute.xlu1 %2578 }
 0x5ee   :  { %v2734_v62 = vperm.slane %v2579_v11, %v4724_v9 }
 0x5f0   :  { %v2735_v63 = vsel %vm2641_vm15, %v2734_v62, %v2733_v16 }
 0x5f1   :  { %v2738_v20 = vrot.slane %v2735_v63, 5 }
 0x5f3   :  { %v2742_v7 = vsel %vm2741_vm1, %v2737_v44, %v2738_v20 }
 0x5f4   :  { %v2744_v9 = vsel %vm2743_vm2, %v4784_v1, %v2742_v7 }
 0x5f5   :  { %2750 = vst.msk [vmem:[#allocation2] sm:$0xf] %vm2748_vm3, %v2744_v9 }
 0x5f6   :  { %2761 = dma.vmem_to_hbm [thread:$0]  %s2757_s8, 64, %s2759_s11, [#allocation3]  }
 0x5f7   :  { %3052 = dma.done.wait [#allocation3], 64  }
 0x5f8   :  { %3053 = vsyncadd [#allocation3], 4294967232 }
 0x5f9   :  { %2766 = vsyncpa [#allocation3], 1 }

</bundles_post_ra>
